<compile_context>
chip_gen: v7x
topology: tpu7x:2x2x1
jax: 0.10.0
libtpu: 0.0.40
codegen_flags: <defaults>
</compile_context>

<pallas_src>
import functools
import math

import jax
import jax.numpy as jnp
from jax.experimental import pallas as pl
from jax.experimental.pallas import tpu as pltpu  # noqa: F401  (kept for parity)


# ------------------------------ Pallas kernel -------------------------------

def _layernorm(h, g, b, eps=1e-5):
    # LayerNorm over last dim, PyTorch defaults (eps=1e-5, biased variance).
    mu = jnp.mean(h, axis=-1, keepdims=True)
    var = jnp.mean((h - mu) * (h - mu), axis=-1, keepdims=True)
    return (h - mu) * jax.lax.rsqrt(var + eps) * g + b


def _fused_forward_kernel(B, S, n_heads, n_qlayers, scale, use_gnn, use_mask,
                          *refs):
    """Whole forward pass in one block:
       surviving 1x1 conv -> quantum layer -> GNN -> per-head attention ->
       out-proj + residual + LN1 + FFN + residual + LN2 -> token & task heads.
    """
    it = iter(refs)
    x_ref = next(it)
    w_b1_ref = next(it); b_b1_ref = next(it)
    rcos_ref = next(it); rsin_ref = next(it)
    esin_ref = next(it); ecos_ref = next(it)
    perm_ref = next(it)
    if use_gnn:
        adj_ref = next(it)
        g1w_ref = next(it); g1b_ref = next(it)
        g2w_ref = next(it); g2b_ref = next(it)
    wq_ref = next(it); wk_ref = next(it); wv_ref = next(it)
    bq_ref = next(it); bk_ref = next(it); bv_ref = next(it)
    wo_ref = next(it); bo_ref = next(it)
    if use_mask:
        mask_ref = next(it)
    ln1g_ref = next(it); ln1b_ref = next(it)
    w1_ref = next(it); bf1_ref = next(it)
    w2_ref = next(it); bf2_ref = next(it)
    ln2g_ref = next(it); ln2b_ref = next(it)
    wtok_ref = next(it); btok_ref = next(it)
    mavg_ref = next(it)
    wtask_ref = next(it); btask_ref = next(it)
    tok_ref = next(it); task_ref = next(it)

    # ---- Inception (dead-code-eliminated): only the first n_qubits (=d_model)
    # output channels of branch1x1 survive the quantum-layer truncation. ----
    x = jnp.dot(x_ref[...], w_b1_ref[...],
                preferred_element_type=jnp.float32) + b_b1_ref[...]      # (M, D)

    # ---- Quantum layer: sin(x+r0)+sin(x+r1)+sin(x+r2) rewritten as
    # sin(x)*SUM cos(r_i) + cos(x)*SUM sin(r_i); sums precomputed in wrapper.
    rcos = rcos_ref[...]; rsin = rsin_ref[...]
    esin = esin_ref[...]; ecos = ecos_ref[...]
    perm = perm_ref[...]
    for l in range(n_qlayers):
        x = jnp.sin(x) * rcos[l:l + 1, :] + jnp.cos(x) * rsin[l:l + 1, :]
        # torch.roll(x, 1, -1) expressed as a (nq, nq) permutation matmul: the
        # lane dim (32) is < 128 so a pltpu.roll lowering is not guaranteed.
        # TODO(synk): switch to pltpu.roll once the qubit dim is 128-aligned.
        x_shift = jnp.dot(x, perm, preferred_element_type=jnp.float32)
        # esin/ecos last column is 0, which also realizes the F.pad(...,0).
        x = x * esin[l:l + 1, :] + x_shift * ecos[l:l + 1, :]

    # ---- Graph neural network (per-batch, sublane-aligned row slices). ----
    if use_gnn:
        g1w = g1w_ref[...]; g1b = g1b_ref[...]
        g2w = g2w_ref[...]; g2b = g2b_ref[...]
        rows = []
        for b in range(B):
            xb = x[b * S:(b + 1) * S, :]
            ab = adj_ref[b]                                          # (S, S)
            ax = jnp.dot(ab, xb, preferred_element_type=jnp.float32)
            hb = jnp.maximum(
                jnp.dot(ax, g1w, preferred_element_type=jnp.float32) + g1b, 0.0)
            ax2 = jnp.dot(ab, hb, preferred_element_type=jnp.float32)
            rows.append(jnp.dot(ax2, g2w,
                                preferred_element_type=jnp.float32) + g2b)
        x = jnp.concatenate(rows, axis=0)                            # (M, D)

    d_model = x.shape[-1]

    # ---- Multi-head attention.  Per-head weights are pre-sliced in the
    # wrapper; the per-head context is folded straight into the output
    # projection, so no (B*H, S, 8) layout or lane-offset assembly exists. ----
    bo = bo_ref[...]
    if use_mask:
        m = mask_ref[...]                                            # (B, S)
    attn_rows = []
    for b in range(B):
        xb = x[b * S:(b + 1) * S, :]                                 # (S, D)
        if use_mask:
            # Faithful to the PyTorch reference: the ADDITIVE mask
            # (1-mask)*-1e4 is fed to masked_fill(mask == 0, -1e9), so the
            # positions whose additive mask is 0 (attention_mask == 1) get -1e9.
            add = (1.0 - m[b:b + 1, :]) * -10000.0                   # (1, S)
        acc = jnp.zeros((S, d_model), jnp.float32)
        for h in range(n_heads):
            q = jnp.dot(xb, wq_ref[h],
                        preferred_element_type=jnp.float32) + bq_ref[h]
            k = jnp.dot(xb, wk_ref[h],
                        preferred_element_type=jnp.float32) + bk_ref[h]
            v = jnp.dot(xb, wv_ref[h],
                        preferred_element_type=jnp.float32) + bv_ref[h]
            s = jax.lax.dot_general(
                q, k, (((1,), (1,)), ((), ())),
                preferred_element_type=jnp.float32) * scale          # (S, S)
            if use_mask:
                s = jnp.where(add == 0.0, -1e9, s)
            s = s - jnp.max(s, axis=-1, keepdims=True)
            p = jnp.exp(s)
            p = p * pl.reciprocal(jnp.sum(p, axis=-1, keepdims=True), approx=True)
            ctx = jnp.dot(p, v, preferred_element_type=jnp.float32)  # (S, hd)
            acc = acc + jnp.dot(ctx, wo_ref[h],
                                preferred_element_type=jnp.float32)
        attn_rows.append(acc + bo)
    attn = jnp.concatenate(attn_rows, axis=0)                        # (M, D)

    # ---- residual + LN1 + FFN + residual + LN2 + output heads ----
    h1 = _layernorm(x + attn, ln1g_ref[...], ln1b_ref[...])
    ff = jnp.maximum(jnp.dot(h1, w1_ref[...],
                             preferred_element_type=jnp.float32) + bf1_ref[...],
                     0.0)
    ff = jnp.dot(ff, w2_ref[...], preferred_element_type=jnp.float32) + bf2_ref[...]
    h2 = _layernorm(h1 + ff, ln2g_ref[...], ln2b_ref[...])

    # Token head (weight/bias padded to a 128-lane-dense N in prepare_params).
    tok_ref[...] = jnp.dot(h2, wtok_ref[...],
                           preferred_element_type=jnp.float32) + btok_ref[...]
    # Task head: sequence mean expressed as a precomputed (B, M) averaging
    # matmul; output N also padded to 128 lanes.
    xm = jnp.dot(mavg_ref[...], h2, preferred_element_type=jnp.float32)
    task_ref[...] = jnp.dot(xm, wtask_ref[...],
                            preferred_element_type=jnp.float32) + btask_ref[...]


# ----------------------------- parameter setup ------------------------------

def init_params(key, vocab_size, d_model, n_heads, num_tasks):
    ks = iter(jax.random.split(key, 64))

    def nrm(shape, scale=0.05):
        return scale * jax.random.normal(next(ks), shape, dtype=jnp.float32)

    p = {}
    p['embedding'] = nrm((vocab_size, d_model), 0.02)
    # Inception module params (full set kept to mirror the module's
    # parameterization; b3*/b5*/bp* are provably dead for n_qubits <= 64).
    oc = [64, 96, 128, 16, 32, 32]
    p['b1_w'] = nrm((oc[0], d_model, 1)); p['b1_b'] = nrm((oc[0],))
    p['b3a_w'] = nrm((oc[1], d_model, 1)); p['b3a_b'] = nrm((oc[1],))
    p['b3b_w'] = nrm((oc[2], oc[1], 3));   p['b3b_b'] = nrm((oc[2],))
    p['b5a_w'] = nrm((oc[3], d_model, 1)); p['b5a_b'] = nrm((oc[3],))
    p['b5b_w'] = nrm((oc[4], oc[3], 5));   p['b5b_b'] = nrm((oc[4],))
    p['bp_w'] = nrm((oc[5], d_model, 1));  p['bp_b'] = nrm((oc[5],))
    # Quantum layer (n_qubits = d_model, n_layers = 2)
    n_qubits, n_qlayers = d_model, 2
    p['q_rot'] = jax.random.normal(next(ks), (n_qlayers, n_qubits, 3), jnp.float32)
    p['q_ent'] = jax.random.normal(next(ks), (n_qlayers, n_qubits - 1), jnp.float32)
    # GNN
    h = d_model // 2
    p['gnn1_w'] = nrm((h, d_model));  p['gnn1_b'] = nrm((h,))
    p['gnn2_w'] = nrm((d_model, h));  p['gnn2_b'] = nrm((d_model,))
    # Multi-head attention
    for nm in ('q', 'k', 'v', 'out'):
        p[f'att_{nm}_w'] = nrm((d_model, d_model))
        p[f'att_{nm}_b'] = nrm((d_model,))
    # Feed forward
    p['ff1_w'] = nrm((4 * d_model, d_model)); p['ff1_b'] = nrm((4 * d_model,))
    p['ff2_w'] = nrm((d_model, 4 * d_model)); p['ff2_b'] = nrm((d_model,))
    # LayerNorms (PyTorch init: ones / zeros)
    p['ln1_g'] = jnp.ones((d_model,), jnp.float32)
    p['ln1_b'] = jnp.zeros((d_model,), jnp.float32)
    p['ln2_g'] = jnp.ones((d_model,), jnp.float32)
    p['ln2_b'] = jnp.zeros((d_model,), jnp.float32)
    # Heads
    p['out_w'] = nrm((vocab_size, d_model)); p['out_b'] = nrm((vocab_size,))
    p['task_w'] = nrm((num_tasks, d_model)); p['task_b'] = nrm((num_tasks,))
    return p


def prepare_params(params, B, S, d_model, n_heads):
    """One-time, hoisted preprocessing: transposes, per-head slicing, trig
    sums, roll-permutation, averaging matrix, lane-dense (128) output padding.
    Call ONCE; the jitted forward only consumes the prepared arrays."""
    f32 = lambda a: jnp.asarray(a, jnp.float32)
    nq = d_model
    hd = d_model // n_heads
    vocab = params['out_w'].shape[0]
    ntasks = params['task_w'].shape[0]
    Vp = max(128, ((vocab + 127) // 128) * 128)
    Tp = max(128, ((ntasks + 127) // 128) * 128)

    prep = {}
    prep['embedding'] = f32(params['embedding'])
    # Surviving slice of branch1x1 (first nq output channels), as (D, nq).
    prep['w_b1'] = f32(params['b1_w'][:nq, :, 0]).T
    prep['b_b1'] = f32(params['b1_b'][:nq]).reshape(1, -1)
    # Quantum layer: per-layer SUM_i cos(r_i) / SUM_i sin(r_i), padded ent trig.
    rot = f32(params['q_rot'])                                     # (L, nq, 3)
    prep['rcos'] = jnp.sum(jnp.cos(rot), axis=-1)
    prep['rsin'] = jnp.sum(jnp.sin(rot), axis=-1)
    ent = f32(params['q_ent'])                                     # (L, nq-1)
    prep['esin'] = jnp.pad(jnp.sin(ent), ((0, 0), (0, 1)))
    prep['ecos'] = jnp.pad(jnp.cos(ent), ((0, 0), (0, 1)))
    # x @ perm == torch.roll(x, 1, dims=-1)
    prep['perm'] = jax.nn.one_hot((jnp.arange(nq) + 1) % nq, nq, dtype=jnp.float32)
    # GNN
    prep['g1w'] = f32(params['gnn1_w']).T
    prep['g1b'] = f32(params['gnn1_b']).reshape(1, -1)
    prep['g2w'] = f32(params['gnn2_w']).T
    prep['g2b'] = f32(params['gnn2_b']).reshape(1, -1)

    # Attention: pre-sliced per-head weights, stacked on a leading head axis.
    def per_head(w):   # torch (out, in) -> (H, D, hd)
        return f32(w).T.reshape(d_model, n_heads, hd).transpose(1, 0, 2)

    prep['wq_h'] = per_head(params['att_q_w'])
    prep['wk_h'] = per_head(params['att_k_w'])
    prep['wv_h'] = per_head(params['att_v_w'])
    prep['bq_h'] = f32(params['att_q_b']).reshape(n_heads, 1, hd)
    prep['bk_h'] = f32(params['att_k_b']).reshape(n_heads, 1, hd)
    prep['bv_h'] = f32(params['att_v_b']).reshape(n_heads, 1, hd)
    prep['wo_h'] = f32(params['att_out_w']).T.reshape(n_heads, hd, d_model)
    prep['bo'] = f32(params['att_out_b']).reshape(1, -1)

    # Post block
    prep['ln1_g'] = f32(params['ln1_g']).reshape(1, -1)
    prep['ln1_b'] = f32(params['ln1_b']).reshape(1, -1)
    prep['w1'] = f32(params['ff1_w']).T
    prep['bf1'] = f32(params['ff1_b']).reshape(1, -1)
    prep['w2'] = f32(params['ff2_w']).T
    prep['bf2'] = f32(params['ff2_b']).reshape(1, -1)
    prep['ln2_g'] = f32(params['ln2_g']).reshape(1, -1)
    prep['ln2_b'] = f32(params['ln2_b']).reshape(1, -1)

    # Heads, zero-padded to 128-lane-dense N (sliced back in the wrapper).
    prep['wtok'] = jnp.pad(f32(params['out_w']).T, ((0, 0), (0, Vp - vocab)))
    prep['btok'] = jnp.pad(f32(params['out_b']).reshape(1, -1),
                           ((0, 0), (0, Vp - vocab)))
    prep['wtask'] = jnp.pad(f32(params['task_w']).T, ((0, 0), (0, Tp - ntasks)))
    prep['btask'] = jnp.pad(f32(params['task_b']).reshape(1, -1),
                            ((0, 0), (0, Tp - ntasks)))
    # (B, B*S) sequence-averaging matrix for the task head.
    prep['mavg'] = jnp.repeat(jnp.eye(B, dtype=jnp.float32), S, axis=1) / float(S)
    return prep


# -------------------------------- forward -----------------------------------

def advanced_neurocoder_forward(prep, input_ids, attention_mask=None,
                                adj_matrix=None, *, d_model=32, n_heads=4,
                                vocab_size=64, num_tasks=4):
    B, S = input_ids.shape
    M = B * S
    n_qlayers = prep['rcos'].shape[0]
    head_dim = d_model // n_heads
    Vp = prep['wtok'].shape[1]
    Tp = prep['wtask'].shape[1]

    # Dead-code elimination is only valid when the quantum layer truncates the
    # inception concat to a prefix of branch1x1's 64 output channels.
    assert d_model <= 64, (
        "d_model (= n_qubits) must be <= branch1x1 out_channels (64) for the "
        "DCE-specialized path")

    # Embedding lookup (gather) stays in XLA glue.
    x = prep['embedding'][input_ids.reshape(-1)]                   # (M, D)

    use_gnn = adj_matrix is not None
    use_mask = attention_mask is not None

    args = [x, prep['w_b1'], prep['b_b1'], prep['rcos'], prep['rsin'],
            prep['esin'], prep['ecos'], prep['perm']]
    if use_gnn:
        args += [jnp.asarray(adj_matrix, jnp.float32),
                 prep['g1w'], prep['g1b'], prep['g2w'], prep['g2b']]
    args += [prep['wq_h'], prep['wk_h'], prep['wv_h'],
             prep['bq_h'], prep['bk_h'], prep['bv_h'],
             prep['wo_h'], prep['bo']]
    if use_mask:
        args += [jnp.asarray(attention_mask, jnp.float32)]        # raw (B, S)
    args += [prep['ln1_g'], prep['ln1_b'], prep['w1'], prep['bf1'],
             prep['w2'], prep['bf2'], prep['ln2_g'], prep['ln2_b'],
             prep['wtok'], prep['btok'], prep['mavg'],
             prep['wtask'], prep['btask']]

    scale = 1.0 / math.sqrt(float(head_dim))
    tok_pad, task_pad = pl.pallas_call(
        functools.partial(_fused_forward_kernel, B, S, n_heads, n_qlayers,
                          scale, use_gnn, use_mask),
        out_shape=(jax.ShapeDtypeStruct((M, Vp), jnp.float32),
                   jax.ShapeDtypeStruct((B, Tp), jnp.float32)),
    )(*args)

    token_out = tok_pad[:, :vocab_size].reshape(B, S, vocab_size)
    task_out = task_pad[:, :num_tasks]
    return token_out, task_out


if __name__ == "__main__":
    key = jax.random.PRNGKey(0)
    vocab_size, d_model, n_heads, num_tasks = 64, 32, 4, 4
    B, S = 2, 8

    pkey, ikey, akey = jax.random.split(key, 3)
    params = init_params(pkey, vocab_size, d_model, n_heads, num_tasks)
    # One-time, hoisted parameter preparation (outside the jitted forward).
    prep = prepare_params(params, B, S, d_model, n_heads)

    input_ids = jax.random.randint(ikey, (B, S), 0, vocab_size)
    attention_mask = jnp.concatenate(
        [jnp.ones((B, S - 2), jnp.float32), jnp.zeros((B, 2), jnp.float32)], axis=-1)
    adj = jax.random.uniform(akey, (B, S, S), jnp.float32)
    adj_matrix = adj / jnp.sum(adj, axis=-1, keepdims=True)

    fwd = jax.jit(functools.partial(advanced_neurocoder_forward,
                                    d_model=d_model, n_heads=n_heads,
                                    vocab_size=vocab_size, num_tasks=num_tasks))
    token_out, task_out = fwd(prep, input_ids, attention_mask, adj_matrix)
    jax.block_until_ready((token_out, task_out))

    assert token_out.shape == (B, S, vocab_size)
    assert task_out.shape == (B, num_tasks)
    assert bool(jnp.all(jnp.isfinite(token_out))) and bool(jnp.all(jnp.isfinite(task_out)))
    print("KERNEL_OK")
</pallas_src>

<mosaic_0001>
module attributes {stable_mosaic.version = 11 : i64} {
  func.func @_fused_forward_kernel(%arg0: memref<16x32xf32, #tpu.memory_space<vmem>>, %arg1: memref<32x32xf32, #tpu.memory_space<vmem>>, %arg2: memref<1x32xf32, #tpu.memory_space<vmem>>, %arg3: memref<2x32xf32, #tpu.memory_space<vmem>>, %arg4: memref<2x32xf32, #tpu.memory_space<vmem>>, %arg5: memref<2x32xf32, #tpu.memory_space<vmem>>, %arg6: memref<2x32xf32, #tpu.memory_space<vmem>>, %arg7: memref<32x32xf32, #tpu.memory_space<vmem>>, %arg8: memref<2x8x8xf32, #tpu.memory_space<vmem>>, %arg9: memref<32x16xf32, #tpu.memory_space<vmem>>, %arg10: memref<1x16xf32, #tpu.memory_space<vmem>>, %arg11: memref<16x32xf32, #tpu.memory_space<vmem>>, %arg12: memref<1x32xf32, #tpu.memory_space<vmem>>, %arg13: memref<4x32x8xf32, #tpu.memory_space<vmem>>, %arg14: memref<4x32x8xf32, #tpu.memory_space<vmem>>, %arg15: memref<4x32x8xf32, #tpu.memory_space<vmem>>, %arg16: memref<4x1x8xf32, #tpu.memory_space<vmem>>, %arg17: memref<4x1x8xf32, #tpu.memory_space<vmem>>, %arg18: memref<4x1x8xf32, #tpu.memory_space<vmem>>, %arg19: memref<4x8x32xf32, #tpu.memory_space<vmem>>, %arg20: memref<1x32xf32, #tpu.memory_space<vmem>>, %arg21: memref<2x8xf32, #tpu.memory_space<vmem>>, %arg22: memref<1x32xf32, #tpu.memory_space<vmem>>, %arg23: memref<1x32xf32, #tpu.memory_space<vmem>>, %arg24: memref<32x128xf32, #tpu.memory_space<vmem>>, %arg25: memref<1x128xf32, #tpu.memory_space<vmem>>, %arg26: memref<128x32xf32, #tpu.memory_space<vmem>>, %arg27: memref<1x32xf32, #tpu.memory_space<vmem>>, %arg28: memref<1x32xf32, #tpu.memory_space<vmem>>, %arg29: memref<1x32xf32, #tpu.memory_space<vmem>>, %arg30: memref<32x128xf32, #tpu.memory_space<vmem>>, %arg31: memref<1x128xf32, #tpu.memory_space<vmem>>, %arg32: memref<2x16xf32, #tpu.memory_space<vmem>>, %arg33: memref<32x128xf32, #tpu.memory_space<vmem>>, %arg34: memref<1x128xf32, #tpu.memory_space<vmem>>, %arg35: memref<16x128xf32, #tpu.memory_space<vmem>>, %arg36: memref<2x128xf32, #tpu.memory_space<vmem>>) attributes {dimension_semantics = [], scalar_prefetch = 0 : i64, scratch_operands = 0 : i64, tpu.core_type = #tpu.core_type<tc>} {
    %c0 = arith.constant 0 : index
    %c0_0 = arith.constant 0 : index
    %0 = vector.load %arg0[%c0, %c0_0] : memref<16x32xf32, #tpu.memory_space<vmem>>, vector<16x32xf32>
    %c0_1 = arith.constant 0 : index
    %c0_2 = arith.constant 0 : index
    %1 = vector.load %arg1[%c0_1, %c0_2] : memref<32x32xf32, #tpu.memory_space<vmem>>, vector<32x32xf32>
    %cst = arith.constant dense<0.000000e+00> : vector<16x32xf32>
    %2 = tpu.matmul %0, %1, %cst {dimension_numbers = #tpu.dot_dimension_numbers<[1], [0], [0], [1], [0, 0, 1, 1], [], []>} : vector<16x32xf32>, vector<32x32xf32>, vector<16x32xf32> -> vector<16x32xf32>
    %c0_3 = arith.constant 0 : index
    %c0_4 = arith.constant 0 : index
    %3 = vector.load %arg2[%c0_3, %c0_4] : memref<1x32xf32, #tpu.memory_space<vmem>>, vector<1x32xf32>
    %4 = vector.broadcast %3 : vector<1x32xf32> to vector<16x32xf32>
    %5 = arith.addf %2, %4 : vector<16x32xf32>
    %c0_5 = arith.constant 0 : index
    %c0_6 = arith.constant 0 : index
    %6 = vector.load %arg3[%c0_5, %c0_6] : memref<2x32xf32, #tpu.memory_space<vmem>>, vector<2x32xf32>
    %c0_7 = arith.constant 0 : index
    %c0_8 = arith.constant 0 : index
    %7 = vector.load %arg4[%c0_7, %c0_8] : memref<2x32xf32, #tpu.memory_space<vmem>>, vector<2x32xf32>
    %c0_9 = arith.constant 0 : index
    %c0_10 = arith.constant 0 : index
    %8 = vector.load %arg5[%c0_9, %c0_10] : memref<2x32xf32, #tpu.memory_space<vmem>>, vector<2x32xf32>
    %c0_11 = arith.constant 0 : index
    %c0_12 = arith.constant 0 : index
    %9 = vector.load %arg6[%c0_11, %c0_12] : memref<2x32xf32, #tpu.memory_space<vmem>>, vector<2x32xf32>
    %c0_13 = arith.constant 0 : index
    %c0_14 = arith.constant 0 : index
    %10 = vector.load %arg7[%c0_13, %c0_14] : memref<32x32xf32, #tpu.memory_space<vmem>>, vector<32x32xf32>
    %11 = math.sin %5 : vector<16x32xf32>
    %12 = vector.extract_strided_slice %6 {offsets = [0, 0], sizes = [1, 32], strides = [1, 1]} : vector<2x32xf32> to vector<1x32xf32>
    %13 = vector.broadcast %12 : vector<1x32xf32> to vector<16x32xf32>
    %14 = arith.mulf %11, %13 : vector<16x32xf32>
    %15 = math.cos %5 : vector<16x32xf32>
    %16 = vector.extract_strided_slice %7 {offsets = [0, 0], sizes = [1, 32], strides = [1, 1]} : vector<2x32xf32> to vector<1x32xf32>
    %17 = vector.broadcast %16 : vector<1x32xf32> to vector<16x32xf32>
    %18 = arith.mulf %15, %17 : vector<16x32xf32>
    %19 = arith.addf %14, %18 : vector<16x32xf32>
    %cst_15 = arith.constant dense<0.000000e+00> : vector<16x32xf32>
    %20 = tpu.matmul %19, %10, %cst_15 {dimension_numbers = #tpu.dot_dimension_numbers<[1], [0], [0], [1], [0, 0, 1, 1], [], []>} : vector<16x32xf32>, vector<32x32xf32>, vector<16x32xf32> -> vector<16x32xf32>
    %21 = vector.extract_strided_slice %8 {offsets = [0, 0], sizes = [1, 32], strides = [1, 1]} : vector<2x32xf32> to vector<1x32xf32>
    %22 = vector.broadcast %21 : vector<1x32xf32> to vector<16x32xf32>
    %23 = arith.mulf %19, %22 : vector<16x32xf32>
    %24 = vector.extract_strided_slice %9 {offsets = [0, 0], sizes = [1, 32], strides = [1, 1]} : vector<2x32xf32> to vector<1x32xf32>
    %25 = vector.broadcast %24 : vector<1x32xf32> to vector<16x32xf32>
    %26 = arith.mulf %20, %25 : vector<16x32xf32>
    %27 = arith.addf %23, %26 : vector<16x32xf32>
    %28 = math.sin %27 : vector<16x32xf32>
    %29 = vector.extract_strided_slice %6 {offsets = [1, 0], sizes = [1, 32], strides = [1, 1]} : vector<2x32xf32> to vector<1x32xf32>
    %30 = vector.broadcast %29 : vector<1x32xf32> to vector<16x32xf32>
    %31 = arith.mulf %28, %30 : vector<16x32xf32>
    %32 = math.cos %27 : vector<16x32xf32>
    %33 = vector.extract_strided_slice %7 {offsets = [1, 0], sizes = [1, 32], strides = [1, 1]} : vector<2x32xf32> to vector<1x32xf32>
    %34 = vector.broadcast %33 : vector<1x32xf32> to vector<16x32xf32>
    %35 = arith.mulf %32, %34 : vector<16x32xf32>
    %36 = arith.addf %31, %35 : vector<16x32xf32>
    %cst_16 = arith.constant dense<0.000000e+00> : vector<16x32xf32>
    %37 = tpu.matmul %36, %10, %cst_16 {dimension_numbers = #tpu.dot_dimension_numbers<[1], [0], [0], [1], [0, 0, 1, 1], [], []>} : vector<16x32xf32>, vector<32x32xf32>, vector<16x32xf32> -> vector<16x32xf32>
    %38 = vector.extract_strided_slice %8 {offsets = [1, 0], sizes = [1, 32], strides = [1, 1]} : vector<2x32xf32> to vector<1x32xf32>
    %39 = vector.broadcast %38 : vector<1x32xf32> to vector<16x32xf32>
    %40 = arith.mulf %36, %39 : vector<16x32xf32>
    %41 = vector.extract_strided_slice %9 {offsets = [1, 0], sizes = [1, 32], strides = [1, 1]} : vector<2x32xf32> to vector<1x32xf32>
    %42 = vector.broadcast %41 : vector<1x32xf32> to vector<16x32xf32>
    %43 = arith.mulf %37, %42 : vector<16x32xf32>
    %44 = arith.addf %40, %43 : vector<16x32xf32>
    %c0_17 = arith.constant 0 : index
    %c0_18 = arith.constant 0 : index
    %45 = vector.load %arg9[%c0_17, %c0_18] : memref<32x16xf32, #tpu.memory_space<vmem>>, vector<32x16xf32>
    %c0_19 = arith.constant 0 : index
    %c0_20 = arith.constant 0 : index
    %46 = vector.load %arg10[%c0_19, %c0_20] : memref<1x16xf32, #tpu.memory_space<vmem>>, vector<1x16xf32>
    %c0_21 = arith.constant 0 : index
    %c0_22 = arith.constant 0 : index
    %47 = vector.load %arg11[%c0_21, %c0_22] : memref<16x32xf32, #tpu.memory_space<vmem>>, vector<16x32xf32>
    %c0_23 = arith.constant 0 : index
    %c0_24 = arith.constant 0 : index
    %48 = vector.load %arg12[%c0_23, %c0_24] : memref<1x32xf32, #tpu.memory_space<vmem>>, vector<1x32xf32>
    %49 = vector.extract_strided_slice %44 {offsets = [0, 0], sizes = [8, 32], strides = [1, 1]} : vector<16x32xf32> to vector<8x32xf32>
    %c0_25 = arith.constant 0 : index
    %c0_26 = arith.constant 0 : index
    %c0_27 = arith.constant 0 : index
    %50 = vector.load %arg8[%c0_25, %c0_26, %c0_27] : memref<2x8x8xf32, #tpu.memory_space<vmem>>, vector<1x8x8xf32>
    %51 = vector.shape_cast %50 : vector<1x8x8xf32> to vector<8x8xf32>
    %cst_28 = arith.constant dense<0.000000e+00> : vector<8x32xf32>
    %52 = tpu.matmul %51, %49, %cst_28 {dimension_numbers = #tpu.dot_dimension_numbers<[1], [0], [0], [1], [0, 0, 1, 1], [], []>} : vector<8x8xf32>, vector<8x32xf32>, vector<8x32xf32> -> vector<8x32xf32>
    %cst_29 = arith.constant dense<0.000000e+00> : vector<8x16xf32>
    %53 = tpu.matmul %52, %45, %cst_29 {dimension_numbers = #tpu.dot_dimension_numbers<[1], [0], [0], [1], [0, 0, 1, 1], [], []>} : vector<8x32xf32>, vector<32x16xf32>, vector<8x16xf32> -> vector<8x16xf32>
    %54 = vector.broadcast %46 : vector<1x16xf32> to vector<8x16xf32>
    %55 = arith.addf %53, %54 : vector<8x16xf32>
    %cst_30 = arith.constant 0.000000e+00 : f32
    %56 = vector.broadcast %cst_30 : f32 to vector<8x16xf32>
    %57 = arith.maximumf %55, %56 : vector<8x16xf32>
    %cst_31 = arith.constant dense<0.000000e+00> : vector<8x16xf32>
    %58 = tpu.matmul %51, %57, %cst_31 {dimension_numbers = #tpu.dot_dimension_numbers<[1], [0], [0], [1], [0, 0, 1, 1], [], []>} : vector<8x8xf32>, vector<8x16xf32>, vector<8x16xf32> -> vector<8x16xf32>
    %cst_32 = arith.constant dense<0.000000e+00> : vector<8x32xf32>
    %59 = tpu.matmul %58, %47, %cst_32 {dimension_numbers = #tpu.dot_dimension_numbers<[1], [0], [0], [1], [0, 0, 1, 1], [], []>} : vector<8x16xf32>, vector<16x32xf32>, vector<8x32xf32> -> vector<8x32xf32>
    %60 = vector.broadcast %48 : vector<1x32xf32> to vector<8x32xf32>
    %61 = arith.addf %59, %60 : vector<8x32xf32>
    %62 = vector.extract_strided_slice %44 {offsets = [8, 0], sizes = [8, 32], strides = [1, 1]} : vector<16x32xf32> to vector<8x32xf32>
    %c1 = arith.constant 1 : index
    %c0_33 = arith.constant 0 : index
    %c0_34 = arith.constant 0 : index
    %63 = vector.load %arg8[%c1, %c0_33, %c0_34] : memref<2x8x8xf32, #tpu.memory_space<vmem>>, vector<1x8x8xf32>
    %64 = vector.shape_cast %63 : vector<1x8x8xf32> to vector<8x8xf32>
    %cst_35 = arith.constant dense<0.000000e+00> : vector<8x32xf32>
    %65 = tpu.matmul %64, %62, %cst_35 {dimension_numbers = #tpu.dot_dimension_numbers<[1], [0], [0], [1], [0, 0, 1, 1], [], []>} : vector<8x8xf32>, vector<8x32xf32>, vector<8x32xf32> -> vector<8x32xf32>
    %cst_36 = arith.constant dense<0.000000e+00> : vector<8x16xf32>
    %66 = tpu.matmul %65, %45, %cst_36 {dimension_numbers = #tpu.dot_dimension_numbers<[1], [0], [0], [1], [0, 0, 1, 1], [], []>} : vector<8x32xf32>, vector<32x16xf32>, vector<8x16xf32> -> vector<8x16xf32>
    %67 = vector.broadcast %46 : vector<1x16xf32> to vector<8x16xf32>
    %68 = arith.addf %66, %67 : vector<8x16xf32>
    %cst_37 = arith.constant 0.000000e+00 : f32
    %69 = vector.broadcast %cst_37 : f32 to vector<8x16xf32>
    %70 = arith.maximumf %68, %69 : vector<8x16xf32>
    %cst_38 = arith.constant dense<0.000000e+00> : vector<8x16xf32>
    %71 = tpu.matmul %64, %70, %cst_38 {dimension_numbers = #tpu.dot_dimension_numbers<[1], [0], [0], [1], [0, 0, 1, 1], [], []>} : vector<8x8xf32>, vector<8x16xf32>, vector<8x16xf32> -> vector<8x16xf32>
    %cst_39 = arith.constant dense<0.000000e+00> : vector<8x32xf32>
    %72 = tpu.matmul %71, %47, %cst_39 {dimension_numbers = #tpu.dot_dimension_numbers<[1], [0], [0], [1], [0, 0, 1, 1], [], []>} : vector<8x16xf32>, vector<16x32xf32>, vector<8x32xf32> -> vector<8x32xf32>
    %73 = vector.broadcast %48 : vector<1x32xf32> to vector<8x32xf32>
    %74 = arith.addf %72, %73 : vector<8x32xf32>
    %75 = tpu.concatenate %61, %74 in 0 : vector<8x32xf32>, vector<8x32xf32> -> vector<16x32xf32>
    %c0_40 = arith.constant 0 : index
    %c0_41 = arith.constant 0 : index
    %76 = vector.load %arg20[%c0_40, %c0_41] : memref<1x32xf32, #tpu.memory_space<vmem>>, vector<1x32xf32>
    %c0_42 = arith.constant 0 : index
    %c0_43 = arith.constant 0 : index
    %77 = vector.load %arg21[%c0_42, %c0_43] : memref<2x8xf32, #tpu.memory_space<vmem>>, vector<2x8xf32>
    %78 = vector.extract_strided_slice %75 {offsets = [0, 0], sizes = [8, 32], strides = [1, 1]} : vector<16x32xf32> to vector<8x32xf32>
    %79 = vector.extract_strided_slice %77 {offsets = [0, 0], sizes = [1, 8], strides = [1, 1]} : vector<2x8xf32> to vector<1x8xf32>
    %cst_44 = arith.constant 1.000000e+00 : f32
    %80 = vector.broadcast %cst_44 : f32 to vector<1x8xf32>
    %81 = arith.subf %80, %79 : vector<1x8xf32>
    %cst_45 = arith.constant -1.000000e+04 : f32
    %82 = vector.broadcast %cst_45 : f32 to vector<1x8xf32>
    %83 = arith.mulf %81, %82 : vector<1x8xf32>
    %cst_46 = arith.constant 0.000000e+00 : f32
    %84 = vector.broadcast %cst_46 : f32 to vector<8x32xf32>
    %c0_47 = arith.constant 0 : index
    %c0_48 = arith.constant 0 : index
    %c0_49 = arith.constant 0 : index
    %85 = vector.load %arg13[%c0_47, %c0_48, %c0_49] : memref<4x32x8xf32, #tpu.memory_space<vmem>>, vector<1x32x8xf32>
    %86 = vector.shape_cast %85 : vector<1x32x8xf32> to vector<32x8xf32>
    %cst_50 = arith.constant dense<0.000000e+00> : vector<8x8xf32>
    %87 = tpu.matmul %78, %86, %cst_50 {dimension_numbers = #tpu.dot_dimension_numbers<[1], [0], [0], [1], [0, 0, 1, 1], [], []>} : vector<8x32xf32>, vector<32x8xf32>, vector<8x8xf32> -> vector<8x8xf32>
    %c0_51 = arith.constant 0 : index
    %c0_52 = arith.constant 0 : index
    %c0_53 = arith.constant 0 : index
    %88 = vector.load %arg16[%c0_51, %c0_52, %c0_53] : memref<4x1x8xf32, #tpu.memory_space<vmem>>, vector<1x1x8xf32>
    %89 = vector.shape_cast %88 : vector<1x1x8xf32> to vector<1x8xf32>
    %90 = vector.broadcast %89 : vector<1x8xf32> to vector<8x8xf32>
    %91 = arith.addf %87, %90 : vector<8x8xf32>
    %c0_54 = arith.constant 0 : index
    %c0_55 = arith.constant 0 : index
    %c0_56 = arith.constant 0 : index
    %92 = vector.load %arg14[%c0_54, %c0_55, %c0_56] : memref<4x32x8xf32, #tpu.memory_space<vmem>>, vector<1x32x8xf32>
    %93 = vector.shape_cast %92 : vector<1x32x8xf32> to vector<32x8xf32>
    %cst_57 = arith.constant dense<0.000000e+00> : vector<8x8xf32>
    %94 = tpu.matmul %78, %93, %cst_57 {dimension_numbers = #tpu.dot_dimension_numbers<[1], [0], [0], [1], [0, 0, 1, 1], [], []>} : vector<8x32xf32>, vector<32x8xf32>, vector<8x8xf32> -> vector<8x8xf32>
    %c0_58 = arith.constant 0 : index
    %c0_59 = arith.constant 0 : index
    %c0_60 = arith.constant 0 : index
    %95 = vector.load %arg17[%c0_58, %c0_59, %c0_60] : memref<4x1x8xf32, #tpu.memory_space<vmem>>, vector<1x1x8xf32>
    %96 = vector.shape_cast %95 : vector<1x1x8xf32> to vector<1x8xf32>
    %97 = vector.broadcast %96 : vector<1x8xf32> to vector<8x8xf32>
    %98 = arith.addf %94, %97 : vector<8x8xf32>
    %c0_61 = arith.constant 0 : index
    %c0_62 = arith.constant 0 : index
    %c0_63 = arith.constant 0 : index
    %99 = vector.load %arg15[%c0_61, %c0_62, %c0_63] : memref<4x32x8xf32, #tpu.memory_space<vmem>>, vector<1x32x8xf32>
    %100 = vector.shape_cast %99 : vector<1x32x8xf32> to vector<32x8xf32>
    %cst_64 = arith.constant dense<0.000000e+00> : vector<8x8xf32>
    %101 = tpu.matmul %78, %100, %cst_64 {dimension_numbers = #tpu.dot_dimension_numbers<[1], [0], [0], [1], [0, 0, 1, 1], [], []>} : vector<8x32xf32>, vector<32x8xf32>, vector<8x8xf32> -> vector<8x8xf32>
    %c0_65 = arith.constant 0 : index
    %c0_66 = arith.constant 0 : index
    %c0_67 = arith.constant 0 : index
    %102 = vector.load %arg18[%c0_65, %c0_66, %c0_67] : memref<4x1x8xf32, #tpu.memory_space<vmem>>, vector<1x1x8xf32>
    %103 = vector.shape_cast %102 : vector<1x1x8xf32> to vector<1x8xf32>
    %104 = vector.broadcast %103 : vector<1x8xf32> to vector<8x8xf32>
    %105 = arith.addf %101, %104 : vector<8x8xf32>
    %cst_68 = arith.constant dense<0.000000e+00> : vector<8x8xf32>
    %106 = tpu.matmul %91, %98, %cst_68 {dimension_numbers = #tpu.dot_dimension_numbers<[1], [1], [0], [0], [0, 0, 1, 0], [], []>} : vector<8x8xf32>, vector<8x8xf32>, vector<8x8xf32> -> vector<8x8xf32>
    %cst_69 = arith.constant 0.353553385 : f32
    %107 = vector.broadcast %cst_69 : f32 to vector<8x8xf32>
    %108 = arith.mulf %106, %107 : vector<8x8xf32>
    %cst_70 = arith.constant 0.000000e+00 : f32
    %109 = vector.broadcast %cst_70 : f32 to vector<1x8xf32>
    %110 = arith.cmpf oeq, %83, %109 : vector<1x8xf32>
    %cst_71 = arith.constant -1.000000e+09 : f32
    %111 = vector.shape_cast %110 : vector<1x8xi1> to vector<1x8xi1>
    %112 = vector.broadcast %111 : vector<1x8xi1> to vector<8x8xi1>
    %113 = vector.broadcast %cst_71 : f32 to vector<8x8xf32>
    %114 = arith.select %112, %113, %108 : vector<8x8xi1>, vector<8x8xf32>
    %cst_72 = arith.constant dense<0xFF800000> : vector<8xf32>
    %115 = vector.multi_reduction <maximumf>, %114, %cst_72 [1] : vector<8x8xf32> to vector<8xf32>
    %116 = vector.shape_cast %115 : vector<8xf32> to vector<8x1xf32>
    %117 = vector.broadcast %116 : vector<8x1xf32> to vector<8x8xf32>
    %118 = arith.subf %114, %117 : vector<8x8xf32>
    %119 = math.exp %118 : vector<8x8xf32>
    %cst_73 = arith.constant dense<0.000000e+00> : vector<8xf32>
    %120 = vector.multi_reduction <add>, %119, %cst_73 [1] : vector<8x8xf32> to vector<8xf32>
    %121 = vector.shape_cast %120 : vector<8xf32> to vector<8x1xf32>
    %122 = tpu.reciprocal %121 {approx = true} : vector<8x1xf32> -> vector<8x1xf32>
    %123 = vector.broadcast %122 : vector<8x1xf32> to vector<8x8xf32>
    %124 = arith.mulf %119, %123 : vector<8x8xf32>
    %cst_74 = arith.constant dense<0.000000e+00> : vector<8x8xf32>
    %125 = tpu.matmul %124, %105, %cst_74 {dimension_numbers = #tpu.dot_dimension_numbers<[1], [0], [0], [1], [0, 0, 1, 1], [], []>} : vector<8x8xf32>, vector<8x8xf32>, vector<8x8xf32> -> vector<8x8xf32>
    %c0_75 = arith.constant 0 : index
    %c0_76 = arith.constant 0 : index
    %c0_77 = arith.constant 0 : index
    %126 = vector.load %arg19[%c0_75, %c0_76, %c0_77] : memref<4x8x32xf32, #tpu.memory_space<vmem>>, vector<1x8x32xf32>
    %127 = vector.shape_cast %126 : vector<1x8x32xf32> to vector<8x32xf32>
    %cst_78 = arith.constant dense<0.000000e+00> : vector<8x32xf32>
    %128 = tpu.matmul %125, %127, %cst_78 {dimension_numbers = #tpu.dot_dimension_numbers<[1], [0], [0], [1], [0, 0, 1, 1], [], []>} : vector<8x8xf32>, vector<8x32xf32>, vector<8x32xf32> -> vector<8x32xf32>
    %129 = arith.addf %84, %128 : vector<8x32xf32>
    %c1_79 = arith.constant 1 : index
    %c0_80 = arith.constant 0 : index
    %c0_81 = arith.constant 0 : index
    %130 = vector.load %arg13[%c1_79, %c0_80, %c0_81] : memref<4x32x8xf32, #tpu.memory_space<vmem>>, vector<1x32x8xf32>
    %131 = vector.shape_cast %130 : vector<1x32x8xf32> to vector<32x8xf32>
    %cst_82 = arith.constant dense<0.000000e+00> : vector<8x8xf32>
    %132 = tpu.matmul %78, %131, %cst_82 {dimension_numbers = #tpu.dot_dimension_numbers<[1], [0], [0], [1], [0, 0, 1, 1], [], []>} : vector<8x32xf32>, vector<32x8xf32>, vector<8x8xf32> -> vector<8x8xf32>
    %c1_83 = arith.constant 1 : index
    %c0_84 = arith.constant 0 : index
    %c0_85 = arith.constant 0 : index
    %133 = vector.load %arg16[%c1_83, %c0_84, %c0_85] : memref<4x1x8xf32, #tpu.memory_space<vmem>>, vector<1x1x8xf32>
    %134 = vector.shape_cast %133 : vector<1x1x8xf32> to vector<1x8xf32>
    %135 = vector.broadcast %134 : vector<1x8xf32> to vector<8x8xf32>
    %136 = arith.addf %132, %135 : vector<8x8xf32>
    %c1_86 = arith.constant 1 : index
    %c0_87 = arith.constant 0 : index
    %c0_88 = arith.constant 0 : index
    %137 = vector.load %arg14[%c1_86, %c0_87, %c0_88] : memref<4x32x8xf32, #tpu.memory_space<vmem>>, vector<1x32x8xf32>
    %138 = vector.shape_cast %137 : vector<1x32x8xf32> to vector<32x8xf32>
    %cst_89 = arith.constant dense<0.000000e+00> : vector<8x8xf32>
    %139 = tpu.matmul %78, %138, %cst_89 {dimension_numbers = #tpu.dot_dimension_numbers<[1], [0], [0], [1], [0, 0, 1, 1], [], []>} : vector<8x32xf32>, vector<32x8xf32>, vector<8x8xf32> -> vector<8x8xf32>
    %c1_90 = arith.constant 1 : index
    %c0_91 = arith.constant 0 : index
    %c0_92 = arith.constant 0 : index
    %140 = vector.load %arg17[%c1_90, %c0_91, %c0_92] : memref<4x1x8xf32, #tpu.memory_space<vmem>>, vector<1x1x8xf32>
    %141 = vector.shape_cast %140 : vector<1x1x8xf32> to vector<1x8xf32>
    %142 = vector.broadcast %141 : vector<1x8xf32> to vector<8x8xf32>
    %143 = arith.addf %139, %142 : vector<8x8xf32>
    %c1_93 = arith.constant 1 : index
    %c0_94 = arith.constant 0 : index
    %c0_95 = arith.constant 0 : index
    %144 = vector.load %arg15[%c1_93, %c0_94, %c0_95] : memref<4x32x8xf32, #tpu.memory_space<vmem>>, vector<1x32x8xf32>
    %145 = vector.shape_cast %144 : vector<1x32x8xf32> to vector<32x8xf32>
    %cst_96 = arith.constant dense<0.000000e+00> : vector<8x8xf32>
    %146 = tpu.matmul %78, %145, %cst_96 {dimension_numbers = #tpu.dot_dimension_numbers<[1], [0], [0], [1], [0, 0, 1, 1], [], []>} : vector<8x32xf32>, vector<32x8xf32>, vector<8x8xf32> -> vector<8x8xf32>
    %c1_97 = arith.constant 1 : index
    %c0_98 = arith.constant 0 : index
    %c0_99 = arith.constant 0 : index
    %147 = vector.load %arg18[%c1_97, %c0_98, %c0_99] : memref<4x1x8xf32, #tpu.memory_space<vmem>>, vector<1x1x8xf32>
    %148 = vector.shape_cast %147 : vector<1x1x8xf32> to vector<1x8xf32>
    %149 = vector.broadcast %148 : vector<1x8xf32> to vector<8x8xf32>
    %150 = arith.addf %146, %149 : vector<8x8xf32>
    %cst_100 = arith.constant dense<0.000000e+00> : vector<8x8xf32>
    %151 = tpu.matmul %136, %143, %cst_100 {dimension_numbers = #tpu.dot_dimension_numbers<[1], [1], [0], [0], [0, 0, 1, 0], [], []>} : vector<8x8xf32>, vector<8x8xf32>, vector<8x8xf32> -> vector<8x8xf32>
    %cst_101 = arith.constant 0.353553385 : f32
    %152 = vector.broadcast %cst_101 : f32 to vector<8x8xf32>
    %153 = arith.mulf %151, %152 : vector<8x8xf32>
    %cst_102 = arith.constant 0.000000e+00 : f32
    %154 = vector.broadcast %cst_102 : f32 to vector<1x8xf32>
    %155 = arith.cmpf oeq, %83, %154 : vector<1x8xf32>
    %cst_103 = arith.constant -1.000000e+09 : f32
    %156 = vector.shape_cast %155 : vector<1x8xi1> to vector<1x8xi1>
    %157 = vector.broadcast %156 : vector<1x8xi1> to vector<8x8xi1>
    %158 = vector.broadcast %cst_103 : f32 to vector<8x8xf32>
    %159 = arith.select %157, %158, %153 : vector<8x8xi1>, vector<8x8xf32>
    %cst_104 = arith.constant dense<0xFF800000> : vector<8xf32>
    %160 = vector.multi_reduction <maximumf>, %159, %cst_104 [1] : vector<8x8xf32> to vector<8xf32>
    %161 = vector.shape_cast %160 : vector<8xf32> to vector<8x1xf32>
    %162 = vector.broadcast %161 : vector<8x1xf32> to vector<8x8xf32>
    %163 = arith.subf %159, %162 : vector<8x8xf32>
    %164 = math.exp %163 : vector<8x8xf32>
    %cst_105 = arith.constant dense<0.000000e+00> : vector<8xf32>
    %165 = vector.multi_reduction <add>, %164, %cst_105 [1] : vector<8x8xf32> to vector<8xf32>
    %166 = vector.shape_cast %165 : vector<8xf32> to vector<8x1xf32>
    %167 = tpu.reciprocal %166 {approx = true} : vector<8x1xf32> -> vector<8x1xf32>
    %168 = vector.broadcast %167 : vector<8x1xf32> to vector<8x8xf32>
    %169 = arith.mulf %164, %168 : vector<8x8xf32>
    %cst_106 = arith.constant dense<0.000000e+00> : vector<8x8xf32>
    %170 = tpu.matmul %169, %150, %cst_106 {dimension_numbers = #tpu.dot_dimension_numbers<[1], [0], [0], [1], [0, 0, 1, 1], [], []>} : vector<8x8xf32>, vector<8x8xf32>, vector<8x8xf32> -> vector<8x8xf32>
    %c1_107 = arith.constant 1 : index
    %c0_108 = arith.constant 0 : index
    %c0_109 = arith.constant 0 : index
    %171 = vector.load %arg19[%c1_107, %c0_108, %c0_109] : memref<4x8x32xf32, #tpu.memory_space<vmem>>, vector<1x8x32xf32>
    %172 = vector.shape_cast %171 : vector<1x8x32xf32> to vector<8x32xf32>
    %cst_110 = arith.constant dense<0.000000e+00> : vector<8x32xf32>
    %173 = tpu.matmul %170, %172, %cst_110 {dimension_numbers = #tpu.dot_dimension_numbers<[1], [0], [0], [1], [0, 0, 1, 1], [], []>} : vector<8x8xf32>, vector<8x32xf32>, vector<8x32xf32> -> vector<8x32xf32>
    %174 = arith.addf %129, %173 : vector<8x32xf32>
    %c2 = arith.constant 2 : index
    %c0_111 = arith.constant 0 : index
    %c0_112 = arith.constant 0 : index
    %175 = vector.load %arg13[%c2, %c0_111, %c0_112] : memref<4x32x8xf32, #tpu.memory_space<vmem>>, vector<1x32x8xf32>
    %176 = vector.shape_cast %175 : vector<1x32x8xf32> to vector<32x8xf32>
    %cst_113 = arith.constant dense<0.000000e+00> : vector<8x8xf32>
    %177 = tpu.matmul %78, %176, %cst_113 {dimension_numbers = #tpu.dot_dimension_numbers<[1], [0], [0], [1], [0, 0, 1, 1], [], []>} : vector<8x32xf32>, vector<32x8xf32>, vector<8x8xf32> -> vector<8x8xf32>
    %c2_114 = arith.constant 2 : index
    %c0_115 = arith.constant 0 : index
    %c0_116 = arith.constant 0 : index
    %178 = vector.load %arg16[%c2_114, %c0_115, %c0_116] : memref<4x1x8xf32, #tpu.memory_space<vmem>>, vector<1x1x8xf32>
    %179 = vector.shape_cast %178 : vector<1x1x8xf32> to vector<1x8xf32>
    %180 = vector.broadcast %179 : vector<1x8xf32> to vector<8x8xf32>
    %181 = arith.addf %177, %180 : vector<8x8xf32>
    %c2_117 = arith.constant 2 : index
    %c0_118 = arith.constant 0 : index
    %c0_119 = arith.constant 0 : index
    %182 = vector.load %arg14[%c2_117, %c0_118, %c0_119] : memref<4x32x8xf32, #tpu.memory_space<vmem>>, vector<1x32x8xf32>
    %183 = vector.shape_cast %182 : vector<1x32x8xf32> to vector<32x8xf32>
    %cst_120 = arith.constant dense<0.000000e+00> : vector<8x8xf32>
    %184 = tpu.matmul %78, %183, %cst_120 {dimension_numbers = #tpu.dot_dimension_numbers<[1], [0], [0], [1], [0, 0, 1, 1], [], []>} : vector<8x32xf32>, vector<32x8xf32>, vector<8x8xf32> -> vector<8x8xf32>
    %c2_121 = arith.constant 2 : index
    %c0_122 = arith.constant 0 : index
    %c0_123 = arith.constant 0 : index
    %185 = vector.load %arg17[%c2_121, %c0_122, %c0_123] : memref<4x1x8xf32, #tpu.memory_space<vmem>>, vector<1x1x8xf32>
    %186 = vector.shape_cast %185 : vector<1x1x8xf32> to vector<1x8xf32>
    %187 = vector.broadcast %186 : vector<1x8xf32> to vector<8x8xf32>
    %188 = arith.addf %184, %187 : vector<8x8xf32>
    %c2_124 = arith.constant 2 : index
    %c0_125 = arith.constant 0 : index
    %c0_126 = arith.constant 0 : index
    %189 = vector.load %arg15[%c2_124, %c0_125, %c0_126] : memref<4x32x8xf32, #tpu.memory_space<vmem>>, vector<1x32x8xf32>
    %190 = vector.shape_cast %189 : vector<1x32x8xf32> to vector<32x8xf32>
    %cst_127 = arith.constant dense<0.000000e+00> : vector<8x8xf32>
    %191 = tpu.matmul %78, %190, %cst_127 {dimension_numbers = #tpu.dot_dimension_numbers<[1], [0], [0], [1], [0, 0, 1, 1], [], []>} : vector<8x32xf32>, vector<32x8xf32>, vector<8x8xf32> -> vector<8x8xf32>
    %c2_128 = arith.constant 2 : index
    %c0_129 = arith.constant 0 : index
    %c0_130 = arith.constant 0 : index
    %192 = vector.load %arg18[%c2_128, %c0_129, %c0_130] : memref<4x1x8xf32, #tpu.memory_space<vmem>>, vector<1x1x8xf32>
    %193 = vector.shape_cast %192 : vector<1x1x8xf32> to vector<1x8xf32>
    %194 = vector.broadcast %193 : vector<1x8xf32> to vector<8x8xf32>
    %195 = arith.addf %191, %194 : vector<8x8xf32>
    %cst_131 = arith.constant dense<0.000000e+00> : vector<8x8xf32>
    %196 = tpu.matmul %181, %188, %cst_131 {dimension_numbers = #tpu.dot_dimension_numbers<[1], [1], [0], [0], [0, 0, 1, 0], [], []>} : vector<8x8xf32>, vector<8x8xf32>, vector<8x8xf32> -> vector<8x8xf32>
    %cst_132 = arith.constant 0.353553385 : f32
    %197 = vector.broadcast %cst_132 : f32 to vector<8x8xf32>
    %198 = arith.mulf %196, %197 : vector<8x8xf32>
    %cst_133 = arith.constant 0.000000e+00 : f32
    %199 = vector.broadcast %cst_133 : f32 to vector<1x8xf32>
    %200 = arith.cmpf oeq, %83, %199 : vector<1x8xf32>
    %cst_134 = arith.constant -1.000000e+09 : f32
    %201 = vector.shape_cast %200 : vector<1x8xi1> to vector<1x8xi1>
    %202 = vector.broadcast %201 : vector<1x8xi1> to vector<8x8xi1>
    %203 = vector.broadcast %cst_134 : f32 to vector<8x8xf32>
    %204 = arith.select %202, %203, %198 : vector<8x8xi1>, vector<8x8xf32>
    %cst_135 = arith.constant dense<0xFF800000> : vector<8xf32>
    %205 = vector.multi_reduction <maximumf>, %204, %cst_135 [1] : vector<8x8xf32> to vector<8xf32>
    %206 = vector.shape_cast %205 : vector<8xf32> to vector<8x1xf32>
    %207 = vector.broadcast %206 : vector<8x1xf32> to vector<8x8xf32>
    %208 = arith.subf %204, %207 : vector<8x8xf32>
    %209 = math.exp %208 : vector<8x8xf32>
    %cst_136 = arith.constant dense<0.000000e+00> : vector<8xf32>
    %210 = vector.multi_reduction <add>, %209, %cst_136 [1] : vector<8x8xf32> to vector<8xf32>
    %211 = vector.shape_cast %210 : vector<8xf32> to vector<8x1xf32>
    %212 = tpu.reciprocal %211 {approx = true} : vector<8x1xf32> -> vector<8x1xf32>
    %213 = vector.broadcast %212 : vector<8x1xf32> to vector<8x8xf32>
    %214 = arith.mulf %209, %213 : vector<8x8xf32>
    %cst_137 = arith.constant dense<0.000000e+00> : vector<8x8xf32>
    %215 = tpu.matmul %214, %195, %cst_137 {dimension_numbers = #tpu.dot_dimension_numbers<[1], [0], [0], [1], [0, 0, 1, 1], [], []>} : vector<8x8xf32>, vector<8x8xf32>, vector<8x8xf32> -> vector<8x8xf32>
    %c2_138 = arith.constant 2 : index
    %c0_139 = arith.constant 0 : index
    %c0_140 = arith.constant 0 : index
    %216 = vector.load %arg19[%c2_138, %c0_139, %c0_140] : memref<4x8x32xf32, #tpu.memory_space<vmem>>, vector<1x8x32xf32>
    %217 = vector.shape_cast %216 : vector<1x8x32xf32> to vector<8x32xf32>
    %cst_141 = arith.constant dense<0.000000e+00> : vector<8x32xf32>
    %218 = tpu.matmul %215, %217, %cst_141 {dimension_numbers = #tpu.dot_dimension_numbers<[1], [0], [0], [1], [0, 0, 1, 1], [], []>} : vector<8x8xf32>, vector<8x32xf32>, vector<8x32xf32> -> vector<8x32xf32>
    %219 = arith.addf %174, %218 : vector<8x32xf32>
    %c3 = arith.constant 3 : index
    %c0_142 = arith.constant 0 : index
    %c0_143 = arith.constant 0 : index
    %220 = vector.load %arg13[%c3, %c0_142, %c0_143] : memref<4x32x8xf32, #tpu.memory_space<vmem>>, vector<1x32x8xf32>
    %221 = vector.shape_cast %220 : vector<1x32x8xf32> to vector<32x8xf32>
    %cst_144 = arith.constant dense<0.000000e+00> : vector<8x8xf32>
    %222 = tpu.matmul %78, %221, %cst_144 {dimension_numbers = #tpu.dot_dimension_numbers<[1], [0], [0], [1], [0, 0, 1, 1], [], []>} : vector<8x32xf32>, vector<32x8xf32>, vector<8x8xf32> -> vector<8x8xf32>
    %c3_145 = arith.constant 3 : index
    %c0_146 = arith.constant 0 : index
    %c0_147 = arith.constant 0 : index
    %223 = vector.load %arg16[%c3_145, %c0_146, %c0_147] : memref<4x1x8xf32, #tpu.memory_space<vmem>>, vector<1x1x8xf32>
    %224 = vector.shape_cast %223 : vector<1x1x8xf32> to vector<1x8xf32>
    %225 = vector.broadcast %224 : vector<1x8xf32> to vector<8x8xf32>
    %226 = arith.addf %222, %225 : vector<8x8xf32>
    %c3_148 = arith.constant 3 : index
    %c0_149 = arith.constant 0 : index
    %c0_150 = arith.constant 0 : index
    %227 = vector.load %arg14[%c3_148, %c0_149, %c0_150] : memref<4x32x8xf32, #tpu.memory_space<vmem>>, vector<1x32x8xf32>
    %228 = vector.shape_cast %227 : vector<1x32x8xf32> to vector<32x8xf32>
    %cst_151 = arith.constant dense<0.000000e+00> : vector<8x8xf32>
    %229 = tpu.matmul %78, %228, %cst_151 {dimension_numbers = #tpu.dot_dimension_numbers<[1], [0], [0], [1], [0, 0, 1, 1], [], []>} : vector<8x32xf32>, vector<32x8xf32>, vector<8x8xf32> -> vector<8x8xf32>
    %c3_152 = arith.constant 3 : index
    %c0_153 = arith.constant 0 : index
    %c0_154 = arith.constant 0 : index
    %230 = vector.load %arg17[%c3_152, %c0_153, %c0_154] : memref<4x1x8xf32, #tpu.memory_space<vmem>>, vector<1x1x8xf32>
    %231 = vector.shape_cast %230 : vector<1x1x8xf32> to vector<1x8xf32>
    %232 = vector.broadcast %231 : vector<1x8xf32> to vector<8x8xf32>
    %233 = arith.addf %229, %232 : vector<8x8xf32>
    %c3_155 = arith.constant 3 : index
    %c0_156 = arith.constant 0 : index
    %c0_157 = arith.constant 0 : index
    %234 = vector.load %arg15[%c3_155, %c0_156, %c0_157] : memref<4x32x8xf32, #tpu.memory_space<vmem>>, vector<1x32x8xf32>
    %235 = vector.shape_cast %234 : vector<1x32x8xf32> to vector<32x8xf32>
    %cst_158 = arith.constant dense<0.000000e+00> : vector<8x8xf32>
    %236 = tpu.matmul %78, %235, %cst_158 {dimension_numbers = #tpu.dot_dimension_numbers<[1], [0], [0], [1], [0, 0, 1, 1], [], []>} : vector<8x32xf32>, vector<32x8xf32>, vector<8x8xf32> -> vector<8x8xf32>
    %c3_159 = arith.constant 3 : index
    %c0_160 = arith.constant 0 : index
    %c0_161 = arith.constant 0 : index
    %237 = vector.load %arg18[%c3_159, %c0_160, %c0_161] : memref<4x1x8xf32, #tpu.memory_space<vmem>>, vector<1x1x8xf32>
    %238 = vector.shape_cast %237 : vector<1x1x8xf32> to vector<1x8xf32>
    %239 = vector.broadcast %238 : vector<1x8xf32> to vector<8x8xf32>
    %240 = arith.addf %236, %239 : vector<8x8xf32>
    %cst_162 = arith.constant dense<0.000000e+00> : vector<8x8xf32>
    %241 = tpu.matmul %226, %233, %cst_162 {dimension_numbers = #tpu.dot_dimension_numbers<[1], [1], [0], [0], [0, 0, 1, 0], [], []>} : vector<8x8xf32>, vector<8x8xf32>, vector<8x8xf32> -> vector<8x8xf32>
    %cst_163 = arith.constant 0.353553385 : f32
    %242 = vector.broadcast %cst_163 : f32 to vector<8x8xf32>
    %243 = arith.mulf %241, %242 : vector<8x8xf32>
    %cst_164 = arith.constant 0.000000e+00 : f32
    %244 = vector.broadcast %cst_164 : f32 to vector<1x8xf32>
    %245 = arith.cmpf oeq, %83, %244 : vector<1x8xf32>
    %cst_165 = arith.constant -1.000000e+09 : f32
    %246 = vector.shape_cast %245 : vector<1x8xi1> to vector<1x8xi1>
    %247 = vector.broadcast %246 : vector<1x8xi1> to vector<8x8xi1>
    %248 = vector.broadcast %cst_165 : f32 to vector<8x8xf32>
    %249 = arith.select %247, %248, %243 : vector<8x8xi1>, vector<8x8xf32>
    %cst_166 = arith.constant dense<0xFF800000> : vector<8xf32>
    %250 = vector.multi_reduction <maximumf>, %249, %cst_166 [1] : vector<8x8xf32> to vector<8xf32>
    %251 = vector.shape_cast %250 : vector<8xf32> to vector<8x1xf32>
    %252 = vector.broadcast %251 : vector<8x1xf32> to vector<8x8xf32>
    %253 = arith.subf %249, %252 : vector<8x8xf32>
    %254 = math.exp %253 : vector<8x8xf32>
    %cst_167 = arith.constant dense<0.000000e+00> : vector<8xf32>
    %255 = vector.multi_reduction <add>, %254, %cst_167 [1] : vector<8x8xf32> to vector<8xf32>
    %256 = vector.shape_cast %255 : vector<8xf32> to vector<8x1xf32>
    %257 = tpu.reciprocal %256 {approx = true} : vector<8x1xf32> -> vector<8x1xf32>
    %258 = vector.broadcast %257 : vector<8x1xf32> to vector<8x8xf32>
    %259 = arith.mulf %254, %258 : vector<8x8xf32>
    %cst_168 = arith.constant dense<0.000000e+00> : vector<8x8xf32>
    %260 = tpu.matmul %259, %240, %cst_168 {dimension_numbers = #tpu.dot_dimension_numbers<[1], [0], [0], [1], [0, 0, 1, 1], [], []>} : vector<8x8xf32>, vector<8x8xf32>, vector<8x8xf32> -> vector<8x8xf32>
    %c3_169 = arith.constant 3 : index
    %c0_170 = arith.constant 0 : index
    %c0_171 = arith.constant 0 : index
    %261 = vector.load %arg19[%c3_169, %c0_170, %c0_171] : memref<4x8x32xf32, #tpu.memory_space<vmem>>, vector<1x8x32xf32>
    %262 = vector.shape_cast %261 : vector<1x8x32xf32> to vector<8x32xf32>
    %cst_172 = arith.constant dense<0.000000e+00> : vector<8x32xf32>
    %263 = tpu.matmul %260, %262, %cst_172 {dimension_numbers = #tpu.dot_dimension_numbers<[1], [0], [0], [1], [0, 0, 1, 1], [], []>} : vector<8x8xf32>, vector<8x32xf32>, vector<8x32xf32> -> vector<8x32xf32>
    %264 = arith.addf %219, %263 : vector<8x32xf32>
    %265 = vector.broadcast %76 : vector<1x32xf32> to vector<8x32xf32>
    %266 = arith.addf %264, %265 : vector<8x32xf32>
    %267 = vector.extract_strided_slice %75 {offsets = [8, 0], sizes = [8, 32], strides = [1, 1]} : vector<16x32xf32> to vector<8x32xf32>
    %268 = vector.extract_strided_slice %77 {offsets = [1, 0], sizes = [1, 8], strides = [1, 1]} : vector<2x8xf32> to vector<1x8xf32>
    %cst_173 = arith.constant 1.000000e+00 : f32
    %269 = vector.broadcast %cst_173 : f32 to vector<1x8xf32>
    %270 = arith.subf %269, %268 : vector<1x8xf32>
    %cst_174 = arith.constant -1.000000e+04 : f32
    %271 = vector.broadcast %cst_174 : f32 to vector<1x8xf32>
    %272 = arith.mulf %270, %271 : vector<1x8xf32>
    %cst_175 = arith.constant 0.000000e+00 : f32
    %273 = vector.broadcast %cst_175 : f32 to vector<8x32xf32>
    %c0_176 = arith.constant 0 : index
    %c0_177 = arith.constant 0 : index
    %c0_178 = arith.constant 0 : index
    %274 = vector.load %arg13[%c0_176, %c0_177, %c0_178] : memref<4x32x8xf32, #tpu.memory_space<vmem>>, vector<1x32x8xf32>
    %275 = vector.shape_cast %274 : vector<1x32x8xf32> to vector<32x8xf32>
    %cst_179 = arith.constant dense<0.000000e+00> : vector<8x8xf32>
    %276 = tpu.matmul %267, %275, %cst_179 {dimension_numbers = #tpu.dot_dimension_numbers<[1], [0], [0], [1], [0, 0, 1, 1], [], []>} : vector<8x32xf32>, vector<32x8xf32>, vector<8x8xf32> -> vector<8x8xf32>
    %c0_180 = arith.constant 0 : index
    %c0_181 = arith.constant 0 : index
    %c0_182 = arith.constant 0 : index
    %277 = vector.load %arg16[%c0_180, %c0_181, %c0_182] : memref<4x1x8xf32, #tpu.memory_space<vmem>>, vector<1x1x8xf32>
    %278 = vector.shape_cast %277 : vector<1x1x8xf32> to vector<1x8xf32>
    %279 = vector.broadcast %278 : vector<1x8xf32> to vector<8x8xf32>
    %280 = arith.addf %276, %279 : vector<8x8xf32>
    %c0_183 = arith.constant 0 : index
    %c0_184 = arith.constant 0 : index
    %c0_185 = arith.constant 0 : index
    %281 = vector.load %arg14[%c0_183, %c0_184, %c0_185] : memref<4x32x8xf32, #tpu.memory_space<vmem>>, vector<1x32x8xf32>
    %282 = vector.shape_cast %281 : vector<1x32x8xf32> to vector<32x8xf32>
    %cst_186 = arith.constant dense<0.000000e+00> : vector<8x8xf32>
    %283 = tpu.matmul %267, %282, %cst_186 {dimension_numbers = #tpu.dot_dimension_numbers<[1], [0], [0], [1], [0, 0, 1, 1], [], []>} : vector<8x32xf32>, vector<32x8xf32>, vector<8x8xf32> -> vector<8x8xf32>
    %c0_187 = arith.constant 0 : index
    %c0_188 = arith.constant 0 : index
    %c0_189 = arith.constant 0 : index
    %284 = vector.load %arg17[%c0_187, %c0_188, %c0_189] : memref<4x1x8xf32, #tpu.memory_space<vmem>>, vector<1x1x8xf32>
    %285 = vector.shape_cast %284 : vector<1x1x8xf32> to vector<1x8xf32>
    %286 = vector.broadcast %285 : vector<1x8xf32> to vector<8x8xf32>
    %287 = arith.addf %283, %286 : vector<8x8xf32>
    %c0_190 = arith.constant 0 : index
    %c0_191 = arith.constant 0 : index
    %c0_192 = arith.constant 0 : index
    %288 = vector.load %arg15[%c0_190, %c0_191, %c0_192] : memref<4x32x8xf32, #tpu.memory_space<vmem>>, vector<1x32x8xf32>
    %289 = vector.shape_cast %288 : vector<1x32x8xf32> to vector<32x8xf32>
    %cst_193 = arith.constant dense<0.000000e+00> : vector<8x8xf32>
    %290 = tpu.matmul %267, %289, %cst_193 {dimension_numbers = #tpu.dot_dimension_numbers<[1], [0], [0], [1], [0, 0, 1, 1], [], []>} : vector<8x32xf32>, vector<32x8xf32>, vector<8x8xf32> -> vector<8x8xf32>
    %c0_194 = arith.constant 0 : index
    %c0_195 = arith.constant 0 : index
    %c0_196 = arith.constant 0 : index
    %291 = vector.load %arg18[%c0_194, %c0_195, %c0_196] : memref<4x1x8xf32, #tpu.memory_space<vmem>>, vector<1x1x8xf32>
    %292 = vector.shape_cast %291 : vector<1x1x8xf32> to vector<1x8xf32>
    %293 = vector.broadcast %292 : vector<1x8xf32> to vector<8x8xf32>
    %294 = arith.addf %290, %293 : vector<8x8xf32>
    %cst_197 = arith.constant dense<0.000000e+00> : vector<8x8xf32>
    %295 = tpu.matmul %280, %287, %cst_197 {dimension_numbers = #tpu.dot_dimension_numbers<[1], [1], [0], [0], [0, 0, 1, 0], [], []>} : vector<8x8xf32>, vector<8x8xf32>, vector<8x8xf32> -> vector<8x8xf32>
    %cst_198 = arith.constant 0.353553385 : f32
    %296 = vector.broadcast %cst_198 : f32 to vector<8x8xf32>
    %297 = arith.mulf %295, %296 : vector<8x8xf32>
    %cst_199 = arith.constant 0.000000e+00 : f32
    %298 = vector.broadcast %cst_199 : f32 to vector<1x8xf32>
    %299 = arith.cmpf oeq, %272, %298 : vector<1x8xf32>
    %cst_200 = arith.constant -1.000000e+09 : f32
    %300 = vector.shape_cast %299 : vector<1x8xi1> to vector<1x8xi1>
    %301 = vector.broadcast %300 : vector<1x8xi1> to vector<8x8xi1>
    %302 = vector.broadcast %cst_200 : f32 to vector<8x8xf32>
    %303 = arith.select %301, %302, %297 : vector<8x8xi1>, vector<8x8xf32>
    %cst_201 = arith.constant dense<0xFF800000> : vector<8xf32>
    %304 = vector.multi_reduction <maximumf>, %303, %cst_201 [1] : vector<8x8xf32> to vector<8xf32>
    %305 = vector.shape_cast %304 : vector<8xf32> to vector<8x1xf32>
    %306 = vector.broadcast %305 : vector<8x1xf32> to vector<8x8xf32>
    %307 = arith.subf %303, %306 : vector<8x8xf32>
    %308 = math.exp %307 : vector<8x8xf32>
    %cst_202 = arith.constant dense<0.000000e+00> : vector<8xf32>
    %309 = vector.multi_reduction <add>, %308, %cst_202 [1] : vector<8x8xf32> to vector<8xf32>
    %310 = vector.shape_cast %309 : vector<8xf32> to vector<8x1xf32>
    %311 = tpu.reciprocal %310 {approx = true} : vector<8x1xf32> -> vector<8x1xf32>
    %312 = vector.broadcast %311 : vector<8x1xf32> to vector<8x8xf32>
    %313 = arith.mulf %308, %312 : vector<8x8xf32>
    %cst_203 = arith.constant dense<0.000000e+00> : vector<8x8xf32>
    %314 = tpu.matmul %313, %294, %cst_203 {dimension_numbers = #tpu.dot_dimension_numbers<[1], [0], [0], [1], [0, 0, 1, 1], [], []>} : vector<8x8xf32>, vector<8x8xf32>, vector<8x8xf32> -> vector<8x8xf32>
    %c0_204 = arith.constant 0 : index
    %c0_205 = arith.constant 0 : index
    %c0_206 = arith.constant 0 : index
    %315 = vector.load %arg19[%c0_204, %c0_205, %c0_206] : memref<4x8x32xf32, #tpu.memory_space<vmem>>, vector<1x8x32xf32>
    %316 = vector.shape_cast %315 : vector<1x8x32xf32> to vector<8x32xf32>
    %cst_207 = arith.constant dense<0.000000e+00> : vector<8x32xf32>
    %317 = tpu.matmul %314, %316, %cst_207 {dimension_numbers = #tpu.dot_dimension_numbers<[1], [0], [0], [1], [0, 0, 1, 1], [], []>} : vector<8x8xf32>, vector<8x32xf32>, vector<8x32xf32> -> vector<8x32xf32>
    %318 = arith.addf %273, %317 : vector<8x32xf32>
    %c1_208 = arith.constant 1 : index
    %c0_209 = arith.constant 0 : index
    %c0_210 = arith.constant 0 : index
    %319 = vector.load %arg13[%c1_208, %c0_209, %c0_210] : memref<4x32x8xf32, #tpu.memory_space<vmem>>, vector<1x32x8xf32>
    %320 = vector.shape_cast %319 : vector<1x32x8xf32> to vector<32x8xf32>
    %cst_211 = arith.constant dense<0.000000e+00> : vector<8x8xf32>
    %321 = tpu.matmul %267, %320, %cst_211 {dimension_numbers = #tpu.dot_dimension_numbers<[1], [0], [0], [1], [0, 0, 1, 1], [], []>} : vector<8x32xf32>, vector<32x8xf32>, vector<8x8xf32> -> vector<8x8xf32>
    %c1_212 = arith.constant 1 : index
    %c0_213 = arith.constant 0 : index
    %c0_214 = arith.constant 0 : index
    %322 = vector.load %arg16[%c1_212, %c0_213, %c0_214] : memref<4x1x8xf32, #tpu.memory_space<vmem>>, vector<1x1x8xf32>
    %323 = vector.shape_cast %322 : vector<1x1x8xf32> to vector<1x8xf32>
    %324 = vector.broadcast %323 : vector<1x8xf32> to vector<8x8xf32>
    %325 = arith.addf %321, %324 : vector<8x8xf32>
    %c1_215 = arith.constant 1 : index
    %c0_216 = arith.constant 0 : index
    %c0_217 = arith.constant 0 : index
    %326 = vector.load %arg14[%c1_215, %c0_216, %c0_217] : memref<4x32x8xf32, #tpu.memory_space<vmem>>, vector<1x32x8xf32>
    %327 = vector.shape_cast %326 : vector<1x32x8xf32> to vector<32x8xf32>
    %cst_218 = arith.constant dense<0.000000e+00> : vector<8x8xf32>
    %328 = tpu.matmul %267, %327, %cst_218 {dimension_numbers = #tpu.dot_dimension_numbers<[1], [0], [0], [1], [0, 0, 1, 1], [], []>} : vector<8x32xf32>, vector<32x8xf32>, vector<8x8xf32> -> vector<8x8xf32>
    %c1_219 = arith.constant 1 : index
    %c0_220 = arith.constant 0 : index
    %c0_221 = arith.constant 0 : index
    %329 = vector.load %arg17[%c1_219, %c0_220, %c0_221] : memref<4x1x8xf32, #tpu.memory_space<vmem>>, vector<1x1x8xf32>
    %330 = vector.shape_cast %329 : vector<1x1x8xf32> to vector<1x8xf32>
    %331 = vector.broadcast %330 : vector<1x8xf32> to vector<8x8xf32>
    %332 = arith.addf %328, %331 : vector<8x8xf32>
    %c1_222 = arith.constant 1 : index
    %c0_223 = arith.constant 0 : index
    %c0_224 = arith.constant 0 : index
    %333 = vector.load %arg15[%c1_222, %c0_223, %c0_224] : memref<4x32x8xf32, #tpu.memory_space<vmem>>, vector<1x32x8xf32>
    %334 = vector.shape_cast %333 : vector<1x32x8xf32> to vector<32x8xf32>
    %cst_225 = arith.constant dense<0.000000e+00> : vector<8x8xf32>
    %335 = tpu.matmul %267, %334, %cst_225 {dimension_numbers = #tpu.dot_dimension_numbers<[1], [0], [0], [1], [0, 0, 1, 1], [], []>} : vector<8x32xf32>, vector<32x8xf32>, vector<8x8xf32> -> vector<8x8xf32>
    %c1_226 = arith.constant 1 : index
    %c0_227 = arith.constant 0 : index
    %c0_228 = arith.constant 0 : index
    %336 = vector.load %arg18[%c1_226, %c0_227, %c0_228] : memref<4x1x8xf32, #tpu.memory_space<vmem>>, vector<1x1x8xf32>
    %337 = vector.shape_cast %336 : vector<1x1x8xf32> to vector<1x8xf32>
    %338 = vector.broadcast %337 : vector<1x8xf32> to vector<8x8xf32>
    %339 = arith.addf %335, %338 : vector<8x8xf32>
    %cst_229 = arith.constant dense<0.000000e+00> : vector<8x8xf32>
    %340 = tpu.matmul %325, %332, %cst_229 {dimension_numbers = #tpu.dot_dimension_numbers<[1], [1], [0], [0], [0, 0, 1, 0], [], []>} : vector<8x8xf32>, vector<8x8xf32>, vector<8x8xf32> -> vector<8x8xf32>
    %cst_230 = arith.constant 0.353553385 : f32
    %341 = vector.broadcast %cst_230 : f32 to vector<8x8xf32>
    %342 = arith.mulf %340, %341 : vector<8x8xf32>
    %cst_231 = arith.constant 0.000000e+00 : f32
    %343 = vector.broadcast %cst_231 : f32 to vector<1x8xf32>
    %344 = arith.cmpf oeq, %272, %343 : vector<1x8xf32>
    %cst_232 = arith.constant -1.000000e+09 : f32
    %345 = vector.shape_cast %344 : vector<1x8xi1> to vector<1x8xi1>
    %346 = vector.broadcast %345 : vector<1x8xi1> to vector<8x8xi1>
    %347 = vector.broadcast %cst_232 : f32 to vector<8x8xf32>
    %348 = arith.select %346, %347, %342 : vector<8x8xi1>, vector<8x8xf32>
    %cst_233 = arith.constant dense<0xFF800000> : vector<8xf32>
    %349 = vector.multi_reduction <maximumf>, %348, %cst_233 [1] : vector<8x8xf32> to vector<8xf32>
    %350 = vector.shape_cast %349 : vector<8xf32> to vector<8x1xf32>
    %351 = vector.broadcast %350 : vector<8x1xf32> to vector<8x8xf32>
    %352 = arith.subf %348, %351 : vector<8x8xf32>
    %353 = math.exp %352 : vector<8x8xf32>
    %cst_234 = arith.constant dense<0.000000e+00> : vector<8xf32>
    %354 = vector.multi_reduction <add>, %353, %cst_234 [1] : vector<8x8xf32> to vector<8xf32>
    %355 = vector.shape_cast %354 : vector<8xf32> to vector<8x1xf32>
    %356 = tpu.reciprocal %355 {approx = true} : vector<8x1xf32> -> vector<8x1xf32>
    %357 = vector.broadcast %356 : vector<8x1xf32> to vector<8x8xf32>
    %358 = arith.mulf %353, %357 : vector<8x8xf32>
    %cst_235 = arith.constant dense<0.000000e+00> : vector<8x8xf32>
    %359 = tpu.matmul %358, %339, %cst_235 {dimension_numbers = #tpu.dot_dimension_numbers<[1], [0], [0], [1], [0, 0, 1, 1], [], []>} : vector<8x8xf32>, vector<8x8xf32>, vector<8x8xf32> -> vector<8x8xf32>
    %c1_236 = arith.constant 1 : index
    %c0_237 = arith.constant 0 : index
    %c0_238 = arith.constant 0 : index
    %360 = vector.load %arg19[%c1_236, %c0_237, %c0_238] : memref<4x8x32xf32, #tpu.memory_space<vmem>>, vector<1x8x32xf32>
    %361 = vector.shape_cast %360 : vector<1x8x32xf32> to vector<8x32xf32>
    %cst_239 = arith.constant dense<0.000000e+00> : vector<8x32xf32>
    %362 = tpu.matmul %359, %361, %cst_239 {dimension_numbers = #tpu.dot_dimension_numbers<[1], [0], [0], [1], [0, 0, 1, 1], [], []>} : vector<8x8xf32>, vector<8x32xf32>, vector<8x32xf32> -> vector<8x32xf32>
    %363 = arith.addf %318, %362 : vector<8x32xf32>
    %c2_240 = arith.constant 2 : index
    %c0_241 = arith.constant 0 : index
    %c0_242 = arith.constant 0 : index
    %364 = vector.load %arg13[%c2_240, %c0_241, %c0_242] : memref<4x32x8xf32, #tpu.memory_space<vmem>>, vector<1x32x8xf32>
    %365 = vector.shape_cast %364 : vector<1x32x8xf32> to vector<32x8xf32>
    %cst_243 = arith.constant dense<0.000000e+00> : vector<8x8xf32>
    %366 = tpu.matmul %267, %365, %cst_243 {dimension_numbers = #tpu.dot_dimension_numbers<[1], [0], [0], [1], [0, 0, 1, 1], [], []>} : vector<8x32xf32>, vector<32x8xf32>, vector<8x8xf32> -> vector<8x8xf32>
    %c2_244 = arith.constant 2 : index
    %c0_245 = arith.constant 0 : index
    %c0_246 = arith.constant 0 : index
    %367 = vector.load %arg16[%c2_244, %c0_245, %c0_246] : memref<4x1x8xf32, #tpu.memory_space<vmem>>, vector<1x1x8xf32>
    %368 = vector.shape_cast %367 : vector<1x1x8xf32> to vector<1x8xf32>
    %369 = vector.broadcast %368 : vector<1x8xf32> to vector<8x8xf32>
    %370 = arith.addf %366, %369 : vector<8x8xf32>
    %c2_247 = arith.constant 2 : index
    %c0_248 = arith.constant 0 : index
    %c0_249 = arith.constant 0 : index
    %371 = vector.load %arg14[%c2_247, %c0_248, %c0_249] : memref<4x32x8xf32, #tpu.memory_space<vmem>>, vector<1x32x8xf32>
    %372 = vector.shape_cast %371 : vector<1x32x8xf32> to vector<32x8xf32>
    %cst_250 = arith.constant dense<0.000000e+00> : vector<8x8xf32>
    %373 = tpu.matmul %267, %372, %cst_250 {dimension_numbers = #tpu.dot_dimension_numbers<[1], [0], [0], [1], [0, 0, 1, 1], [], []>} : vector<8x32xf32>, vector<32x8xf32>, vector<8x8xf32> -> vector<8x8xf32>
    %c2_251 = arith.constant 2 : index
    %c0_252 = arith.constant 0 : index
    %c0_253 = arith.constant 0 : index
    %374 = vector.load %arg17[%c2_251, %c0_252, %c0_253] : memref<4x1x8xf32, #tpu.memory_space<vmem>>, vector<1x1x8xf32>
    %375 = vector.shape_cast %374 : vector<1x1x8xf32> to vector<1x8xf32>
    %376 = vector.broadcast %375 : vector<1x8xf32> to vector<8x8xf32>
    %377 = arith.addf %373, %376 : vector<8x8xf32>
    %c2_254 = arith.constant 2 : index
    %c0_255 = arith.constant 0 : index
    %c0_256 = arith.constant 0 : index
    %378 = vector.load %arg15[%c2_254, %c0_255, %c0_256] : memref<4x32x8xf32, #tpu.memory_space<vmem>>, vector<1x32x8xf32>
    %379 = vector.shape_cast %378 : vector<1x32x8xf32> to vector<32x8xf32>
    %cst_257 = arith.constant dense<0.000000e+00> : vector<8x8xf32>
    %380 = tpu.matmul %267, %379, %cst_257 {dimension_numbers = #tpu.dot_dimension_numbers<[1], [0], [0], [1], [0, 0, 1, 1], [], []>} : vector<8x32xf32>, vector<32x8xf32>, vector<8x8xf32> -> vector<8x8xf32>
    %c2_258 = arith.constant 2 : index
    %c0_259 = arith.constant 0 : index
    %c0_260 = arith.constant 0 : index
    %381 = vector.load %arg18[%c2_258, %c0_259, %c0_260] : memref<4x1x8xf32, #tpu.memory_space<vmem>>, vector<1x1x8xf32>
    %382 = vector.shape_cast %381 : vector<1x1x8xf32> to vector<1x8xf32>
    %383 = vector.broadcast %382 : vector<1x8xf32> to vector<8x8xf32>
    %384 = arith.addf %380, %383 : vector<8x8xf32>
    %cst_261 = arith.constant dense<0.000000e+00> : vector<8x8xf32>
    %385 = tpu.matmul %370, %377, %cst_261 {dimension_numbers = #tpu.dot_dimension_numbers<[1], [1], [0], [0], [0, 0, 1, 0], [], []>} : vector<8x8xf32>, vector<8x8xf32>, vector<8x8xf32> -> vector<8x8xf32>
    %cst_262 = arith.constant 0.353553385 : f32
    %386 = vector.broadcast %cst_262 : f32 to vector<8x8xf32>
    %387 = arith.mulf %385, %386 : vector<8x8xf32>
    %cst_263 = arith.constant 0.000000e+00 : f32
    %388 = vector.broadcast %cst_263 : f32 to vector<1x8xf32>
    %389 = arith.cmpf oeq, %272, %388 : vector<1x8xf32>
    %cst_264 = arith.constant -1.000000e+09 : f32
    %390 = vector.shape_cast %389 : vector<1x8xi1> to vector<1x8xi1>
    %391 = vector.broadcast %390 : vector<1x8xi1> to vector<8x8xi1>
    %392 = vector.broadcast %cst_264 : f32 to vector<8x8xf32>
    %393 = arith.select %391, %392, %387 : vector<8x8xi1>, vector<8x8xf32>
    %cst_265 = arith.constant dense<0xFF800000> : vector<8xf32>
    %394 = vector.multi_reduction <maximumf>, %393, %cst_265 [1] : vector<8x8xf32> to vector<8xf32>
    %395 = vector.shape_cast %394 : vector<8xf32> to vector<8x1xf32>
    %396 = vector.broadcast %395 : vector<8x1xf32> to vector<8x8xf32>
    %397 = arith.subf %393, %396 : vector<8x8xf32>
    %398 = math.exp %397 : vector<8x8xf32>
    %cst_266 = arith.constant dense<0.000000e+00> : vector<8xf32>
    %399 = vector.multi_reduction <add>, %398, %cst_266 [1] : vector<8x8xf32> to vector<8xf32>
    %400 = vector.shape_cast %399 : vector<8xf32> to vector<8x1xf32>
    %401 = tpu.reciprocal %400 {approx = true} : vector<8x1xf32> -> vector<8x1xf32>
    %402 = vector.broadcast %401 : vector<8x1xf32> to vector<8x8xf32>
    %403 = arith.mulf %398, %402 : vector<8x8xf32>
    %cst_267 = arith.constant dense<0.000000e+00> : vector<8x8xf32>
    %404 = tpu.matmul %403, %384, %cst_267 {dimension_numbers = #tpu.dot_dimension_numbers<[1], [0], [0], [1], [0, 0, 1, 1], [], []>} : vector<8x8xf32>, vector<8x8xf32>, vector<8x8xf32> -> vector<8x8xf32>
    %c2_268 = arith.constant 2 : index
    %c0_269 = arith.constant 0 : index
    %c0_270 = arith.constant 0 : index
    %405 = vector.load %arg19[%c2_268, %c0_269, %c0_270] : memref<4x8x32xf32, #tpu.memory_space<vmem>>, vector<1x8x32xf32>
    %406 = vector.shape_cast %405 : vector<1x8x32xf32> to vector<8x32xf32>
    %cst_271 = arith.constant dense<0.000000e+00> : vector<8x32xf32>
    %407 = tpu.matmul %404, %406, %cst_271 {dimension_numbers = #tpu.dot_dimension_numbers<[1], [0], [0], [1], [0, 0, 1, 1], [], []>} : vector<8x8xf32>, vector<8x32xf32>, vector<8x32xf32> -> vector<8x32xf32>
    %408 = arith.addf %363, %407 : vector<8x32xf32>
    %c3_272 = arith.constant 3 : index
    %c0_273 = arith.constant 0 : index
    %c0_274 = arith.constant 0 : index
    %409 = vector.load %arg13[%c3_272, %c0_273, %c0_274] : memref<4x32x8xf32, #tpu.memory_space<vmem>>, vector<1x32x8xf32>
    %410 = vector.shape_cast %409 : vector<1x32x8xf32> to vector<32x8xf32>
    %cst_275 = arith.constant dense<0.000000e+00> : vector<8x8xf32>
    %411 = tpu.matmul %267, %410, %cst_275 {dimension_numbers = #tpu.dot_dimension_numbers<[1], [0], [0], [1], [0, 0, 1, 1], [], []>} : vector<8x32xf32>, vector<32x8xf32>, vector<8x8xf32> -> vector<8x8xf32>
    %c3_276 = arith.constant 3 : index
    %c0_277 = arith.constant 0 : index
    %c0_278 = arith.constant 0 : index
    %412 = vector.load %arg16[%c3_276, %c0_277, %c0_278] : memref<4x1x8xf32, #tpu.memory_space<vmem>>, vector<1x1x8xf32>
    %413 = vector.shape_cast %412 : vector<1x1x8xf32> to vector<1x8xf32>
    %414 = vector.broadcast %413 : vector<1x8xf32> to vector<8x8xf32>
    %415 = arith.addf %411, %414 : vector<8x8xf32>
    %c3_279 = arith.constant 3 : index
    %c0_280 = arith.constant 0 : index
    %c0_281 = arith.constant 0 : index
    %416 = vector.load %arg14[%c3_279, %c0_280, %c0_281] : memref<4x32x8xf32, #tpu.memory_space<vmem>>, vector<1x32x8xf32>
    %417 = vector.shape_cast %416 : vector<1x32x8xf32> to vector<32x8xf32>
    %cst_282 = arith.constant dense<0.000000e+00> : vector<8x8xf32>
    %418 = tpu.matmul %267, %417, %cst_282 {dimension_numbers = #tpu.dot_dimension_numbers<[1], [0], [0], [1], [0, 0, 1, 1], [], []>} : vector<8x32xf32>, vector<32x8xf32>, vector<8x8xf32> -> vector<8x8xf32>
    %c3_283 = arith.constant 3 : index
    %c0_284 = arith.constant 0 : index
    %c0_285 = arith.constant 0 : index
    %419 = vector.load %arg17[%c3_283, %c0_284, %c0_285] : memref<4x1x8xf32, #tpu.memory_space<vmem>>, vector<1x1x8xf32>
    %420 = vector.shape_cast %419 : vector<1x1x8xf32> to vector<1x8xf32>
    %421 = vector.broadcast %420 : vector<1x8xf32> to vector<8x8xf32>
    %422 = arith.addf %418, %421 : vector<8x8xf32>
    %c3_286 = arith.constant 3 : index
    %c0_287 = arith.constant 0 : index
    %c0_288 = arith.constant 0 : index
    %423 = vector.load %arg15[%c3_286, %c0_287, %c0_288] : memref<4x32x8xf32, #tpu.memory_space<vmem>>, vector<1x32x8xf32>
    %424 = vector.shape_cast %423 : vector<1x32x8xf32> to vector<32x8xf32>
    %cst_289 = arith.constant dense<0.000000e+00> : vector<8x8xf32>
    %425 = tpu.matmul %267, %424, %cst_289 {dimension_numbers = #tpu.dot_dimension_numbers<[1], [0], [0], [1], [0, 0, 1, 1], [], []>} : vector<8x32xf32>, vector<32x8xf32>, vector<8x8xf32> -> vector<8x8xf32>
    %c3_290 = arith.constant 3 : index
    %c0_291 = arith.constant 0 : index
    %c0_292 = arith.constant 0 : index
    %426 = vector.load %arg18[%c3_290, %c0_291, %c0_292] : memref<4x1x8xf32, #tpu.memory_space<vmem>>, vector<1x1x8xf32>
    %427 = vector.shape_cast %426 : vector<1x1x8xf32> to vector<1x8xf32>
    %428 = vector.broadcast %427 : vector<1x8xf32> to vector<8x8xf32>
    %429 = arith.addf %425, %428 : vector<8x8xf32>
    %cst_293 = arith.constant dense<0.000000e+00> : vector<8x8xf32>
    %430 = tpu.matmul %415, %422, %cst_293 {dimension_numbers = #tpu.dot_dimension_numbers<[1], [1], [0], [0], [0, 0, 1, 0], [], []>} : vector<8x8xf32>, vector<8x8xf32>, vector<8x8xf32> -> vector<8x8xf32>
    %cst_294 = arith.constant 0.353553385 : f32
    %431 = vector.broadcast %cst_294 : f32 to vector<8x8xf32>
    %432 = arith.mulf %430, %431 : vector<8x8xf32>
    %cst_295 = arith.constant 0.000000e+00 : f32
    %433 = vector.broadcast %cst_295 : f32 to vector<1x8xf32>
    %434 = arith.cmpf oeq, %272, %433 : vector<1x8xf32>
    %cst_296 = arith.constant -1.000000e+09 : f32
    %435 = vector.shape_cast %434 : vector<1x8xi1> to vector<1x8xi1>
    %436 = vector.broadcast %435 : vector<1x8xi1> to vector<8x8xi1>
    %437 = vector.broadcast %cst_296 : f32 to vector<8x8xf32>
    %438 = arith.select %436, %437, %432 : vector<8x8xi1>, vector<8x8xf32>
    %cst_297 = arith.constant dense<0xFF800000> : vector<8xf32>
    %439 = vector.multi_reduction <maximumf>, %438, %cst_297 [1] : vector<8x8xf32> to vector<8xf32>
    %440 = vector.shape_cast %439 : vector<8xf32> to vector<8x1xf32>
    %441 = vector.broadcast %440 : vector<8x1xf32> to vector<8x8xf32>
    %442 = arith.subf %438, %441 : vector<8x8xf32>
    %443 = math.exp %442 : vector<8x8xf32>
    %cst_298 = arith.constant dense<0.000000e+00> : vector<8xf32>
    %444 = vector.multi_reduction <add>, %443, %cst_298 [1] : vector<8x8xf32> to vector<8xf32>
    %445 = vector.shape_cast %444 : vector<8xf32> to vector<8x1xf32>
    %446 = tpu.reciprocal %445 {approx = true} : vector<8x1xf32> -> vector<8x1xf32>
    %447 = vector.broadcast %446 : vector<8x1xf32> to vector<8x8xf32>
    %448 = arith.mulf %443, %447 : vector<8x8xf32>
    %cst_299 = arith.constant dense<0.000000e+00> : vector<8x8xf32>
    %449 = tpu.matmul %448, %429, %cst_299 {dimension_numbers = #tpu.dot_dimension_numbers<[1], [0], [0], [1], [0, 0, 1, 1], [], []>} : vector<8x8xf32>, vector<8x8xf32>, vector<8x8xf32> -> vector<8x8xf32>
    %c3_300 = arith.constant 3 : index
    %c0_301 = arith.constant 0 : index
    %c0_302 = arith.constant 0 : index
    %450 = vector.load %arg19[%c3_300, %c0_301, %c0_302] : memref<4x8x32xf32, #tpu.memory_space<vmem>>, vector<1x8x32xf32>
    %451 = vector.shape_cast %450 : vector<1x8x32xf32> to vector<8x32xf32>
    %cst_303 = arith.constant dense<0.000000e+00> : vector<8x32xf32>
    %452 = tpu.matmul %449, %451, %cst_303 {dimension_numbers = #tpu.dot_dimension_numbers<[1], [0], [0], [1], [0, 0, 1, 1], [], []>} : vector<8x8xf32>, vector<8x32xf32>, vector<8x32xf32> -> vector<8x32xf32>
    %453 = arith.addf %408, %452 : vector<8x32xf32>
    %454 = vector.broadcast %76 : vector<1x32xf32> to vector<8x32xf32>
    %455 = arith.addf %453, %454 : vector<8x32xf32>
    %456 = tpu.concatenate %266, %455 in 0 : vector<8x32xf32>, vector<8x32xf32> -> vector<16x32xf32>
    %457 = arith.addf %75, %456 : vector<16x32xf32>
    %c0_304 = arith.constant 0 : index
    %c0_305 = arith.constant 0 : index
    %458 = vector.load %arg22[%c0_304, %c0_305] : memref<1x32xf32, #tpu.memory_space<vmem>>, vector<1x32xf32>
    %c0_306 = arith.constant 0 : index
    %c0_307 = arith.constant 0 : index
    %459 = vector.load %arg23[%c0_306, %c0_307] : memref<1x32xf32, #tpu.memory_space<vmem>>, vector<1x32xf32>
    %cst_308 = arith.constant dense<0.000000e+00> : vector<16xf32>
    %460 = vector.multi_reduction <add>, %457, %cst_308 [1] : vector<16x32xf32> to vector<16xf32>
    %461 = vector.shape_cast %460 : vector<16xf32> to vector<16x1xf32>
    %cst_309 = arith.constant 3.200000e+01 : f32
    %462 = vector.broadcast %cst_309 : f32 to vector<16x1xf32>
    %463 = arith.divf %461, %462 : vector<16x1xf32>
    %464 = vector.broadcast %463 : vector<16x1xf32> to vector<16x32xf32>
    %465 = arith.subf %457, %464 : vector<16x32xf32>
    %466 = vector.broadcast %463 : vector<16x1xf32> to vector<16x32xf32>
    %467 = arith.subf %457, %466 : vector<16x32xf32>
    %468 = arith.mulf %465, %467 : vector<16x32xf32>
    %cst_310 = arith.constant dense<0.000000e+00> : vector<16xf32>
    %469 = vector.multi_reduction <add>, %468, %cst_310 [1] : vector<16x32xf32> to vector<16xf32>
    %470 = vector.shape_cast %469 : vector<16xf32> to vector<16x1xf32>
    %cst_311 = arith.constant 3.200000e+01 : f32
    %471 = vector.broadcast %cst_311 : f32 to vector<16x1xf32>
    %472 = arith.divf %470, %471 : vector<16x1xf32>
    %473 = vector.broadcast %463 : vector<16x1xf32> to vector<16x32xf32>
    %474 = arith.subf %457, %473 : vector<16x32xf32>
    %cst_312 = arith.constant 9.99999974E-6 : f32
    %475 = vector.broadcast %cst_312 : f32 to vector<16x1xf32>
    %476 = arith.addf %472, %475 : vector<16x1xf32>
    %477 = math.rsqrt %476 : vector<16x1xf32>
    %478 = vector.broadcast %477 : vector<16x1xf32> to vector<16x32xf32>
    %479 = arith.mulf %474, %478 : vector<16x32xf32>
    %480 = vector.broadcast %458 : vector<1x32xf32> to vector<16x32xf32>
    %481 = arith.mulf %479, %480 : vector<16x32xf32>
    %482 = vector.broadcast %459 : vector<1x32xf32> to vector<16x32xf32>
    %483 = arith.addf %481, %482 : vector<16x32xf32>
    %c0_313 = arith.constant 0 : index
    %c0_314 = arith.constant 0 : index
    %484 = vector.load %arg24[%c0_313, %c0_314] : memref<32x128xf32, #tpu.memory_space<vmem>>, vector<32x128xf32>
    %cst_315 = arith.constant dense<0.000000e+00> : vector<16x128xf32>
    %485 = tpu.matmul %483, %484, %cst_315 {dimension_numbers = #tpu.dot_dimension_numbers<[1], [0], [0], [1], [0, 0, 1, 1], [], []>} : vector<16x32xf32>, vector<32x128xf32>, vector<16x128xf32> -> vector<16x128xf32>
    %c0_316 = arith.constant 0 : index
    %c0_317 = arith.constant 0 : index
    %486 = vector.load %arg25[%c0_316, %c0_317] : memref<1x128xf32, #tpu.memory_space<vmem>>, vector<1x128xf32>
    %487 = vector.broadcast %486 : vector<1x128xf32> to vector<16x128xf32>
    %488 = arith.addf %485, %487 : vector<16x128xf32>
    %cst_318 = arith.constant 0.000000e+00 : f32
    %489 = vector.broadcast %cst_318 : f32 to vector<16x128xf32>
    %490 = arith.maximumf %488, %489 : vector<16x128xf32>
    %c0_319 = arith.constant 0 : index
    %c0_320 = arith.constant 0 : index
    %491 = vector.load %arg26[%c0_319, %c0_320] : memref<128x32xf32, #tpu.memory_space<vmem>>, vector<128x32xf32>
    %cst_321 = arith.constant dense<0.000000e+00> : vector<16x32xf32>
    %492 = tpu.matmul %490, %491, %cst_321 {dimension_numbers = #tpu.dot_dimension_numbers<[1], [0], [0], [1], [0, 0, 1, 1], [], []>} : vector<16x128xf32>, vector<128x32xf32>, vector<16x32xf32> -> vector<16x32xf32>
    %c0_322 = arith.constant 0 : index
    %c0_323 = arith.constant 0 : index
    %493 = vector.load %arg27[%c0_322, %c0_323] : memref<1x32xf32, #tpu.memory_space<vmem>>, vector<1x32xf32>
    %494 = vector.broadcast %493 : vector<1x32xf32> to vector<16x32xf32>
    %495 = arith.addf %492, %494 : vector<16x32xf32>
    %496 = arith.addf %483, %495 : vector<16x32xf32>
    %c0_324 = arith.constant 0 : index
    %c0_325 = arith.constant 0 : index
    %497 = vector.load %arg28[%c0_324, %c0_325] : memref<1x32xf32, #tpu.memory_space<vmem>>, vector<1x32xf32>
    %c0_326 = arith.constant 0 : index
    %c0_327 = arith.constant 0 : index
    %498 = vector.load %arg29[%c0_326, %c0_327] : memref<1x32xf32, #tpu.memory_space<vmem>>, vector<1x32xf32>
    %cst_328 = arith.constant dense<0.000000e+00> : vector<16xf32>
    %499 = vector.multi_reduction <add>, %496, %cst_328 [1] : vector<16x32xf32> to vector<16xf32>
    %500 = vector.shape_cast %499 : vector<16xf32> to vector<16x1xf32>
    %cst_329 = arith.constant 3.200000e+01 : f32
    %501 = vector.broadcast %cst_329 : f32 to vector<16x1xf32>
    %502 = arith.divf %500, %501 : vector<16x1xf32>
    %503 = vector.broadcast %502 : vector<16x1xf32> to vector<16x32xf32>
    %504 = arith.subf %496, %503 : vector<16x32xf32>
    %505 = vector.broadcast %502 : vector<16x1xf32> to vector<16x32xf32>
    %506 = arith.subf %496, %505 : vector<16x32xf32>
    %507 = arith.mulf %504, %506 : vector<16x32xf32>
    %cst_330 = arith.constant dense<0.000000e+00> : vector<16xf32>
    %508 = vector.multi_reduction <add>, %507, %cst_330 [1] : vector<16x32xf32> to vector<16xf32>
    %509 = vector.shape_cast %508 : vector<16xf32> to vector<16x1xf32>
    %cst_331 = arith.constant 3.200000e+01 : f32
    %510 = vector.broadcast %cst_331 : f32 to vector<16x1xf32>
    %511 = arith.divf %509, %510 : vector<16x1xf32>
    %512 = vector.broadcast %502 : vector<16x1xf32> to vector<16x32xf32>
    %513 = arith.subf %496, %512 : vector<16x32xf32>
    %cst_332 = arith.constant 9.99999974E-6 : f32
    %514 = vector.broadcast %cst_332 : f32 to vector<16x1xf32>
    %515 = arith.addf %511, %514 : vector<16x1xf32>
    %516 = math.rsqrt %515 : vector<16x1xf32>
    %517 = vector.broadcast %516 : vector<16x1xf32> to vector<16x32xf32>
    %518 = arith.mulf %513, %517 : vector<16x32xf32>
    %519 = vector.broadcast %497 : vector<1x32xf32> to vector<16x32xf32>
    %520 = arith.mulf %518, %519 : vector<16x32xf32>
    %521 = vector.broadcast %498 : vector<1x32xf32> to vector<16x32xf32>
    %522 = arith.addf %520, %521 : vector<16x32xf32>
    %c0_333 = arith.constant 0 : index
    %c0_334 = arith.constant 0 : index
    %523 = vector.load %arg30[%c0_333, %c0_334] : memref<32x128xf32, #tpu.memory_space<vmem>>, vector<32x128xf32>
    %cst_335 = arith.constant dense<0.000000e+00> : vector<16x128xf32>
    %524 = tpu.matmul %522, %523, %cst_335 {dimension_numbers = #tpu.dot_dimension_numbers<[1], [0], [0], [1], [0, 0, 1, 1], [], []>} : vector<16x32xf32>, vector<32x128xf32>, vector<16x128xf32> -> vector<16x128xf32>
    %c0_336 = arith.constant 0 : index
    %c0_337 = arith.constant 0 : index
    %525 = vector.load %arg31[%c0_336, %c0_337] : memref<1x128xf32, #tpu.memory_space<vmem>>, vector<1x128xf32>
    %526 = vector.broadcast %525 : vector<1x128xf32> to vector<16x128xf32>
    %527 = arith.addf %524, %526 : vector<16x128xf32>
    %c0_338 = arith.constant 0 : index
    %c0_339 = arith.constant 0 : index
    %528 = vector.load %arg35[%c0_338, %c0_339] : memref<16x128xf32, #tpu.memory_space<vmem>>, vector<16x128xf32>
    tpu.vector_store %arg35[%c0_338, %c0_339], %527 {strides = array<i32>} : memref<16x128xf32, #tpu.memory_space<vmem>>, vector<16x128xf32>,
    %c0_340 = arith.constant 0 : index
    %c0_341 = arith.constant 0 : index
    %529 = vector.load %arg32[%c0_340, %c0_341] : memref<2x16xf32, #tpu.memory_space<vmem>>, vector<2x16xf32>
    %cst_342 = arith.constant dense<0.000000e+00> : vector<2x32xf32>
    %530 = tpu.matmul %529, %522, %cst_342 {dimension_numbers = #tpu.dot_dimension_numbers<[1], [0], [0], [1], [0, 0, 1, 1], [], []>} : vector<2x16xf32>, vector<16x32xf32>, vector<2x32xf32> -> vector<2x32xf32>
    %c0_343 = arith.constant 0 : index
    %c0_344 = arith.constant 0 : index
    %531 = vector.load %arg33[%c0_343, %c0_344] : memref<32x128xf32, #tpu.memory_space<vmem>>, vector<32x128xf32>
    %cst_345 = arith.constant dense<0.000000e+00> : vector<2x128xf32>
    %532 = tpu.matmul %530, %531, %cst_345 {dimension_numbers = #tpu.dot_dimension_numbers<[1], [0], [0], [1], [0, 0, 1, 1], [], []>} : vector<2x32xf32>, vector<32x128xf32>, vector<2x128xf32> -> vector<2x128xf32>
    %c0_346 = arith.constant 0 : index
    %c0_347 = arith.constant 0 : index
    %533 = vector.load %arg34[%c0_346, %c0_347] : memref<1x128xf32, #tpu.memory_space<vmem>>, vector<1x128xf32>
    %534 = vector.broadcast %533 : vector<1x128xf32> to vector<2x128xf32>
    %535 = arith.addf %532, %534 : vector<2x128xf32>
    %c0_348 = arith.constant 0 : index
    %c0_349 = arith.constant 0 : index
    %536 = vector.load %arg36[%c0_348, %c0_349] : memref<2x128xf32, #tpu.memory_space<vmem>>, vector<2x128xf32>
    tpu.vector_store %arg36[%c0_348, %c0_349], %535 {strides = array<i32>} : memref<2x128xf32, #tpu.memory_space<vmem>>, vector<2x128xf32>,
    return
  }
}

</mosaic_0001>

<bundles_post_ra>
// kernel: advanced_neurocoder_forward.1
= control target key start
LH: loop header
LB: loop body
LE: loop exit
PB: predicated region body
PF: predicated region fallthrough
CT: control target
= control target key end

     0   :  { %s7610_s6 = smov 1   ;;  %s7611_s10 = smov 2   ;;  %s8741_s0 = inlined_call_operand.smem [shape: u32[37], index: -1, kind: input, shape index: {}] }
   0x1   :  { %s7665_s5 = sld [smem:[%s8741_s0]]   ;;  %s7612_s14 = smov 3  }
   0x2   :  { %s7670_s9 = sld [smem:[%s8741_s0 + %s7610_s6]]   ;;  %s7613_s18 = smov 4  }
   0x3   :  { %s7675_s13 = sld [smem:[%s8741_s0 + %s7611_s10]]   ;;  %s7614_s22 = smov 5  }
   0x4   :  { %s7680_s17 = sld [smem:[%s8741_s0 + %s7612_s14]]   ;;  %s7615_s26 = smov 6  }
   0x5   :  { %s7685_s21 = sld [smem:[%s8741_s0 + %s7613_s18]]   ;;  %s7616_s30 = smov 7  }
   0x6   :  { %s7690_s25 = sld [smem:[%s8741_s0 + %s7614_s22]]   ;;  %s7617_s4 = smov 8  }
   0x7   :  { %s7695_s29 = sld [smem:[%s8741_s0 + %s7615_s26]]   ;;  %s7618_s10 = smov 9  }
   0x8   :  { %s7700_s3 = sld [smem:[%s8741_s0 + %s7616_s30]]   ;;  %s7619_s15 = smov 10  }
   0x9   :  { %s7705_s8 = sld [smem:[%s8741_s0 + %s7617_s4]]   ;;  %s7620_s20 = smov 11  }
   0xa   :  { %s7710_s14 = sld [smem:[%s8741_s0 + %s7618_s10]]   ;;  %s7621_s26 = smov 12  }
   0xb   :  { %s7715_s19 = sld [smem:[%s8741_s0 + %s7619_s15]]   ;;  %s7622_s1 = smov 13  }
   0xc   :  { %s7720_s24 = sld [smem:[%s8741_s0 + %s7620_s20]]   ;;  %s7623_s7 = smov 14  }
   0xd   :  { %s7725_s30 = sld [smem:[%s8741_s0 + %s7621_s26]]   ;;  %s7624_s15 = smov 15  }
   0xe   :  { %s7730_s6 = sld [smem:[%s8741_s0 + %s7622_s1]]   ;;  %s7625_s22 = smov 16  }
   0xf   :  { %s7735_s12 = sld [smem:[%s8741_s0 + %s7623_s7]]   ;;  %s7626_s28 = smov 17  }
  0x10   :  { %s7740_s20 = sld [smem:[%s8741_s0 + %s7624_s15]]   ;;  %s7627_s7 = smov 18  }
  0x11   :  { %s7745_s27 = sld [smem:[%s8741_s0 + %s7625_s22]]   ;;  %s7628_s15 = smov 19  }
  0x12   :  { %s7750_s4 = sld [smem:[%s8741_s0 + %s7626_s28]]   ;;  %s7629_s22 = smov 20  }
  0x13   :  { %8750 = sst [smem:[#allocation5_spill]] %s7725_s30  ;;  %s7630_s28 = smov 21  }
  0x14   :  { %s7760_s30 = sld [smem:[%s8741_s0 + %s7628_s15]]   ;;  %s7632_s15 = smov 23  }
  0x15   :  { %8751 = sst [smem:[#allocation6_spill]] %s7735_s12 }
  0x16   :  { %s7755_s12 = sld [smem:[%s8741_s0 + %s7627_s7]]   ;;  %s7631_s7 = smov 22  }
  0x17   :  { %8752 = sst [smem:[#allocation7_spill]] %s7745_s27 }
  0x18   :  { %8753 = sst [smem:[#allocation8_spill]] %s7750_s4 }
  0x19   :  { %s7765_s27 = sld [smem:[%s8741_s0 + %s7629_s22]]   ;;  %s7633_s22 = smov 24  }
  0x1a   :  { %8755 = sst [smem:[#allocation10_spill]] %s7760_s30 }
  0x1b   :  { %s7770_s4 = sld [smem:[%s8741_s0 + %s7630_s28]]   ;;  %s7634_s28 = smov 25  }
  0x1c   :  { %8754 = sst [smem:[#allocation9_spill]] %s7755_s12 }
  0x1d   :  { %s7775_s12 = sld [smem:[%s8741_s0 + %s7631_s7]]   ;;  %s7635_s7 = smov 26  }
  0x1e   :  { %s7780_s30 = sld [smem:[%s8741_s0 + %s7632_s15]]   ;;  %s7636_s15 = smov 27  }
  0x1f   :  { %8756 = sst [smem:[#allocation11_spill]] %s7765_s27 }
  0x20   :  { %s7785_s27 = sld [smem:[%s8741_s0 + %s7633_s22]]   ;;  %s7637_s22 = smov 28  }
  0x21   :  { %8757 = sst [smem:[#allocation12_spill]] %s7770_s4 }
  0x22   :  { %s7790_s4 = sld [smem:[%s8741_s0 + %s7634_s28]]   ;;  %s7638_s28 = smov 29  }
  0x23   :  { %8758 = sst [smem:[#allocation13_spill]] %s7775_s12 }
  0x24   :  { %8759 = sst [smem:[#allocation14_spill]] %s7780_s30 }
  0x25   :  { %s7795_s12 = sld [smem:[%s8741_s0 + %s7635_s7]]   ;;  %s7639_s7 = smov 30  }
  0x26   :  { %8760 = sst [smem:[#allocation15_spill]] %s7785_s27 }
  0x27   :  { %s7800_s30 = sld [smem:[%s8741_s0 + %s7636_s15]]   ;;  %s7640_s15 = smov 31  }
  0x28   :  { %8761 = sst [smem:[#allocation16_spill]] %s7790_s4 }
  0x29   :  { %s7805_s27 = sld [smem:[%s8741_s0 + %s7637_s22]]   ;;  %s7641_s22 = smov 32  }
  0x2a   :  { %s7810_s4 = sld [smem:[%s8741_s0 + %s7638_s28]]   ;;  %s7642_s28 = smov 33  }
  0x2b   :  { %8762 = sst [smem:[#allocation17_spill]] %s7795_s12 }
  0x2c   :  { %s7815_s12 = sld [smem:[%s8741_s0 + %s7639_s7]]   ;;  %s7643_s7 = smov 34  }
  0x2d   :  { %8763 = sst [smem:[#allocation18_spill]] %s7800_s30 }
  0x2e   :  { %s7820_s30 = sld [smem:[%s8741_s0 + %s7640_s15]]   ;;  %s7644_s15 = smov 35  }
  0x2f   :  { %8764 = sst [smem:[#allocation19_spill]] %s7805_s27 }
  0x30   :  { %8765 = sst [smem:[#allocation20_spill]] %s7810_s4 }
  0x31   :  { %s7825_s27 = sld [smem:[%s8741_s0 + %s7641_s22]]   ;;  %s7645_s22 = smov 36  }
  0x32   :  { %8766 = sst [smem:[#allocation21_spill]] %s7815_s12 }
  0x33   :  { %s7830_s4 = sld [smem:[%s8741_s0 + %s7642_s28]]  }
  0x34   :  { %8767 = sst [smem:[#allocation22_spill]] %s7820_s30 }
  0x35   :  { %s7835_s12 = sld [smem:[%s8741_s0 + %s7643_s7]]  }
  0x36   :  { %s7840_s30 = sld [smem:[%s8741_s0 + %s7644_s15]]  }
  0x37   :  { %8768 = sst [smem:[#allocation23_spill]] %s7825_s27 }
  0x38   :  { %s7845_s27 = sld [smem:[%s8741_s0 + %s7645_s22]]  }
  0x39   :  { %v152_v0 = vld [vmem:[%s7670_s9] sm:$0xff]  ;;  %v153_v1 = vld [vmem:[%s7670_s9 + $0x8] sm:$0xff]  ;;  %v154_v2 = vld [vmem:[%s7670_s9 + $0x10] sm:$0xff]  ;;  %vm163_vm0 = vcmask 261120  }
  0x3a   :  { %v7224_v3 = vpack.c.bf16 %v153_v1, %v152_v0  ;;  %v155_v4 = vld [vmem:[%s7670_s9 + $0x18] sm:$0xff]  ;;  %v150_v5 = vld [vmem:[%s7665_s5] sm:$0xff] }
  0x3b   :  { %v7228_v6 = vpack.c.bf16 %v155_v4, %v154_v2  ;;  %6684 = vmatprep.mubr.msk.f32.mxu0 %vm163_vm0, %v150_v5 }
  0x3c   :  { %79 = vsyncpa [#allocation3], 0  ;;  %7225 = vmatprep.subr.bf16.mxu0 %v7224_v3  ;;  %v151_v7 = vld [vmem:[%s7665_s5 + $0x8] sm:$0xff]  ;;  %v249_v8 = vld [vmem:[%s7700_s3] sm:$0xff]  ;;  %v7646_v39 = vmov 683565275  }
  0x3d   :  { %7227 = vmatpush3.bf16.msra.mxu0 %v7224_v3  ;;  %v250_v9 = vld [vmem:[%s7700_s3 + $0x8] sm:$0xff]  ;;  %v251_v10 = vld [vmem:[%s7700_s3 + $0x10] sm:$0xff]  ;;  %v252_v12 = vld [vmem:[%s7700_s3 + $0x18] sm:$0xff]  ;;  %v7647_v43 = vmov 2475754826   ;;  %s8769_s0 = sld [smem:[#allocation5_spill]] }
  0x3e   :  { %7229 = vmatprep.subr.bf16.mxu0 %v7228_v6  ;;  %v7232_v11 = vpack.c.bf16 %v250_v9, %v249_v8  ;;  %v7236_v13 = vpack.c.bf16 %v252_v12, %v251_v10  ;;  %v6247_v14 = vld [vmem:[%s7675_s13] ss:$0 sm:$0xff]  ;;  %v7648_v45 = vmov 2131351028   ;;  %v7649_v47 = vmov 2102212464  }
  0x3f   :  { %v7650_v49 = vmov 920167782   ;;  %v7651_v56 = vmov 1326507024   ;;  %s8770_s5 = sld [smem:[#allocation6_spill]]  ;;  %s8771_s9 = sld [smem:[#allocation8_spill]] }
  0x40   :  { %7233 = vmatprep.subr.bf16.mxu1 %v7232_v11  ;;  %s8772_s13 = sld [smem:[#allocation7_spill]]  ;;  %s8781_s3 = sld [smem:[#allocation13_spill]] }
  0x41   :  { %7231 = vmatpush3.bf16.msra.mxu0 %v7228_v6  ;;  %7235 = vmatpush3.bf16.msra.mxu1 %v7232_v11  ;;  %s8788_s28 = sld [smem:[#allocation19_spill]]  ;;  %s8789_s1 = sld [smem:[#allocation20_spill]] }
  0x42   :  { %7241 = vmatprep.subr.bf16.mxu0 %v7232_v11  ;;  %7237 = vmatprep.subr.bf16.mxu1 %v7236_v13  ;;  %s8790_s2 = sld [smem:[#allocation23_spill]]  ;;  %s8791_s7 = sld [smem:[#allocation22_spill]] }
  0x43   :  { %s7656_s10 = smov [#allocation2]  }
  0x44   :  { %6685 = vmatmul.mubr.msk.f32.vlgmr.msra.gmra.mrb[0].mxu0 %vm163_vm0, %v151_v7  ;;  %s6201_s11 = sshll.u32 %s7656_s10, 4  ;;  %s6202_s11 = int_to_ptr.vmem [resolvable:$true] %s6201_s11 }
  0x45   :  { %7243 = vmatpush3.bf16.msra.mxu0 %v7232_v11  ;;  %7239 = vmatpush3.bf16.msra.mxu1 %v7236_v13  ;;  %p7591_p1 = scmp.lt.s32.totalorder %s6202_s11, %s6202_s11 }
  0x46   :  { %7245 = vmatprep.subr.bf16.mxu0 %v7236_v13 }
  0x49   :  { %7247 = vmatpush3.bf16.msra.mxu0 %v7236_v13 }
 0x117   :  { %v6686_v15 = vpop.f32.mrb[0].mxu0 }
 0x118   :  { %v7860_v16 = vadd.f32 %v6686_v15, %v6247_v14  ;;  %v236_v17 = vpop.f32.mrb[1].mxu0 }
 0x119   :  { %v7862_v18 = vadd.f32 %v6247_v14, %v236_v17 }
 0x11a   :  { %v357_v19 = vand.u32 2147483647, %v7860_v16  ;;  %v360_v20 = vand.u32 2139095040, %v7860_v16  ;;  %vm359_vm15 = vcmp.lt.s32.totalorder %v7860_v16, 0 }
 0x11b   :  { %v256_v21 = vand.u32 2139095040, %v7862_v18  ;;  %v253_v24 = vand.u32 2147483647, %v7862_v18 }
 0x11c   :  { %v361_v22 = vshrl.u32 %v360_v20, 23  ;;  %v364_v23 = vand.u32 8388607, %v357_v19 }
 0x11d   :  { %v257_v25 = vshrl.u32 %v256_v21, 23  ;;  %v7872_v30 = vand.u32 8388607, %v253_v24 }
 0x11e   :  { %v6254_v26 = vadd.s32 4294967169, %v361_v22  ;;  %v365_v29 = vor.u32 8388608, %v364_v23 }
 0x11f   :  { %v6250_v27 = vadd.s32 4294967169, %v257_v25  ;;  %v261_v37 = vor.u32 8388608, %v7872_v30 }
 0x120   :  { %v367_v28 = vadd.s32 1, %v6254_v26  ;;  %v7874_v36 = vshll.u32 %v365_v29, 8 }
 0x121   :  { %v263_v31 = vadd.s32 1, %v6250_v27 }
 0x122   :  { %vm368_vm1 = vcmp.gt.s32.totalorder %v367_v28, 0 }
 0x123   :  { %v369_v32 = vsel %vm368_vm1, %v367_v28, 0  ;;  %vm264_vm2 = vcmp.gt.s32.totalorder %v263_v31, 0  ;;  %vm358_vm1 = vcmp.le.f32.partialorder %v357_v19, 0.7853982 }
 0x124   :  { %v370_v33 = vshrl.u32 %v369_v32, 5  ;;  %v371_v34 = vand.u32 31, %v369_v32  ;;  %v265_v35 = vsel %vm264_vm2, %v263_v31, 0  ;;  %v301_v31 = vshll.u32 %v261_v37, 8 }
 0x125   :  { %v7878_v41 = vshrl.u32 %v265_v35, 5  ;;  %v267_v42 = vand.u32 31, %v265_v35  ;;  %vm255_vm2 = vcmp.lt.s32.totalorder %v7862_v18, 0 }
 0x126   :  { %v372_v38 = vsub.s32 32, %v371_v34  ;;  %v374_v40 = vshll.u32 %v7646_v39, %v371_v34  ;;  %v377_v44 = vshll.u32 %v7647_v43, %v371_v34  ;;  %v380_v46 = vshll.u32 %v7648_v45, %v371_v34 }
 0x127   :  { %v383_v48 = vshll.u32 %v7649_v47, %v371_v34  ;;  %v386_v50 = vshll.u32 %v7650_v49, %v371_v34  ;;  %vm389_vm3 = vcmp.lt.s32.totalorder %v370_v33, 1  ;;  %vm390_vm4 = vcmp.lt.s32.totalorder %v370_v33, 2 }
 0x128   :  { %v375_v51 = vshrl.u32 %v7647_v43, %v372_v38  ;;  %v378_v52 = vshrl.u32 %v7648_v45, %v372_v38  ;;  %v381_v53 = vshrl.u32 %v7649_v47, %v372_v38  ;;  %v373_v54 = vshrl.u32 %v7646_v39, %v372_v38 }
 0x129   :  { %v384_v55 = vshrl.u32 %v7650_v49, %v372_v38  ;;  %v387_v57 = vshrl.u32 %v7651_v56, %v372_v38  ;;  %v268_v61 = vsub.s32 32, %v267_v42  ;;  %vm391_vm5 = vcmp.lt.s32.totalorder %v370_v33, 3 }
 0x12a   :  { %v376_v58 = vor.u32 %v375_v51, %v374_v40  ;;  %v379_v59 = vor.u32 %v378_v52, %v377_v44  ;;  %v382_v60 = vor.u32 %v381_v53, %v380_v46  ;;  %vm392_vm6 = vcmp.lt.s32.totalorder %v370_v33, 4 }
 0x12b   :  { %v385_v62 = vor.u32 %v384_v55, %v383_v48  ;;  %v388_v63 = vor.u32 %v387_v57, %v386_v50  ;;  %v270_v7 = vshll.u32 %v7646_v39, %v267_v42  ;;  %v271_v10 = vshrl.u32 %v7647_v43, %v268_v61 }
 0x12c   :  { %v393_v0 = vsel %vm389_vm3, %v373_v54, %v376_v58  ;;  %v394_v1 = vsel %vm392_vm6, %v382_v60, 2102212464  ;;  %v397_v2 = vsel %vm389_vm3, %v376_v58, %v379_v59  ;;  %v401_v3 = vsel %vm389_vm3, %v379_v59, %v382_v60 }
 0x12d   :  { %v395_v4 = vsel %vm391_vm5, %v379_v59, %v394_v1  ;;  %v398_v5 = vsel %vm392_vm6, %v385_v62, 920167782  ;;  %v402_v6 = vsel %vm392_vm6, %v388_v63, 1326507024  ;;  %v273_v11 = vshll.u32 %v7647_v43, %v267_v42 }
 0x12e   :  { %v399_v8 = vsel %vm391_vm5, %v382_v60, %v398_v5  ;;  %v403_v9 = vsel %vm391_vm5, %v385_v62, %v402_v6  ;;  %v396_v12 = vsel %vm390_vm4, %v393_v0, %v395_v4  ;;  %v274_v15 = vshrl.u32 %v7648_v45, %v268_v61 }
 0x12f   :  { %v400_v13 = vsel %vm390_vm4, %v397_v2, %v399_v8  ;;  %v404_v14 = vsel %vm390_vm4, %v401_v3, %v403_v9  ;;  %v272_v23 = vor.u32 %v271_v10, %v270_v7  ;;  %v276_v26 = vshll.u32 %v7648_v45, %v267_v42 }
 0x130   :  { %v7901_v17 = vmul.u32.u64.low %v7874_v36, %v404_v14  ;;  %v7902_v20 = vmul.u32.u64.high %v7874_v36, %v404_v14, %v7901_v17  ;;  %v7905_v21 = vmul.u32.u64.low %v7874_v36, %v400_v13  ;;  %v7906_v22 = vmul.u32.u64.high %v7874_v36, %v400_v13, %v7905_v21 }
 0x131   :  { %v275_v25 = vor.u32 %v274_v15, %v273_v11  ;;  %v277_v27 = vshrl.u32 %v7649_v47, %v268_v61  ;;  %v279_v28 = vshll.u32 %v7649_v47, %v267_v42  ;;  %v280_v29 = vshrl.u32 %v7650_v49, %v268_v61 }
 0x132   :  { %v283_v30 = vshrl.u32 %v7651_v56, %v268_v61  ;;  %v412_v32 = vmul.u32 %v7874_v36, %v396_v12  ;;  %v269_v33 = vshrl.u32 %v7646_v39, %v268_v61  ;;  %v282_v35 = vshll.u32 %v7650_v49, %v267_v42 }
 0x133   :  { %v278_v34 = vor.u32 %v277_v27, %v276_v26  ;;  %vm414_vm7 = vc.u32 %v7902_v20, %v7905_v21  ;;  %v415_v38 = vadd.s32 1, %v7906_v22  ;;  %v281_v40 = vor.u32 %v280_v29, %v279_v28 }
 0x134   :  { %vm285_vm8 = vcmp.lt.s32.totalorder %v7878_v41, 1  ;;  %v284_v44 = vor.u32 %v283_v30, %v282_v35  ;;  %vm287_vm9 = vcmp.lt.s32.totalorder %v7878_v41, 3  ;;  %vm288_vm10 = vcmp.lt.s32.totalorder %v7878_v41, 4 }
 0x135   :  { %v293_v37 = vsel %vm285_vm8, %v272_v23, %v275_v25  ;;  %v416_v36 = vsel %vm414_vm7, %v415_v38, %v7906_v22  ;;  %v290_v46 = vsel %vm288_vm10, %v278_v34, 2102212464  ;;  %v294_v48 = vsel %vm288_vm10, %v281_v40, 920167782 }
 0x136   :  { %v297_v50 = vsel %vm285_vm8, %v275_v25, %v278_v34  ;;  %v417_v51 = vadd.s32 %v416_v36, %v412_v32  ;;  %vm286_vm11 = vcmp.lt.s32.totalorder %v7878_v41, 2  ;;  %v295_v42 = vsel %vm287_vm9, %v278_v34, %v294_v48 }
 0x137   :  { %v298_v52 = vsel %vm288_vm10, %v284_v44, 1326507024  ;;  %v289_v53 = vsel %vm285_vm8, %v269_v33, %v272_v23  ;;  %v291_v54 = vsel %vm287_vm9, %v275_v25, %v290_v46  ;;  %v296_v55 = vsel %vm286_vm11, %v293_v37, %v295_v42 }
 0x138   :  { %v299_v57 = vsel %vm287_vm9, %v281_v40, %v298_v52  ;;  %v418_v58 = vadd.s32 536870912, %v417_v51  ;;  %v7923_v60 = vmul.u32.u64.low %v301_v31, %v296_v55  ;;  %v7924_v61 = vmul.u32.u64.high %v301_v31, %v296_v55, %v7923_v60 }
 0x139   :  { %v300_v59 = vsel %vm286_vm11, %v297_v50, %v299_v57  ;;  %v292_v1 = vsel %vm286_vm11, %v289_v53, %v291_v54  ;;  %v413_v22 = vadd.s32 %v7905_v21, %v7902_v20  ;;  %vm254_vm3 = vcmp.le.f32.partialorder %v253_v24, 0.7853982 }
 0x13a   :  { %v7926_v62 = vmul.u32.u64.low %v301_v31, %v300_v59  ;;  %v7927_v63 = vmul.u32.u64.high %v301_v31, %v300_v59, %v7926_v62  ;;  %v419_v0 = vshrl.u32 %v418_v58, 30  ;;  %v311_v3 = vadd.s32 1, %v7924_v61 }
 0x13b   :  { %v308_v41 = vmul.u32 %v301_v31, %v292_v1  ;;  %v461_v58 = vlaneseq  ;;  %vm449_vm10 = vweird.f32 %v7860_v16 }
 0x13c   :  { %v420_v2 = vshll.u32 %v419_v0, 30  ;;  %vm310_vm12 = vc.u32 %v7927_v63, %v7923_v60  ;;  %v309_v44 = vadd.s32 %v7923_v60, %v7927_v63  ;;  %v443_v21 = vsub.s32 4, %v419_v0 }
 0x13d   :  { %v312_v5 = vsel %vm310_vm12, %v311_v3, %v7924_v61  ;;  %v7938_v1 = vshrl.u32 %v461_v58, 7 }
 0x13e   :  { %v421_v4 = vsub.s32 %v417_v51, %v420_v2  ;;  %v313_v6 = vadd.s32 %v312_v5, %v308_v41  ;;  %v444_v54 = vsel %vm359_vm15, %v443_v21, %v419_v0  ;;  %v7948_v5 = vld [vmem:[%s7680_s17] sm:$0x3]  ;;  %s8773_s17 = sld [smem:[#allocation9_spill]] }
 0x13f   :  { %v446_v59 = vsel %vm358_vm1, 0, %v444_v54  ;;  %v7944_v41 = vsub.s32 0, %v7938_v1  ;;  %v7965_v54 = vld [vmem:[%s7695_s29] sm:$0x3]  ;;  %s8780_s29 = sld [smem:[#allocation11_spill]] }
 0x140   :  { %v423_v7 = vsub.s32 0, %v421_v4  ;;  %v314_v8 = vadd.s32 536870912, %v313_v6  ;;  %v450_v2 = vadd.s32 3, %v446_v59 }
 0x141   :  { %v464_v24 = vrot.slane %v7948_v5, %v7944_v41 }
 0x142   :  { %v6255_v9 = vmin.u32 %v423_v7, %v421_v4  ;;  %v315_v10 = vshrl.u32 %v314_v8, 30  ;;  %v451_v7 = vand.u32 3, %v450_v2  ;;  %v663_v8 = vand.u32 3, %v446_v59 }
 0x144   :  { %v425_v11 = vclz %v6255_v9  ;;  %v316_v12 = vshll.u32 %v315_v10, 30  ;;  %v339_v63 = vsub.s32 4, %v315_v10  ;;  %vm456_vm4 = vcmp.eq.s32.totalorder %v451_v7, 2 }
 0x145   :  { %vm665_vm5 = vcmp.eq.s32.totalorder %v663_v8, 0  ;;  %vm668_vm6 = vcmp.eq.s32.totalorder %v663_v8, 2  ;;  %vm453_vm7 = vcmp.eq.s32.totalorder %v451_v7, 0  ;;  %vm452_vm8 = vcmp.lt.s32.totalorder %v451_v7, 2 }
 0x146   :  { %v6256_v13 = vadd.s32 4294967294, %v425_v11  ;;  %v317_v14 = vsub.s32 %v313_v6, %v316_v12  ;;  %v340_v0 = vsel %vm255_vm2, %v339_v63, %v315_v10  ;;  %v7951_v6 = vld [vmem:[%s7685_s21] sm:$0x3]  ;;  %vm664_vm9 = vcmp.lt.s32.totalorder %v663_v8, 2  ;;  %s8774_s21 = sld [smem:[#allocation12_spill]] }
 0x147   :  { %v342_v11 = vsel %vm254_vm3, 0, %v340_v0  ;;  %v676_v10 = vrot.slane %v7951_v6, %v7944_v41 }
 0x148   :  { %vm6257_vm13 = vcmp.lt.s32.totalorder %v6256_v13, 0  ;;  %v319_v17 = vsub.s32 0, %v317_v14 }
 0x149   :  { %v428_v15 = vsel %vm6257_vm13, 0, %v6256_v13 }
 0x14a   :  { %v429_v23 = vsub.s32 32, %v428_v15  ;;  %v433_v25 = vsub.s32 4294967266, %v428_v15  ;;  %v6251_v26 = vmin.u32 %v319_v17, %v317_v14  ;;  %v430_v27 = vshll.u32 %v421_v4, %v428_v15 }
 0x14b   :  { %v346_v15 = vadd.s32 3, %v342_v11 }
 0x14c   :  { %v431_v28 = vshrl.u32 %v413_v22, %v429_v23  ;;  %v434_v29 = vadd.s32 127, %v433_v25  ;;  %v321_v30 = vclz %v6251_v26 }
 0x14e   :  { %v432_v31 = vor.u32 %v431_v28, %v430_v27  ;;  %v435_v32 = vshll.u32 %v434_v29, 23  ;;  %v6252_v33 = vadd.s32 4294967294, %v321_v30  ;;  %v347_v30 = vand.u32 3, %v346_v15 }
 0x150   :  { %v436_v34 = vor.u32 4788187, %v435_v32  ;;  %vm6253_vm14 = vcmp.lt.s32.totalorder %v6252_v33, 0  ;;  %v439_v38 = vcvt.s32.f32 %v432_v31  ;;  %v560_v32 = vand.u32 3, %v342_v11 }
 0x151   :  { %v324_v40 = vsel %vm6253_vm14, 0, %v6252_v33  ;;  %vm352_vm11 = vcmp.eq.s32.totalorder %v347_v30, 2  ;;  %vm349_vm13 = vcmp.eq.s32.totalorder %v347_v30, 0 }
 0x152   :  { %v437_v35 = vand.u32 2147483647, %v436_v34  ;;  %v325_v37 = vsub.s32 32, %v324_v40  ;;  %v329_v36 = vsub.s32 4294967266, %v324_v40  ;;  %v326_v46 = vshll.u32 %v317_v14, %v324_v40 }
 0x153   :  { %vm565_vm12 = vcmp.eq.s32.totalorder %v560_v32, 2  ;;  %vm562_vm14 = vcmp.eq.s32.totalorder %v560_v32, 0 }
 0x154   :  { %v440_v20 = vmul.f32 %v439_v38, %v437_v35  ;;  %v327_v48 = vshrl.u32 %v309_v44, %v325_v37  ;;  %v330_v50 = vadd.s32 127, %v329_v36 }
 0x156   :  { %v441_v51 = vxor.u32 2147483648, %v440_v20  ;;  %v328_v42 = vor.u32 %v327_v48, %v326_v46  ;;  %v331_v52 = vshll.u32 %v330_v50, 23 }
 0x158   :  { %v442_v53 = vsel %vm359_vm15, %v441_v51, %v440_v20  ;;  %v332_v57 = vor.u32 4788187, %v331_v52  ;;  %v335_v61 = vcvt.s32.f32 %v328_v42  ;;  %vm348_vm15 = vcmp.lt.s32.totalorder %v347_v30, 2 }
 0x159   :  { %v445_v55 = vsel %vm358_vm1, %v7860_v16, %v442_v53  ;;  %vm561_vm1 = vcmp.lt.s32.totalorder %v560_v32, 2  ;;  %v7962_v53 = vld [vmem:[%s7690_s25] sm:$0x3]  ;;  %s8777_s25 = sld [smem:[#allocation10_spill]] }
 0x15a   :  { %7530 = vcosq.f32 %v445_v55  ;;  %v333_v60 = vand.u32 2147483647, %v332_v57 }
 0x15b   :  { %7532 = vsinq.f32 %v445_v55  ;;  %v765_v55 = vrot.slane %v7962_v53, %v7944_v41 }
 0x15c   :  { %v336_v62 = vmul.f32 %v335_v61, %v333_v60 }
 0x15e   :  { %v337_v3 = vxor.u32 2147483648, %v336_v62 }
 0x160   :  { %v338_v19 = vsel %vm255_vm2, %v337_v3, %v336_v62  ;;  %vm345_vm2 = vweird.f32 %v7862_v18 }
 0x161   :  { %v341_v4 = vsel %vm254_vm3, %v7862_v18, %v338_v19  ;;  %v771_v18 = vrot.slane %v7965_v54, %v7944_v41 }
 0x162   :  { %7534 = vcosq.f32 %v341_v4 }
 0x163   :  { %7536 = vsinq.f32 %v341_v4 }
 0x164   :  { %v7531_v9 = vpop.eup %7530 }
 0x165   :  { %v7533_v12 = vpop.eup %7532  ;;  %v457_v13 = vxor.u32 2147483648, %v7531_v9 }
 0x166   :  { %v454_v14 = vxor.u32 2147483648, %v7533_v12 }
 0x167   :  { %v458_v17 = vsel %vm456_vm4, %v457_v13, %v7533_v12  ;;  %v670_v22 = vsel %vm668_vm6, %v457_v13, %v7533_v12 }
 0x168   :  { %v455_v23 = vsel %vm453_vm7, %v7531_v9, %v454_v14  ;;  %v667_v25 = vsel %vm665_vm5, %v7531_v9, %v454_v14 }
 0x169   :  { %v459_v26 = vsel %vm452_vm8, %v455_v23, %v458_v17  ;;  %v671_v27 = vsel %vm664_vm9, %v667_v25, %v670_v22 }
 0x16a   :  { %v460_v28 = vsel %vm449_vm10, nan, %v459_v26  ;;  %v672_v29 = vsel %vm449_vm10, nan, %v671_v27 }
 0x16b   :  { %v466_v31 = vmul.f32 %v464_v24, %v460_v28  ;;  %v678_v33 = vmul.f32 %v676_v10, %v672_v29 }
 0x16c   :  { %v7535_v34 = vpop.eup %7534 }
 0x16d   :  { %v680_v35 = vadd.f32 %v678_v33, %v466_v31  ;;  %v7537_v38 = vpop.eup %7536  ;;  %v353_v40 = vxor.u32 2147483648, %v7535_v34 }
 0x16e   :  { %v350_v44 = vxor.u32 2147483648, %v7537_v38 }
 0x16f   :  { %v354_v37 = vsel %vm352_vm11, %v353_v40, %v7537_v38  ;;  %v567_v16 = vsel %vm565_vm12, %v353_v40, %v7537_v38  ;;  %v767_v58 = vmul.f32 %v765_v55, %v680_v35 }
 0x170   :  { %v351_v36 = vsel %vm349_vm13, %v7535_v34, %v350_v44  ;;  %v564_v20 = vsel %vm562_vm14, %v7535_v34, %v350_v44 }
 0x171   :  { %v355_v21 = vsel %vm348_vm15, %v351_v36, %v354_v37  ;;  %v568_v46 = vsel %vm561_vm1, %v564_v20, %v567_v16 }
 0x172   :  { %v356_v48 = vsel %vm345_vm2, nan, %v355_v21  ;;  %v569_v50 = vsel %vm345_vm2, nan, %v568_v46 }
 0x173   :  { %v465_v51 = vmul.f32 %v464_v24, %v356_v48  ;;  %v677_v42 = vmul.f32 %v676_v10, %v569_v50 }
 0x175   :  { %v679_v52 = vadd.f32 %v677_v42, %v465_v51 }
 0x177   :  { %6695 = vmatprep.mubr.msk.f32.mxu1 %vm163_vm0, %v679_v52  ;;  %v766_v61 = vmul.f32 %v765_v55, %v679_v52 }
 0x178   :  { %6696 = vmatmul.mubr.msk.f32.vlgmr.msra.gmra.mrb[0].mxu1 %vm163_vm0, %v680_v35 }
 0x24b   :  { %v6697_v57 = vpop.f32.mrb[0].mxu1 }
 0x24c   :  { %v773_v59 = vmul.f32 %v6697_v57, %v771_v18  ;;  %v753_v60 = vpop.f32.mrb[1].mxu1 }
 0x24d   :  { %v772_v62 = vmul.f32 %v771_v18, %v753_v60 }
 0x24e   :  { %v7971_v63 = vadd.f32 %v773_v59, %v767_v58 }
 0x24f   :  { %v7973_v2 = vadd.f32 %v772_v62, %v766_v61 }
 0x250   :  { %v880_v3 = vand.u32 2147483647, %v7971_v63  ;;  %v883_v19 = vand.u32 2139095040, %v7971_v63  ;;  %vm882_vm2 = vcmp.lt.s32.totalorder %v7971_v63, 0 }
 0x251   :  { %v779_v0 = vand.u32 2139095040, %v7973_v2  ;;  %v776_v8 = vand.u32 2147483647, %v7973_v2 }
 0x252   :  { %v884_v4 = vshrl.u32 %v883_v19, 23  ;;  %v887_v7 = vand.u32 8388607, %v880_v3 }
 0x253   :  { %v780_v9 = vshrl.u32 %v779_v0, 23  ;;  %v783_v10 = vand.u32 8388607, %v776_v8 }
 0x254   :  { %v6272_v11 = vadd.s32 4294967169, %v884_v4  ;;  %v888_v24 = vor.u32 8388608, %v887_v7 }
 0x255   :  { %v6268_v12 = vadd.s32 4294967169, %v780_v9  ;;  %v784_v26 = vor.u32 8388608, %v783_v10 }
 0x256   :  { %v890_v13 = vadd.s32 1, %v6272_v11  ;;  %v7983_v25 = vshll.u32 %v888_v24, 8 }
 0x257   :  { %v786_v14 = vadd.s32 1, %v6268_v12 }
 0x258   :  { %vm891_vm3 = vcmp.gt.s32.totalorder %v890_v13, 0 }
 0x259   :  { %v892_v15 = vsel %vm891_vm3, %v890_v13, 0  ;;  %vm787_vm4 = vcmp.gt.s32.totalorder %v786_v14, 0  ;;  %vm881_vm3 = vcmp.le.f32.partialorder %v880_v3, 0.7853982 }
 0x25a   :  { %v893_v17 = vshrl.u32 %v892_v15, 5  ;;  %v894_v22 = vand.u32 31, %v892_v15  ;;  %v788_v23 = vsel %vm787_vm4, %v786_v14, 0  ;;  %vm778_vm4 = vcmp.lt.s32.totalorder %v7973_v2, 0 }
 0x25b   :  { %v7986_v29 = vshrl.u32 %v788_v23, 5  ;;  %v790_v30 = vand.u32 31, %v788_v23 }
 0x25c   :  { %v895_v27 = vsub.s32 32, %v894_v22  ;;  %v897_v28 = vshll.u32 %v7646_v39, %v894_v22  ;;  %v900_v31 = vshll.u32 %v7647_v43, %v894_v22  ;;  %v903_v32 = vshll.u32 %v7648_v45, %v894_v22 }
 0x25d   :  { %v906_v33 = vshll.u32 %v7649_v47, %v894_v22  ;;  %v909_v34 = vshll.u32 %v7650_v49, %v894_v22  ;;  %vm912_vm5 = vcmp.lt.s32.totalorder %v893_v17, 1  ;;  %vm913_vm6 = vcmp.lt.s32.totalorder %v893_v17, 2 }
 0x25e   :  { %v898_v35 = vshrl.u32 %v7647_v43, %v895_v27  ;;  %v901_v38 = vshrl.u32 %v7648_v45, %v895_v27  ;;  %v904_v40 = vshrl.u32 %v7649_v47, %v895_v27  ;;  %v896_v44 = vshrl.u32 %v7646_v39, %v895_v27 }
 0x25f   :  { %v907_v37 = vshrl.u32 %v7650_v49, %v895_v27  ;;  %v910_v16 = vshrl.u32 %v7651_v56, %v895_v27  ;;  %v791_v46 = vsub.s32 32, %v790_v30  ;;  %vm914_vm7 = vcmp.lt.s32.totalorder %v893_v17, 3 }
 0x260   :  { %v899_v36 = vor.u32 %v898_v35, %v897_v28  ;;  %v902_v20 = vor.u32 %v901_v38, %v900_v31  ;;  %v905_v21 = vor.u32 %v904_v40, %v903_v32  ;;  %vm915_vm8 = vcmp.lt.s32.totalorder %v893_v17, 4 }
 0x261   :  { %v908_v48 = vor.u32 %v907_v37, %v906_v33  ;;  %v911_v50 = vor.u32 %v910_v16, %v909_v34  ;;  %v793_v59 = vshll.u32 %v7646_v39, %v790_v30  ;;  %v794_v62 = vshrl.u32 %v7647_v43, %v791_v46 }
 0x262   :  { %v916_v51 = vsel %vm912_vm5, %v896_v44, %v899_v36  ;;  %v917_v42 = vsel %vm915_vm8, %v905_v21, 2102212464  ;;  %v920_v52 = vsel %vm912_vm5, %v899_v36, %v902_v20  ;;  %v924_v55 = vsel %vm912_vm5, %v902_v20, %v905_v21 }
 0x263   :  { %v918_v18 = vsel %vm914_vm7, %v902_v20, %v917_v42  ;;  %v921_v57 = vsel %vm915_vm8, %v908_v48, 920167782  ;;  %v925_v58 = vsel %vm915_vm8, %v911_v50, 1326507024  ;;  %v796_v19 = vshll.u32 %v7647_v43, %v790_v30 }
 0x264   :  { %v922_v60 = vsel %vm914_vm7, %v905_v21, %v921_v57  ;;  %v926_v61 = vsel %vm914_vm7, %v908_v48, %v925_v58  ;;  %v919_v0 = vsel %vm913_vm6, %v916_v51, %v918_v18  ;;  %v797_v9 = vshrl.u32 %v7648_v45, %v791_v46 }
 0x265   :  { %v923_v4 = vsel %vm913_vm6, %v920_v52, %v922_v60  ;;  %v927_v7 = vsel %vm913_vm6, %v924_v55, %v926_v61  ;;  %v795_v10 = vor.u32 %v794_v62, %v793_v59  ;;  %v799_v43 = vshll.u32 %v7648_v45, %v790_v30 }
 0x266   :  { %v8009_v11 = vmul.u32.u64.low %v7983_v25, %v927_v7  ;;  %v8010_v12 = vmul.u32.u64.high %v7983_v25, %v927_v7, %v8009_v11  ;;  %v8013_v13 = vmul.u32.u64.low %v7983_v25, %v923_v4  ;;  %v8014_v24 = vmul.u32.u64.high %v7983_v25, %v923_v4, %v8013_v13 }
 0x267   :  { %v798_v14 = vor.u32 %v797_v9, %v796_v19  ;;  %v800_v15 = vshrl.u32 %v7649_v47, %v791_v46  ;;  %v802_v22 = vshll.u32 %v7649_v47, %v790_v30  ;;  %v803_v17 = vshrl.u32 %v7650_v49, %v791_v46 }
 0x268   :  { %v806_v23 = vshrl.u32 %v7651_v56, %v791_v46  ;;  %v824_v27 = vshll.u32 %v784_v26, 8  ;;  %v935_v28 = vmul.u32 %v7983_v25, %v919_v0  ;;  %v792_v31 = vshrl.u32 %v7646_v39, %v791_v46 }
 0x269   :  { %v801_v32 = vor.u32 %v800_v15, %v799_v43  ;;  %v805_v33 = vshll.u32 %v7650_v49, %v790_v30  ;;  %vm937_vm9 = vc.u32 %v8010_v12, %v8013_v13  ;;  %v938_v45 = vadd.s32 1, %v8014_v24 }
 0x26a   :  { %v804_v34 = vor.u32 %v803_v17, %v802_v22  ;;  %vm808_vm10 = vcmp.lt.s32.totalorder %v7986_v29, 1  ;;  %vm810_vm11 = vcmp.lt.s32.totalorder %v7986_v29, 3  ;;  %vm811_vm12 = vcmp.lt.s32.totalorder %v7986_v29, 4 }
 0x26b   :  { %v807_v47 = vor.u32 %v806_v23, %v805_v33  ;;  %v816_v56 = vsel %vm808_vm10, %v795_v10, %v798_v14  ;;  %v939_v25 = vsel %vm937_vm9, %v938_v45, %v8014_v24  ;;  %v813_v26 = vsel %vm811_vm12, %v801_v32, 2102212464 }
 0x26c   :  { %v817_v39 = vsel %vm811_vm12, %v804_v34, 920167782  ;;  %v820_v35 = vsel %vm808_vm10, %v798_v14, %v801_v32  ;;  %v940_v38 = vadd.s32 %v939_v25, %v935_v28  ;;  %vm809_vm13 = vcmp.lt.s32.totalorder %v7986_v29, 2 }
 0x26d   :  { %v818_v49 = vsel %vm810_vm11, %v801_v32, %v817_v39  ;;  %v821_v30 = vsel %vm811_vm12, %v807_v47, 1326507024  ;;  %v812_v40 = vsel %vm808_vm10, %v792_v31, %v795_v10  ;;  %v814_v44 = vsel %vm810_vm11, %v798_v14, %v813_v26 }
 0x26e   :  { %v819_v37 = vsel %vm809_vm13, %v816_v56, %v818_v49  ;;  %v822_v16 = vsel %vm810_vm11, %v804_v34, %v821_v30  ;;  %v941_v36 = vadd.s32 536870912, %v940_v38  ;;  %v815_v42 = vsel %vm809_vm13, %v812_v40, %v814_v44 }
 0x26f   :  { %v823_v20 = vsel %vm809_vm13, %v820_v35, %v822_v16  ;;  %v8031_v21 = vmul.u32.u64.low %v824_v27, %v819_v37  ;;  %v8032_v46 = vmul.u32.u64.high %v824_v27, %v819_v37, %v8031_v21  ;;  %v831_v29 = vmul.u32 %v824_v27, %v815_v42 }
 0x270   :  { %v8034_v48 = vmul.u32.u64.low %v824_v27, %v823_v20  ;;  %v8035_v50 = vmul.u32.u64.high %v824_v27, %v823_v20, %v8034_v48  ;;  %v942_v51 = vshrl.u32 %v941_v36, 30  ;;  %v936_v24 = vadd.s32 %v8013_v13, %v8010_v12 }
 0x271   :  { %v834_v55 = vadd.s32 1, %v8032_v46  ;;  %vm777_vm5 = vcmp.le.f32.partialorder %v776_v8, 0.7853982  ;;  %vm972_vm12 = vweird.f32 %v7971_v63 }
 0x272   :  { %v943_v52 = vshll.u32 %v942_v51, 30  ;;  %vm833_vm14 = vc.u32 %v8035_v50, %v8031_v21  ;;  %v832_v47 = vadd.s32 %v8031_v21, %v8035_v50  ;;  %v966_v13 = vsub.s32 4, %v942_v51 }
 0x273   :  { %v835_v57 = vsel %vm833_vm14, %v834_v55, %v8032_v46 }
 0x274   :  { %v944_v18 = vsub.s32 %v940_v38, %v943_v52  ;;  %v836_v58 = vadd.s32 %v835_v57, %v831_v29  ;;  %v967_v44 = vsel %vm882_vm2, %v966_v13, %v942_v51  ;;  %v8048_v52 = vsub.s32 1, %v7938_v1 }
 0x275   :  { %v969_v36 = vsel %vm881_vm3, 0, %v967_v44 }
 0x276   :  { %v946_v59 = vsub.s32 0, %v944_v18  ;;  %v837_v60 = vadd.s32 536870912, %v836_v58  ;;  %v973_v50 = vadd.s32 3, %v969_v36  ;;  %v1186_v29 = vand.u32 3, %v969_v36  ;;  %v1307_v36 = vld [vmem:[%s7705_s8] sm:$0xff] }
 0x277   :  { %v1199_v1 = vrot.slane %v7951_v6, %v8048_v52  ;;  %v1288_v6 = vrot.slane %v7962_v53, %v8048_v52 }
 0x278   :  { %v6273_v61 = vmin.u32 %v946_v59, %v944_v18  ;;  %v838_v62 = vshrl.u32 %v837_v60, 30  ;;  %v974_v55 = vand.u32 3, %v973_v50  ;;  %v987_v60 = vrot.slane %v7948_v5, %v8048_v52 }
 0x279   :  { %vm1188_vm7 = vcmp.eq.s32.totalorder %v1186_v29, 0  ;;  %vm1191_vm8 = vcmp.eq.s32.totalorder %v1186_v29, 2  ;;  %vm1187_vm11 = vcmp.lt.s32.totalorder %v1186_v29, 2  ;;  %v1304_v29 = vld [vmem:[%s7720_s24] sm:$0xff] }
 0x27a   :  { %v948_v19 = vclz %v6273_v61  ;;  %v839_v0 = vshll.u32 %v838_v62, 30  ;;  %v862_v48 = vsub.s32 4, %v838_v62  ;;  %vm979_vm6 = vcmp.eq.s32.totalorder %v974_v55, 2 }
 0x27b   :  { %vm976_vm9 = vcmp.eq.s32.totalorder %v974_v55, 0  ;;  %vm975_vm10 = vcmp.lt.s32.totalorder %v974_v55, 2 }
 0x27c   :  { %v6274_v4 = vadd.s32 4294967294, %v948_v19  ;;  %v840_v7 = vsub.s32 %v836_v58, %v839_v0  ;;  %v863_v51 = vsel %vm778_vm4, %v862_v48, %v838_v62  ;;  %v7654_v48 = vmov 0.0|0.0  }
 0x27d   :  { %v865_v58 = vsel %vm777_vm5, 0, %v863_v51  ;;  %v6287_v51 = vld [vmem:[%s7715_s19] ss:$0 sm:$0xff]  ;;  %s8784_s19 = sld [smem:[#allocation17_spill]] }
 0x27e   :  { %vm6275_vm15 = vcmp.lt.s32.totalorder %v6274_v4, 0  ;;  %v842_v11 = vsub.s32 0, %v840_v7  ;;  %v869_v8 = vadd.s32 3, %v865_v58 }
 0x27f   :  { %v951_v9 = vsel %vm6275_vm15, 0, %v6274_v4 }
 0x280   :  { %v952_v10 = vsub.s32 32, %v951_v9  ;;  %v956_v14 = vsub.s32 4294967266, %v951_v9  ;;  %v6269_v43 = vmin.u32 %v842_v11, %v840_v7  ;;  %v953_v15 = vshll.u32 %v944_v18, %v951_v9 }
 0x282   :  { %v954_v22 = vshrl.u32 %v936_v24, %v952_v10  ;;  %v957_v17 = vadd.s32 127, %v956_v14  ;;  %v844_v23 = vclz %v6269_v43  ;;  %v870_v10 = vand.u32 3, %v869_v8 }
 0x283   :  { %v1083_v14 = vand.u32 3, %v865_v58 }
 0x284   :  { %v955_v27 = vor.u32 %v954_v22, %v953_v15  ;;  %v958_v28 = vshll.u32 %v957_v17, 23  ;;  %v6270_v31 = vadd.s32 4294967294, %v844_v23  ;;  %vm875_vm13 = vcmp.eq.s32.totalorder %v870_v10, 2 }
 0x285   :  { %vm1088_vm14 = vcmp.eq.s32.totalorder %v1083_v14, 2  ;;  %vm872_vm15 = vcmp.eq.s32.totalorder %v870_v10, 0 }
 0x286   :  { %v959_v32 = vor.u32 4788187, %v958_v28  ;;  %vm6271_vm1 = vcmp.lt.s32.totalorder %v6270_v31, 0  ;;  %v962_v45 = vcvt.s32.f32 %v955_v27 }
 0x287   :  { %v847_v34 = vsel %vm6271_vm1, 0, %v6270_v31  ;;  %vm1085_vm1 = vcmp.eq.s32.totalorder %v1083_v14, 0 }
 0x288   :  { %v960_v33 = vand.u32 2147483647, %v959_v32  ;;  %v848_v56 = vsub.s32 32, %v847_v34  ;;  %v852_v25 = vsub.s32 4294967266, %v847_v34  ;;  %v849_v26 = vshll.u32 %v840_v7, %v847_v34 }
 0x28a   :  { %v963_v12 = vmul.f32 %v962_v45, %v960_v33  ;;  %v850_v39 = vshrl.u32 %v832_v47, %v848_v56  ;;  %v853_v35 = vadd.s32 127, %v852_v25 }
 0x28c   :  { %v964_v38 = vxor.u32 2147483648, %v963_v12  ;;  %v851_v49 = vor.u32 %v850_v39, %v849_v26  ;;  %v854_v30 = vshll.u32 %v853_v35, 23  ;;  %v7652_v26 = vmov 0.0  }
 0x28d   :  { %6709 = vmatprep.subr.mxu1 %v7652_v26  ;;  %6725 = vmatprep.subr.mxu0 %v7652_v26 }
 0x28e   :  { %v965_v40 = vsel %vm882_vm2, %v964_v38, %v963_v12  ;;  %v855_v16 = vor.u32 4788187, %v854_v30  ;;  %v858_v21 = vcvt.s32.f32 %v851_v49  ;;  %vm871_vm2 = vcmp.lt.s32.totalorder %v870_v10, 2  ;;  %v1299_v49 = vld [vmem:[%s7710_s14] sm:$0xff]  ;;  %v1300_v30 = vld [vmem:[%s7710_s14 + $0x8] sm:$0xff] }
 0x28f   :  { %v968_v37 = vsel %vm881_vm3, %v7971_v63, %v965_v40  ;;  %vm1084_vm3 = vcmp.lt.s32.totalorder %v1083_v14, 2 }
 0x290   :  { %7538 = vcosq.f32 %v968_v37  ;;  %v856_v20 = vand.u32 2147483647, %v855_v16 }
 0x291   :  { %7540 = vsinq.f32 %v968_v37 }
 0x292   :  { %v859_v46 = vmul.f32 %v858_v21, %v856_v20  ;;  %v7249_v20 = vpack.c.bf16 %v1300_v30, %v1299_v49  ;;  %v1301_v21 = vld [vmem:[%s7710_s14 + $0x10] sm:$0xff]  ;;  %v1992_v49 = vld [vmem:[%s8770_s5] sm:$0xff]  ;;  %v1993_v30 = vld [vmem:[%s8770_s5 + $0x8] sm:$0xff] }
 0x294   :  { %v860_v42 = vxor.u32 2147483648, %v859_v46 }
 0x296   :  { %v861_v3 = vsel %vm778_vm4, %v860_v42, %v859_v46  ;;  %vm868_vm4 = vweird.f32 %v7973_v2  ;;  %v1302_v46 = vld [vmem:[%s7710_s14 + $0x18] sm:$0xff]  ;;  %s8783_s14 = sld [smem:[#allocation15_spill]] }
 0x297   :  { %v864_v18 = vsel %vm777_vm5, %v7973_v2, %v861_v3  ;;  %vm7653_vm5 = vmmov 0   ;;  %v1294_v2 = vrot.slane %v7965_v54, %v8048_v52  ;;  %v7252_v54 = vpack.c.bf16 %v1302_v46, %v1301_v21  ;;  %v8087_v3 = vld [vmem:[%s7705_s8 + $0x8] sm:$0xff]  ;;  %s8782_s8 = sld [smem:[#allocation14_spill]] }
 0x298   :  { %7542 = vcosq.f32 %v864_v18  ;;  %6711 = vmatprep.mubr.msk.f32.mxu1 %vm7653_vm5, %v7652_v26 }
 0x299   :  { %7544 = vsinq.f32 %v864_v18  ;;  %v1305_v18 = vld [vmem:[%s7720_s24 + $0x8] sm:$0xff]  ;;  %s8785_s24 = sld [smem:[#allocation16_spill]] }
 0x29a   :  { %v7539_v57 = vpop.eup %7538 }
 0x29b   :  { %v7541_v59 = vpop.eup %7540  ;;  %v980_v61 = vxor.u32 2147483648, %v7539_v57 }
 0x29c   :  { %v977_v19 = vxor.u32 2147483648, %v7541_v59 }
 0x29d   :  { %v981_v62 = vsel %vm979_vm6, %v980_v61, %v7541_v59  ;;  %v1193_v0 = vsel %vm1191_vm8, %v980_v61, %v7541_v59  ;;  %vm1308_vm6 = vcmask 64512  }
 0x29e   :  { %v978_v4 = vsel %vm976_vm9, %v7539_v57, %v977_v19  ;;  %v1190_v7 = vsel %vm1188_vm7, %v7539_v57, %v977_v19  ;;  %vm1538_vm7 = vcmask 130048  }
 0x29f   :  { %v982_v9 = vsel %vm975_vm10, %v978_v4, %v981_v62  ;;  %v1194_v5 = vsel %vm1187_vm11, %v1190_v7, %v1193_v0  ;;  %v1908_v62 = vld [vmem:[%s7730_s6] sm:$0xff]  ;;  %v1909_v0 = vld [vmem:[%s7730_s6 + $0x8] sm:$0xff]  ;;  %v1910_v7 = vld [vmem:[%s7730_s6 + $0x10] sm:$0xff] }
 0x2a0   :  { %v983_v11 = vsel %vm972_vm12, nan, %v982_v9  ;;  %v1195_v24 = vsel %vm972_vm12, nan, %v1194_v5  ;;  %v8110_v4 = vpack.c.bf16 %v1909_v0, %v1908_v62  ;;  %v1911_v9 = vld [vmem:[%s7730_s6 + $0x18] sm:$0xff]  ;;  %v7655_v0 = vmov 0  }
 0x2a1   :  { %v989_v43 = vmul.f32 %v987_v60, %v983_v11  ;;  %v1201_v15 = vmul.f32 %v1199_v1, %v1195_v24  ;;  %v8117_v5 = vpack.c.bf16 %v1911_v9, %v1910_v7  ;;  %v2073_v11 = vld [vmem:[%s7740_s20] sm:$0xff]  ;;  %v2074_v24 = vld [vmem:[%s7740_s20 + $0x8] sm:$0xff] }
 0x2a2   :  { %v7543_v22 = vpop.eup %7542  ;;  %v8129_v14 = vpack.c.bf16 %v2074_v24, %v2073_v11 }
 0x2a3   :  { %v1203_v17 = vadd.f32 %v1201_v15, %v989_v43  ;;  %v7545_v23 = vpop.eup %7544  ;;  %v876_v27 = vxor.u32 2147483648, %v7543_v22 }
 0x2a4   :  { %v873_v28 = vxor.u32 2147483648, %v7545_v23 }
 0x2a5   :  { %v1290_v31 = vmul.f32 %v1288_v6, %v1203_v17  ;;  %v877_v63 = vsel %vm875_vm13, %v876_v27, %v7545_v23  ;;  %v1090_v32 = vsel %vm1088_vm14, %v876_v27, %v7545_v23  ;;  %v6306_v27 = vld [vmem:[%s7730_s6 + $0x20] sm:$0xff] }
 0x2a6   :  { %v874_v33 = vsel %vm872_vm15, %v7543_v22, %v873_v28  ;;  %v1087_v53 = vsel %vm1085_vm1, %v7543_v22, %v873_v28  ;;  %v2075_v22 = vld [vmem:[%s7740_s20 + $0x10] sm:$0xff]  ;;  %v6307_v28 = vld [vmem:[%s7730_s6 + $0x28] sm:$0xff] }
 0x2a7   :  { %v878_v45 = vsel %vm871_vm2, %v874_v33, %v877_v63  ;;  %v1091_v34 = vsel %vm1084_vm3, %v1087_v53, %v1090_v32  ;;  %v8147_v63 = vpack.c.bf16 %v6307_v28, %v6306_v27  ;;  %v6308_v53 = vld [vmem:[%s7730_s6 + $0x30] sm:$0xff] }
 0x2a8   :  { %v879_v47 = vsel %vm868_vm4, nan, %v878_v45  ;;  %v1092_v56 = vsel %vm868_vm4, nan, %v1091_v34  ;;  %v6309_v45 = vld [vmem:[%s7730_s6 + $0x38] sm:$0xff] }
 0x2a9   :  { %v988_v25 = vmul.f32 %v987_v60, %v879_v47  ;;  %v1200_v12 = vmul.f32 %v1199_v1, %v1092_v56  ;;  %v8096_v60 = vpack.c.bf16 %v1305_v18, %v1304_v29  ;;  %v8155_v47 = vpack.c.bf16 %v6309_v45, %v6308_v53  ;;  %v6320_v56 = vld [vmem:[%s7740_s20 + $0x20] sm:$0xff]  ;;  %v6314_v45 = vld [vmem:[%s8770_s5 + $0x28] sm:$0xff] }
 0x2aa   :  { %v8215_v29 = vld [vmem:[%s8771_s9] ss:$0 sm:$0xff] }
 0x2ab   :  { %v1202_v13 = vadd.f32 %v1200_v12, %v988_v25  ;;  %v6321_v25 = vld [vmem:[%s7740_s20 + $0x28] sm:$0xff]  ;;  %v6313_v53 = vld [vmem:[%s8770_s5 + $0x20] sm:$0xff] }
 0x2ac   :  { %v8169_v12 = vpack.c.bf16 %v6321_v25, %v6320_v56  ;;  %v8247_v56 = vpack.c.bf16 %v6314_v45, %v6313_v53  ;;  %v6336_v53 = vld [vmem:[%s7730_s6 + $0x58] sm:$0xff] }
 0x2ad   :  { %6706 = vmatprep.mubr.msk.f32.mxu0 %vm163_vm0, %v1202_v13  ;;  %v1289_v40 = vmul.f32 %v1288_v6, %v1202_v13  ;;  %v8127_v6 = vld [vmem:[%s8769_s0] ss:$0 sm:$0xff]  ;;  %v6322_v13 = vld [vmem:[%s7740_s20 + $0x30] sm:$0xff] }
 0x2ae   :  { %6707 = vmatmul.mubr.msk.f32.vlgmr.msra.gmra.mrb[2].mxu0 %vm163_vm0, %v1203_v17  ;;  %v2076_v17 = vld [vmem:[%s7740_s20 + $0x18] sm:$0xff] }
 0x2af   :  { %6727 = vmatprep.mubr.msk.f32.mxu0 %vm7653_vm5, %v7652_v26  ;;  %v8139_v23 = vpack.c.bf16 %v2076_v17, %v2075_v22 }
 0x381   :  { %v6708_v39 = vpop.f32.mrb[2].mxu0 }
 0x382   :  { %v1296_v35 = vmul.f32 %v6708_v39, %v1294_v2  ;;  %v1276_v38 = vpop.f32.mrb[3].mxu0 }
 0x383   :  { %v1295_v44 = vmul.f32 %v1294_v2, %v1276_v38  ;;  %v6323_v2 = vld [vmem:[%s7740_s20 + $0x38] sm:$0xff] }
 0x384   :  { %v1298_v37 = vadd.f32 %v1296_v35, %v1290_v31  ;;  %v8178_v39 = vpack.c.bf16 %v6323_v2, %v6322_v13  ;;  %v6315_v13 = vld [vmem:[%s8770_s5 + $0x30] sm:$0xff]  ;;  %v6316_v2 = vld [vmem:[%s8770_s5 + $0x38] sm:$0xff] }
 0x385   :  { %v1297_v16 = vadd.f32 %v1295_v44, %v1289_v40 }
 0x387   :  { %6710 = vmatpush3.msra.mxu1 %v1297_v16  ;;  %v1994_v16 = vld [vmem:[%s8770_s5 + $0x10] sm:$0xff] }
 0x388   :  { %6712 = vmatmul.mubr.msk.f32.vlgmr.msra.gmra.mrb[2].mxu1 %vm1308_vm6, %v1307_v36  ;;  %7248 = vmatprep.subr.bf16.mxu1 %v7654_v48 }
 0x389   :  { %7250 = vmatpush3.bf16.msra.mxu1 %v7249_v20  ;;  %6722 = vmatprep.mubr.msk.f32.mxu1 %vm7653_vm5, %v7652_v26 }
 0x38a   :  { %7251 = vmatprep.subr.bf16.mxu1 %v7654_v48 }
 0x38d   :  { %7253 = vmatpush3.bf16.msra.mxu1 %v7252_v54 }
 0x38e   :  { %6737 = vmatprep.subr.mxu1 %v7652_v26 }
 0x45b   :  { %v1378_v50 = vpop.f32.mrb[2].mxu1 }
 0x45c   :  { %v6713_v42 = vpop.f32.mrb[3].mxu1  ;;  %6723 = vmatmul.mubr.msk.f32.vlgmr.msra.gmra.mrb[4].mxu1 %vm163_vm0, %v1378_v50 }
 0x45d   :  { %6738 = vmatpush3.msra.mxu1 %v1298_v37  ;;  %6739 = vmatprep.mubr.msk.f32.mxu1 %vm7653_vm5, %v7652_v26  ;;  %v8191_v37 = vpack.c.bf16 %v1993_v30, %v1992_v49  ;;  %v8265_v30 = vld [vmem:[%s8771_s9 + $0x1] ss:$0 sm:$0xff] }
 0x45e   :  { %6753 = vmatprep.subr.mxu1 %v7652_v26 }
 0x460   :  { %6740 = vmatmul.mubr.msk.f32.vlgmr.msra.gmra.mrb[6].mxu1 %vm1308_vm6, %v8087_v3 }
 0x461   :  { %6755 = vmatprep.mubr.msk.f32.mxu1 %vm7653_vm5, %v7652_v26 }
 0x52f   :  { %v1457_v55 = vpop.f32.mrb[4].mxu1 }
 0x530   :  { %v1458_v57 = vadd.f32 %v6287_v51, %v1457_v55  ;;  %v6724_v58 = vpop.f32.mrb[5].mxu1 }
 0x532   :  { %v1461_v59 = vmax.f32 %v1458_v57, 0.0  ;;  %v8218_v57 = vld [vmem:[%s8772_s13] ss:$0 sm:$0xff] }
 0x533   :  { %v1683_v1 = vpop.f32.mrb[6].mxu1 }
 0x534   :  { %6726 = vmatpush3.msra.mxu0 %v1461_v59  ;;  %v6741_v61 = vpop.f32.mrb[7].mxu1 }
 0x535   :  { %6728 = vmatmul.mubr.msk.f32.vlgmr.msra.gmra.mrb[4].mxu0 %vm1308_vm6, %v1307_v36  ;;  %7254 = vmatprep.subr.bf16.mxu0 %v7654_v48  ;;  %v1995_v36 = vld [vmem:[%s8770_s5 + $0x18] sm:$0xff] }
 0x536   :  { %7256 = vmatpush3.bf16.msra.mxu0 %v8096_v60  ;;  %6734 = vmatprep.mubr.msk.f32.mxu0 %vm7653_vm5, %v7652_v26  ;;  %v8197_v46 = vpack.c.bf16 %v1995_v36, %v1994_v16 }
 0x537   :  { %7257 = vmatprep.subr.bf16.mxu0 %v7654_v48 }
 0x608   :  { %v1528_v19 = vpop.f32.mrb[4].mxu0 }
 0x609   :  { %v6729_v8 = vpop.f32.mrb[5].mxu0  ;;  %6735 = vmatmul.mubr.msk.f32.vlgmr.msra.gmra.mrb[6].mxu0 %vm1538_vm7, %v1528_v19  ;;  %v1905_v19 = vld [vmem:[%s8774_s21] sm:$0x3] }
 0x60a   :  { %7259 = vmatpush3.bf16.msra.mxu0 %v7249_v20  ;;  %6750 = vmatprep.mubr.msk.f32.mxu0 %vm7653_vm5, %v7652_v26  ;;  %v1906_v8 = vsub.f32 1.0, %v1905_v19 }
 0x60b   :  { %7260 = vmatprep.subr.bf16.mxu0 %v7654_v48 }
 0x60c   :  { %v1907_v62 = vmul.f32 -10000.0, %v1906_v8  ;;  %v8289_v8 = vld [vmem:[%s8777_s25 + $0x8] sm:$0xff] }
 0x60e   :  { %7262 = vmatpush3.bf16.msra.mxu0 %v7252_v54  ;;  %vm2231_vm8 = vcmp.eq.f32.partialorder %v1907_v62, 0.0 }
 0x60f   :  { %7266 = vmatprep.subr.bf16.mxu0 %v7654_v48  ;;  %v8233_v7 = vsel %vm2231_vm8, 1, %v7655_v0 }
 0x610   :  { %v2236_v9 = vrot.slane %v8233_v7, %v7944_v41 }
 0x611   :  { %6751 = vmatmul.mubr.msk.f32.vlgmr.msra.gmra.mrb[8].mxu0 %vm163_vm0, %v1683_v1 }
 0x612   :  { %7268 = vmatpush3.bf16.msra.mxu0 %v8110_v4  ;;  %6773 = vmatprep.mubr.msk.f32.mxu0 %vm7653_vm5, %v7652_v26  ;;  %vm8237_vm9 = vcmp.eq.s32.totalorder %v2236_v9, 1 }
 0x613   :  { %7269 = vmatprep.subr.bf16.mxu0 %v7654_v48 }
 0x616   :  { %7271 = vmatpush3.bf16.msra.mxu0 %v8117_v5 }
 0x617   :  { %7278 = vmatprep.subr.bf16.mxu0 %v7654_v48 }
 0x6dc   :  { %v1608_v10 = vpop.f32.mrb[6].mxu0 }
 0x6dd   :  { %v8132_v43 = vadd.f32 %v8127_v6, %v1608_v10  ;;  %v6736_v15 = vpop.f32.mrb[7].mxu0 }
 0x6df   :  { %6774 = vmatmul.mubr.msk.f32.vlgmr.msra.gmra.mrb[10].mxu0 %vm163_vm0, %v8132_v43 }
 0x6e0   :  { %7280 = vmatpush3.bf16.msra.mxu0 %v8129_v14  ;;  %6795 = vmatprep.mubr.msk.f32.mxu0 %vm7653_vm5, %v7652_v26 }
 0x6e1   :  { %7281 = vmatprep.subr.bf16.mxu0 %v7654_v48 }
 0x6e4   :  { %v1756_v31 = vpop.f32.mrb[8].mxu0  ;;  %7283 = vmatpush3.bf16.msra.mxu0 %v8139_v23 }
 0x6e5   :  { %v1757_v32 = vadd.f32 %v6287_v51, %v1756_v31  ;;  %v6752_v33 = vpop.f32.mrb[9].mxu0  ;;  %7284 = vmatprep.subr.bf16.mxu0 %v7654_v48 }
 0x6e7   :  { %v1760_v34 = vmax.f32 %v1757_v32, 0.0  ;;  %6796 = vmatmul.mubr.msk.f32.vlgmr.msra.gmra.mrb[12].mxu0 %vm163_vm0, %v8132_v43 }
 0x6e8   :  { %7286 = vmatpush3.bf16.msra.mxu0 %v8147_v63  ;;  %6816 = vmatprep.mubr.msk.f32.mxu0 %vm7653_vm5, %v7652_v26 }
 0x6e9   :  { %6754 = vmatpush3.msra.mxu1 %v1760_v34  ;;  %7287 = vmatprep.subr.bf16.mxu0 %v7654_v48 }
 0x6ea   :  { %6756 = vmatmul.mubr.msk.f32.vlgmr.msra.gmra.mrb[8].mxu1 %vm1308_vm6, %v8087_v3  ;;  %7263 = vmatprep.subr.bf16.mxu1 %v7654_v48 }
 0x6eb   :  { %7265 = vmatpush3.bf16.msra.mxu1 %v8096_v60  ;;  %6762 = vmatprep.mubr.msk.f32.mxu1 %vm7653_vm5, %v7652_v26  ;;  %v8222_v60 = vld [vmem:[%s8773_s17] ss:$0 sm:$0xff] }
 0x6ec   :  { %7289 = vmatpush3.bf16.msra.mxu0 %v8155_v47  ;;  %7272 = vmatprep.subr.bf16.mxu1 %v7654_v48 }
 0x6ed   :  { %7296 = vmatprep.subr.bf16.mxu0 %v7654_v48 }
 0x6ef   :  { %6817 = vmatmul.mubr.msk.f32.vlgmr.msra.gmra.mrb[14].mxu0 %vm163_vm0, %v8132_v43 }
 0x6f0   :  { %7298 = vmatpush3.bf16.msra.mxu0 %v8169_v12  ;;  %6838 = vmatprep.mubr.msk.f32.mxu0 %vm7653_vm5, %v7652_v26 }
 0x6f1   :  { %7299 = vmatprep.subr.bf16.mxu0 %v7654_v48 }
 0x6f4   :  { %7301 = vmatpush3.bf16.msra.mxu0 %v8178_v39 }
 0x6f5   :  { %6851 = vmatprep.subr.mxu0 %v7652_v26 }
 0x6f7   :  { %6839 = vmatmul.mubr.msk.f32.vlgmr.msra.gmra.mrb[16].mxu0 %vm163_vm0, %v8132_v43 }
 0x6f8   :  { %6853 = vmatprep.mubr.msk.f32.mxu0 %vm7653_vm5, %v7652_v26  ;;  %6852 = vmatpush3.msra.mxu0 %v8289_v8 }
 0x6f9   :  { %7302 = vmatprep.subr.bf16.mxu0 %v7654_v48 }
 0x7b2   :  { %v1988_v35 = vpop.f32.mrb[10].mxu0 }
 0x7b3   :  { %v6775_v38 = vpop.f32.mrb[11].mxu0  ;;  %v1989_v1 = vadd.f32 %v8218_v57, %v1988_v35  ;;  %v8253_v35 = vpack.c.bf16 %v6316_v2, %v6315_v13  ;;  %v6347_v13 = vld [vmem:[%s7740_s20 + $0x40] sm:$0xff]  ;;  %v6348_v2 = vld [vmem:[%s7740_s20 + $0x48] sm:$0xff] }
 0x7ba   :  { %v2150_v40 = vpop.f32.mrb[12].mxu0 }
 0x7bb   :  { %v6797_v44 = vpop.f32.mrb[13].mxu0  ;;  %v2151_v61 = vadd.f32 %v8222_v60, %v2150_v40 }
 0x7bc   :  { %v8268_v44 = vld [vmem:[%s8772_s13 + $0x1] ss:$0 sm:$0xff] }
 0x7bd   :  { %v1827_v20 = vpop.f32.mrb[8].mxu1 }
 0x7be   :  { %6763 = vmatmul.mubr.msk.f32.vlgmr.msra.gmra.mrb[10].mxu1 %vm1538_vm7, %v1827_v20  ;;  %v6757_v21 = vpop.f32.mrb[9].mxu1  ;;  %v8272_v20 = vld [vmem:[%s8773_s17 + $0x1] ss:$0 sm:$0xff] }
 0x7bf   :  { %7274 = vmatpush3.bf16.msra.mxu1 %v8191_v37  ;;  %6784 = vmatprep.mubr.msk.f32.mxu1 %vm7653_vm5, %v7652_v26 }
 0x7c0   :  { %7275 = vmatprep.subr.bf16.mxu1 %v7654_v48 }
 0x7c2   :  { %v8202_v54 = vpop.f32.mrb[14].mxu0 }
 0x7c3   :  { %7277 = vmatpush3.bf16.msra.mxu1 %v8197_v46  ;;  %v6818_v50 = vpop.f32.mrb[15].mxu0  ;;  %v2404_v21 = vadd.f32 %v8268_v44, %v8202_v54 }
 0x7c4   :  { %6798 = vmatprep.subr.mxu1 %v7652_v26 }
 0x7c6   :  { %6785 = vmatmul.mubr.msk.f32.vlgmr.msra.gmra.mrb[12].mxu1 %vm163_vm0, %v8132_v43 }
 0x7c7   :  { %6800 = vmatprep.mubr.msk.f32.mxu1 %vm7653_vm5, %v7652_v26 }
 0x7ca   :  { %v8210_v42 = vpop.f32.mrb[16].mxu0 }
 0x7cb   :  { %v6840_v3 = vpop.f32.mrb[17].mxu0  ;;  %v2570_v50 = vadd.f32 %v8272_v20, %v8210_v42 }
 0x891   :  { %v8212_v51 = vpop.f32.mrb[10].mxu1 }
 0x892   :  { %v6764_v55 = vpop.f32.mrb[11].mxu1 }
 0x899   :  { %v2069_v18 = vpop.f32.mrb[12].mxu1 }
 0x89a   :  { %v2070_v58 = vadd.f32 %v8215_v29, %v2069_v18  ;;  %v6786_v59 = vpop.f32.mrb[13].mxu1 }
 0x89c   :  { %6799 = vmatpush3.xpose.msk.msra.mxu1 %vm1308_vm6, %v2070_v58 }
 0x89d   :  { %6803 = vmatprep.subr.mxu1 %v7652_v26 }
 0x89f   :  { %6801 = vmatmul.mubr.msk.f32.vlgmr.msra.gmra.mrb[14].mxu1 %vm1308_vm6, %v1989_v1 }
 0x8a0   :  { %6804 = vmatpush3.msra.mxu1 %v2151_v61  ;;  %6805 = vmatprep.mubr.msk.f32.mxu1 %vm7653_vm5, %v7652_v26 }
 0x8a1   :  { %7290 = vmatprep.subr.bf16.mxu1 %v7654_v48 }
 0x972   :  { %v2226_v11 = vpop.f32.mrb[14].mxu1 }
 0x973   :  { %v2230_v10 = vmul.f32 0.35355338, %v2226_v11  ;;  %v6802_v15 = vpop.f32.mrb[15].mxu1  ;;  %v8294_v11 = vld [vmem:[%s8777_s25] sm:$0xff] }
 0x974   :  { %v6341_v15 = vld [vmem:[%s8770_s5 + $0x48] sm:$0xff] }
 0x975   :  { %v2238_v22 = vsel %vm8237_vm9, -1e+09, %v2230_v10  ;;  %v6340_v10 = vld [vmem:[%s8770_s5 + $0x40] sm:$0xff] }
 0x976   :  { %v2239_v17 = vsel %vm1308_vm6, %v2238_v22, -inf }
 0x977   :  { %2240 = vmax.xlane.f32.xlu0 %v2239_v17  ;;  %v6342_v17 = vld [vmem:[%s8770_s5 + $0x50] sm:$0xff] }
 0xa04   :  { %v2241_v27 = vpop.xlane.xlu0 %2240 }
 0xa05   :  { %v2242_v28 = vsub.f32 %v2238_v22, %v2241_v27  ;;  %v8302_v22 = vpack.c.bf16 %v6341_v15, %v6340_v10  ;;  %v6343_v27 = vld [vmem:[%s8770_s5 + $0x58] sm:$0xff] }
 0xa07   :  { %v2243_v41 = vmul.f32 1.442695, %v2242_v28  ;;  %v8309_v28 = vpack.c.bf16 %v6343_v27, %v6342_v17 }
 0xa09   :  { %7546 = vpow2.f32 %v2243_v41  ;;  %v6333_v41 = vld [vmem:[%s7730_s6 + $0x40] sm:$0xff] }
 0xa13   :  { %v7547_v31 = vpop.eup %7546 }
 0xa14   :  { %v2245_v32 = vsel %vm1308_vm6, %v7547_v31, 0.0 }
 0xa15   :  { %2246 = vadd.xlane.f32.xlu0 %v2245_v32 }
 0xaa2   :  { %v2247_v33 = vpop.xlane.xlu0 %2246 }
 0xaa3   :  { %7548 = vrcp.f32 %v2247_v33  ;;  %v6335_v33 = vld [vmem:[%s7730_s6 + $0x50] sm:$0xff] }
 0xaad   :  { %v7549_v34 = vpop.eup %7548 }
 0xaae   :  { %v2249_v25 = vmul.f32 %v7549_v34, %v7547_v31  ;;  %v6334_v31 = vld [vmem:[%s7730_s6 + $0x48] sm:$0xff] }
 0xaaf   :  { %v8322_v32 = vpack.c.bf16 %v6334_v31, %v6333_v41 }
 0xab0   :  { %6806 = vmatmul.mubr.msk.f32.vlgmr.msra.gmra.mrb[16].mxu1 %vm1308_vm6, %v2249_v25  ;;  %v8328_v25 = vpack.c.bf16 %v6336_v53, %v6335_v33 }
 0xab1   :  { %7292 = vmatpush3.bf16.msra.mxu1 %v8247_v56  ;;  %6827 = vmatprep.mubr.msk.f32.mxu1 %vm7653_vm5, %v7652_v26 }
 0xab2   :  { %7293 = vmatprep.subr.bf16.mxu1 %v7654_v48 }
 0xab5   :  { %7295 = vmatpush3.bf16.msra.mxu1 %v8253_v35 }
 0xab6   :  { %6841 = vmatprep.subr.mxu1 %v7652_v26 }
 0xab8   :  { %6828 = vmatmul.mubr.msk.f32.vlgmr.msra.gmra.mrb[18].mxu1 %vm163_vm0, %v8132_v43 }
 0xab9   :  { %6843 = vmatprep.mubr.msk.f32.mxu1 %vm7653_vm5, %v7652_v26 }
 0xb83   :  { %v2319_v38 = vpop.f32.mrb[16].mxu1 }
 0xb84   :  { %v6807_v49 = vpop.f32.mrb[17].mxu1 }
 0xb8b   :  { %v2486_v40 = vpop.f32.mrb[18].mxu1 }
 0xb8c   :  { %v2487_v16 = vadd.f32 %v8265_v30, %v2486_v40  ;;  %v6829_v36 = vpop.f32.mrb[19].mxu1  ;;  %v8336_v40 = vpack.c.bf16 %v6348_v2, %v6347_v13  ;;  %v8380_v2 = vld [vmem:[%s8777_s25 + $0x10] sm:$0xff] }
 0xb8d   :  { %v6350_v36 = vld [vmem:[%s7740_s20 + $0x58] sm:$0xff] }
 0xb8e   :  { %6842 = vmatpush3.xpose.msk.msra.mxu1 %vm1308_vm6, %v2487_v16  ;;  %v6349_v16 = vld [vmem:[%s7740_s20 + $0x50] sm:$0xff] }
 0xb8f   :  { %6846 = vmatprep.subr.mxu1 %v7652_v26 }
 0xb91   :  { %6844 = vmatmul.mubr.msk.f32.vlgmr.msra.gmra.mrb[20].mxu1 %vm1308_vm6, %v2404_v21  ;;  %v8345_v21 = vld [vmem:[%s8771_s9 + $0x2] ss:$0 sm:$0xff] }
 0xb92   :  { %6847 = vmatpush3.msra.mxu1 %v2570_v50  ;;  %6848 = vmatprep.mubr.msk.f32.mxu1 %vm7653_vm5, %v7652_v26  ;;  %v8347_v50 = vpack.c.bf16 %v6350_v36, %v6349_v16  ;;  %v6360_v16 = vld [vmem:[%s7730_s6 + $0x68] sm:$0xff] }
 0xb93   :  { %6856 = vmatprep.subr.mxu1 %v7652_v26 }
 0xc64   :  { %v2645_v3 = vpop.f32.mrb[20].mxu1 }
 0xc65   :  { %v2649_v55 = vmul.f32 0.35355338, %v2645_v3  ;;  %v6845_v18 = vpop.f32.mrb[21].mxu1 }
 0xc67   :  { %v2650_v54 = vsel %vm8237_vm9, -1e+09, %v2649_v55 }
 0xc68   :  { %v2651_v58 = vsel %vm1308_vm6, %v2650_v54, -inf }
 0xc69   :  { %2652 = vmax.xlane.f32.xlu1 %v2651_v58 }
 0xcf6   :  { %v2653_v42 = vpop.xlane.xlu1 %2652 }
 0xcf7   :  { %v2654_v59 = vsub.f32 %v2650_v54, %v2653_v42 }
 0xcf9   :  { %v2655_v1 = vmul.f32 1.442695, %v2654_v59  ;;  %v8364_v59 = vld [vmem:[%s8772_s13 + $0x2] ss:$0 sm:$0xff] }
 0xcfb   :  { %7550 = vpow2.f32 %v2655_v1 }
 0xd05   :  { %v7551_v61 = vpop.eup %7550 }
 0xd06   :  { %v2657_v19 = vsel %vm1308_vm6, %v7551_v61, 0.0 }
 0xd07   :  { %2658 = vadd.xlane.f32.xlu1 %v2657_v19 }
 0xd94   :  { %v2659_v62 = vpop.xlane.xlu1 %2658 }
 0xd95   :  { %7552 = vrcp.f32 %v2659_v62  ;;  %v8371_v62 = vld [vmem:[%s8773_s17 + $0x2] ss:$0 sm:$0xff] }
 0xd9f   :  { %v7553_v0 = vpop.eup %7552 }
 0xda0   :  { %v2661_v9 = vmul.f32 %v7553_v0, %v7551_v61 }
 0xda2   :  { %6849 = vmatmul.mubr.msk.f32.vlgmr.msra.gmra.mrb[22].mxu1 %vm1308_vm6, %v2661_v9 }
 0xda3   :  { %6857 = vmatpush3.msra.mxu1 %v8294_v11  ;;  %6858 = vmatprep.mubr.msk.f32.mxu1 %vm7653_vm5, %v7652_v26 }
 0xda4   :  { %7308 = vmatprep.subr.bf16.mxu1 %v7654_v48 }
 0xda6   :  { %6859 = vmatmul.mubr.msk.f32.vlgmr.msra.gmra.mrb[24].mxu1 %vm1308_vm6, %v2319_v38 }
 0xda7   :  { %7310 = vmatpush3.bf16.msra.mxu1 %v8302_v22  ;;  %6880 = vmatprep.mubr.msk.f32.mxu1 %vm7653_vm5, %v7652_v26 }
 0xda8   :  { %7311 = vmatprep.subr.bf16.mxu1 %v7654_v48 }
 0xdab   :  { %7313 = vmatpush3.bf16.msra.mxu1 %v8309_v28 }
 0xdac   :  { %6894 = vmatprep.subr.mxu1 %v7652_v26 }
 0xdae   :  { %6881 = vmatmul.mubr.msk.f32.vlgmr.msra.gmra.mrb[26].mxu1 %vm163_vm0, %v8132_v43 }
 0xdaf   :  { %6896 = vmatprep.mubr.msk.f32.mxu1 %vm7653_vm5, %v7652_v26 }
 0xe75   :  { %v2731_v45 = vpop.f32.mrb[22].mxu1 }
 0xe76   :  { %v6850_v34 = vpop.f32.mrb[23].mxu1  ;;  %6854 = vmatmul.mubr.msk.f32.vlgmr.msra.gmra.mrb[18].mxu0 %vm1308_vm6, %v2731_v45 }
 0xe77   :  { %7304 = vmatpush3.bf16.msra.mxu0 %v8322_v32  ;;  %6869 = vmatprep.mubr.msk.f32.mxu0 %vm7653_vm5, %v7652_v26 }
 0xe78   :  { %7305 = vmatprep.subr.bf16.mxu0 %v7654_v48 }
 0xe79   :  { %v2879_v38 = vpop.f32.mrb[24].mxu1 }
 0xe7a   :  { %v6860_v49 = vpop.f32.mrb[25].mxu1 }
 0xe7b   :  { %7307 = vmatpush3.bf16.msra.mxu0 %v8328_v25  ;;  %v6359_v49 = vld [vmem:[%s7730_s6 + $0x60] sm:$0xff] }
 0xe7c   :  { %7314 = vmatprep.subr.bf16.mxu0 %v7654_v48 }
 0xe7e   :  { %6870 = vmatmul.mubr.msk.f32.vlgmr.msra.gmra.mrb[20].mxu0 %vm163_vm0, %v8132_v43 }
 0xe7f   :  { %7316 = vmatpush3.bf16.msra.mxu0 %v8336_v40  ;;  %6891 = vmatprep.mubr.msk.f32.mxu0 %vm7653_vm5, %v7652_v26 }
 0xe80   :  { %7317 = vmatprep.subr.bf16.mxu0 %v7654_v48 }
 0xe81   :  { %v3045_v3 = vpop.f32.mrb[26].mxu1 }
 0xe82   :  { %v3046_v55 = vadd.f32 %v8345_v21, %v3045_v3  ;;  %v6882_v18 = vpop.f32.mrb[27].mxu1  ;;  %v8386_v3 = vpack.c.bf16 %v6360_v16, %v6359_v49 }
 0xe83   :  { %7319 = vmatpush3.bf16.msra.mxu0 %v8347_v50  ;;  %v6361_v18 = vld [vmem:[%s7730_s6 + $0x70] sm:$0xff] }
 0xe84   :  { %6895 = vmatpush3.xpose.msk.msra.mxu1 %vm1308_vm6, %v3046_v55  ;;  %6904 = vmatprep.subr.mxu0 %v7652_v26 }
 0xe85   :  { %6899 = vmatprep.subr.mxu1 %v7652_v26 }
 0xe86   :  { %6892 = vmatmul.mubr.msk.f32.vlgmr.msra.gmra.mrb[22].mxu0 %vm163_vm0, %v8132_v43 }
 0xe87   :  { %6906 = vmatprep.mubr.msk.f32.mxu0 %vm7653_vm5, %v7652_v26  ;;  %6905 = vmatpush3.msra.mxu0 %v8380_v2 }
 0xe88   :  { %7326 = vmatprep.subr.bf16.mxu0 %v7654_v48 }
 0xf49   :  { %v2806_v54 = vpop.f32.mrb[18].mxu0 }
 0xf4a   :  { %v8361_v58 = vadd.f32 %v2879_v38, %v2806_v54  ;;  %v6855_v42 = vpop.f32.mrb[19].mxu0  ;;  %v6362_v54 = vld [vmem:[%s7730_s6 + $0x78] sm:$0xff]  ;;  %s8786_s6 = sld [smem:[#allocation18_spill]] }
 0xf4b   :  { %v8392_v42 = vpack.c.bf16 %v6362_v54, %v6361_v18  ;;  %v8442_v18 = vld [vmem:[%s8771_s9 + $0x3] ss:$0 sm:$0xff] }
 0xf51   :  { %v2962_v1 = vpop.f32.mrb[20].mxu0 }
 0xf52   :  { %v2963_v61 = vadd.f32 %v8364_v59, %v2962_v1  ;;  %v6871_v19 = vpop.f32.mrb[21].mxu0  ;;  %v6373_v1 = vld [vmem:[%s7740_s20 + $0x60] sm:$0xff] }
 0xf54   :  { %6897 = vmatmul.mubr.msk.f32.vlgmr.msra.gmra.mrb[28].mxu1 %vm1308_vm6, %v2963_v61  ;;  %v6374_v61 = vld [vmem:[%s7740_s20 + $0x68] sm:$0xff] }
 0xf55   :  { %6901 = vmatprep.mubr.msk.f32.mxu1 %vm7653_vm5, %v7652_v26  ;;  %v8400_v19 = vpack.c.bf16 %v6374_v61, %v6373_v1  ;;  %v8445_v1 = vld [vmem:[%s8772_s13 + $0x3] ss:$0 sm:$0xff] }
 0xf59   :  { %v3128_v0 = vpop.f32.mrb[22].mxu0 }
 0xf5a   :  { %v3129_v9 = vadd.f32 %v8371_v62, %v3128_v0  ;;  %v6893_v10 = vpop.f32.mrb[23].mxu0  ;;  %v6375_v0 = vld [vmem:[%s7740_s20 + $0x70] sm:$0xff] }
 0xf5c   :  { %6900 = vmatpush3.msra.mxu1 %v3129_v9  ;;  %v6376_v9 = vld [vmem:[%s7740_s20 + $0x78] sm:$0xff]  ;;  %s8787_s20 = sld [smem:[#allocation21_spill]] }
 0xf5d   :  { %7320 = vmatprep.subr.bf16.mxu1 %v7654_v48  ;;  %v8408_v10 = vpack.c.bf16 %v6376_v9, %v6375_v0  ;;  %v8449_v9 = vld [vmem:[%s8773_s17 + $0x3] ss:$0 sm:$0xff] }
0x1027   :  { %v3204_v15 = vpop.f32.mrb[28].mxu1 }
0x1028   :  { %v3208_v17 = vmul.f32 0.35355338, %v3204_v15  ;;  %v6898_v27 = vpop.f32.mrb[29].mxu1  ;;  %v6366_v15 = vld [vmem:[%s8770_s5 + $0x60] sm:$0xff] }
0x102a   :  { %v3209_v41 = vsel %vm8237_vm9, -1e+09, %v3208_v17  ;;  %v6367_v17 = vld [vmem:[%s8770_s5 + $0x68] sm:$0xff] }
0x102b   :  { %v3210_v31 = vsel %vm1308_vm6, %v3209_v41, -inf  ;;  %v8421_v27 = vpack.c.bf16 %v6367_v17, %v6366_v15 }
0x102c   :  { %3211 = vmax.xlane.f32.xlu0 %v3210_v31  ;;  %v6369_v31 = vld [vmem:[%s8770_s5 + $0x78] sm:$0xff] }
0x10b9   :  { %v3212_v33 = vpop.xlane.xlu0 %3211 }
0x10ba   :  { %v3213_v53 = vsub.f32 %v3209_v41, %v3212_v33  ;;  %v6368_v41 = vld [vmem:[%s8770_s5 + $0x70] sm:$0xff] }
0x10bc   :  { %v3214_v45 = vmul.f32 1.442695, %v3213_v53 }
0x10be   :  { %7554 = vpow2.f32 %v3214_v45  ;;  %v8427_v45 = vpack.c.bf16 %v6369_v31, %v6368_v41 }
0x10c8   :  { %v7555_v34 = vpop.eup %7554 }
0x10c9   :  { %v3216_v13 = vsel %vm1308_vm6, %v7555_v34, 0.0 }
0x10ca   :  { %3217 = vadd.xlane.f32.xlu1 %v3216_v13 }
0x1157   :  { %v3218_v38 = vpop.xlane.xlu1 %3217 }
0x1158   :  { %7556 = vrcp.f32 %v3218_v38 }
0x1162   :  { %v7557_v36 = vpop.eup %7556 }
0x1163   :  { %v3220_v55 = vmul.f32 %v7557_v36, %v7555_v34 }
0x1165   :  { %6902 = vmatmul.mubr.msk.f32.vlgmr.msra.gmra.mrb[30].mxu1 %vm1308_vm6, %v3220_v55 }
0x1166   :  { %7322 = vmatpush3.bf16.msra.mxu1 %v8386_v3  ;;  %6917 = vmatprep.mubr.msk.f32.mxu1 %vm7653_vm5, %v7652_v26 }
0x1167   :  { %7323 = vmatprep.subr.bf16.mxu1 %v7654_v48 }
0x116a   :  { %7325 = vmatpush3.bf16.msra.mxu1 %v8392_v42 }
0x116b   :  { %7332 = vmatprep.subr.bf16.mxu1 %v7654_v48 }
0x116d   :  { %6918 = vmatmul.mubr.msk.f32.vlgmr.msra.gmra.mrb[32].mxu1 %vm163_vm0, %v8132_v43 }
0x116e   :  { %7334 = vmatpush3.bf16.msra.mxu1 %v8400_v19  ;;  %6939 = vmatprep.mubr.msk.f32.mxu1 %vm7653_vm5, %v7652_v26 }
0x116f   :  { %7335 = vmatprep.subr.bf16.mxu1 %v7654_v48 }
0x1172   :  { %7337 = vmatpush3.bf16.msra.mxu1 %v8408_v10 }
0x1173   :  { %6952 = vmatprep.subr.mxu1 %v7652_v26 }
0x1175   :  { %6940 = vmatmul.mubr.msk.f32.vlgmr.msra.gmra.mrb[34].mxu1 %vm163_vm0, %v8132_v43 }
0x1176   :  { %6954 = vmatprep.mubr.msk.f32.mxu1 %vm7653_vm5, %v7652_v26 }
0x1238   :  { %v3290_v33 = vpop.f32.mrb[30].mxu1 }
0x1239   :  { %v6903_v53 = vpop.f32.mrb[31].mxu1  ;;  %6907 = vmatmul.mubr.msk.f32.vlgmr.msra.gmra.mrb[24].mxu0 %vm1308_vm6, %v3290_v33 }
0x123a   :  { %7328 = vmatpush3.bf16.msra.mxu0 %v8421_v27  ;;  %6928 = vmatprep.mubr.msk.f32.mxu0 %vm7653_vm5, %v7652_v26 }
0x123b   :  { %7329 = vmatprep.subr.bf16.mxu0 %v7654_v48 }
0x123e   :  { %7331 = vmatpush3.bf16.msra.mxu0 %v8427_v45 }
0x123f   :  { %6942 = vmatprep.subr.mxu0 %v7652_v26 }
0x1240   :  { %v3449_v34 = vpop.f32.mrb[32].mxu1 }
0x1241   :  { %v6919_v13 = vpop.f32.mrb[33].mxu1  ;;  %6929 = vmatmul.mubr.msk.f32.vlgmr.msra.gmra.mrb[26].mxu0 %vm163_vm0, %v8132_v43  ;;  %v3450_v15 = vadd.f32 %v8445_v1, %v3449_v34 }
0x1242   :  { %6944 = vmatprep.mubr.msk.f32.mxu0 %vm7653_vm5, %v7652_v26 }
0x1248   :  { %v3615_v38 = vpop.f32.mrb[34].mxu1 }
0x1249   :  { %v6941_v49 = vpop.f32.mrb[35].mxu1 }
0x130c   :  { %v3365_v16 = vpop.f32.mrb[24].mxu0 }
0x130d   :  { %v8439_v36 = vadd.f32 %v3365_v16, %v8361_v58  ;;  %v6908_v55 = vpop.f32.mrb[25].mxu0  ;;  %v3616_v58 = vadd.f32 %v8449_v9, %v3615_v38 }
0x130e   :  { %v8464_v55 = vld [vmem:[%s8777_s25 + $0x18] sm:$0xff] }
0x130f   :  { %6953 = vmatpush3.msra.mxu1 %v8464_v55 }
0x1310   :  { %7344 = vmatprep.subr.bf16.mxu1 %v7654_v48 }
0x1314   :  { %v3532_v54 = vpop.f32.mrb[26].mxu0 }
0x1315   :  { %v3533_v61 = vadd.f32 %v8442_v18, %v3532_v54  ;;  %v6930_v0 = vpop.f32.mrb[27].mxu0 }
0x1316   :  { %v8476_v0 = vadd.f32 %v8127_v6, %v8212_v51 }
0x1317   :  { %6943 = vmatpush3.xpose.msk.msra.mxu0 %vm1308_vm6, %v3533_v61 }
0x1318   :  { %6947 = vmatprep.subr.mxu0 %v7652_v26 }
0x131a   :  { %6945 = vmatmul.mubr.msk.f32.vlgmr.msra.gmra.mrb[28].mxu0 %vm1308_vm6, %v3450_v15 }
0x131b   :  { %6948 = vmatpush3.msra.mxu0 %v3616_v58  ;;  %6949 = vmatprep.mubr.msk.f32.mxu0 %vm7653_vm5, %v7652_v26 }
0x131c   :  { %7338 = vmatprep.subr.bf16.mxu0 %v7654_v48 }
0x13ed   :  { %v3691_v17 = vpop.f32.mrb[28].mxu0 }
0x13ee   :  { %v3695_v41 = vmul.f32 0.35355338, %v3691_v17  ;;  %v6946_v31 = vpop.f32.mrb[29].mxu0 }
0x13f0   :  { %v3696_v33 = vsel %vm8237_vm9, -1e+09, %v3695_v41 }
0x13f1   :  { %v3697_v53 = vsel %vm1308_vm6, %v3696_v33, -inf }
0x13f2   :  { %3698 = vmax.xlane.f32.xlu0 %v3697_v53 }
0x147f   :  { %v3699_v34 = vpop.xlane.xlu0 %3698 }
0x1480   :  { %v3700_v13 = vsub.f32 %v3696_v33, %v3699_v34 }
0x1482   :  { %v3701_v38 = vmul.f32 1.442695, %v3700_v13 }
0x1484   :  { %7558 = vpow2.f32 %v3701_v38 }
0x148e   :  { %v7559_v49 = vpop.eup %7558 }
0x148f   :  { %v3703_v16 = vsel %vm1308_vm6, %v7559_v49, 0.0 }
0x1490   :  { %3704 = vadd.xlane.f32.xlu1 %v3703_v16 }
0x151d   :  { %v3705_v54 = vpop.xlane.xlu1 %3704 }
0x151e   :  { %7560 = vrcp.f32 %v3705_v54 }
0x1528   :  { %v7561_v24 = vpop.eup %7560 }
0x1529   :  { %v3707_v61 = vmul.f32 %v7561_v24, %v7559_v49 }
0x152b   :  { %6950 = vmatmul.mubr.msk.f32.vlgmr.msra.gmra.mrb[30].mxu0 %vm1308_vm6, %v3707_v61 }
0x152c   :  { %7340 = vmatpush3.bf16.msra.mxu0 %v8110_v4  ;;  %6965 = vmatprep.mubr.msk.f32.mxu0 %vm7653_vm5, %v7652_v26 }
0x152d   :  { %7341 = vmatprep.subr.bf16.mxu0 %v7654_v48 }
0x1530   :  { %7343 = vmatpush3.bf16.msra.mxu0 %v8117_v5 }
0x1531   :  { %7350 = vmatprep.subr.bf16.mxu0 %v7654_v48 }
0x1533   :  { %6966 = vmatmul.mubr.msk.f32.vlgmr.msra.gmra.mrb[32].mxu0 %vm163_vm0, %v8476_v0 }
0x1534   :  { %7352 = vmatpush3.bf16.msra.mxu0 %v8129_v14  ;;  %6987 = vmatprep.mubr.msk.f32.mxu0 %vm7653_vm5, %v7652_v26 }
0x1535   :  { %7353 = vmatprep.subr.bf16.mxu0 %v7654_v48 }
0x1538   :  { %7355 = vmatpush3.bf16.msra.mxu0 %v8139_v23 }
0x1539   :  { %7356 = vmatprep.subr.bf16.mxu0 %v7654_v48 }
0x153b   :  { %6988 = vmatmul.mubr.msk.f32.vlgmr.msra.gmra.mrb[34].mxu0 %vm163_vm0, %v8476_v0 }
0x153c   :  { %7358 = vmatpush3.bf16.msra.mxu0 %v8147_v63  ;;  %7008 = vmatprep.mubr.msk.f32.mxu0 %vm7653_vm5, %v7652_v26 }
0x153d   :  { %7359 = vmatprep.subr.bf16.mxu0 %v7654_v48 }
0x1540   :  { %7361 = vmatpush3.bf16.msra.mxu0 %v8155_v47 }
0x1541   :  { %7368 = vmatprep.subr.bf16.mxu0 %v7654_v48 }
0x1543   :  { %7009 = vmatmul.mubr.msk.f32.vlgmr.msra.gmra.mrb[36].mxu0 %vm163_vm0, %v8476_v0 }
0x1544   :  { %7370 = vmatpush3.bf16.msra.mxu0 %v8169_v12  ;;  %7030 = vmatprep.mubr.msk.f32.mxu0 %vm7653_vm5, %v7652_v26 }
0x1545   :  { %7371 = vmatprep.subr.bf16.mxu0 %v7654_v48 }
0x1548   :  { %7373 = vmatpush3.bf16.msra.mxu0 %v8178_v39 }
0x1549   :  { %7043 = vmatprep.subr.mxu0 %v7652_v26 }
0x154b   :  { %7031 = vmatmul.mubr.msk.f32.vlgmr.msra.gmra.mrb[38].mxu0 %vm163_vm0, %v8476_v0 }
0x154c   :  { %7044 = vmatpush3.msra.mxu0 %v8289_v8  ;;  %7045 = vmatprep.mubr.msk.f32.mxu0 %vm7653_vm5, %v7652_v26 }
0x154d   :  { %7374 = vmatprep.subr.bf16.mxu0 %v7654_v48 }
0x15fe   :  { %v3777_v4 = vpop.f32.mrb[30].mxu0 }
0x15ff   :  { %v6951_v5 = vpop.f32.mrb[31].mxu0  ;;  %6955 = vmatmul.mubr.msk.f32.vlgmr.msra.gmra.mrb[36].mxu1 %vm1308_vm6, %v3777_v4 }
0x1600   :  { %7346 = vmatpush3.bf16.msra.mxu1 %v8191_v37  ;;  %6976 = vmatprep.mubr.msk.f32.mxu1 %vm7653_vm5, %v7652_v26 }
0x1601   :  { %7347 = vmatprep.subr.bf16.mxu1 %v7654_v48 }
0x1604   :  { %7349 = vmatpush3.bf16.msra.mxu1 %v8197_v46 }
0x1605   :  { %6990 = vmatprep.subr.mxu1 %v7652_v26 }
0x1606   :  { %v3933_v6 = vpop.f32.mrb[32].mxu0 }
0x1607   :  { %v6967_v14 = vpop.f32.mrb[33].mxu0  ;;  %6977 = vmatmul.mubr.msk.f32.vlgmr.msra.gmra.mrb[38].mxu1 %vm163_vm0, %v8476_v0  ;;  %v3934_v41 = vadd.f32 %v8218_v57, %v3933_v6 }
0x1608   :  { %6992 = vmatprep.mubr.msk.f32.mxu1 %vm7653_vm5, %v7652_v26 }
0x160e   :  { %v4073_v23 = vpop.f32.mrb[34].mxu0 }
0x160f   :  { %v6989_v63 = vpop.f32.mrb[35].mxu0  ;;  %v4074_v31 = vadd.f32 %v8222_v60, %v4073_v23 }
0x1616   :  { %v4310_v47 = vpop.f32.mrb[36].mxu0 }
0x1617   :  { %v7010_v12 = vpop.f32.mrb[37].mxu0  ;;  %v4311_v14 = vadd.f32 %v8268_v44, %v4310_v47 }
0x161e   :  { %v4450_v39 = vpop.f32.mrb[38].mxu0 }
0x161f   :  { %v7032_v37 = vpop.f32.mrb[39].mxu0 }
0x16d2   :  { %v3852_v51 = vpop.f32.mrb[36].mxu1 }
0x16d3   :  { %v8521_v8 = vadd.f32 %v3852_v51, %v8439_v36  ;;  %v6956_v46 = vpop.f32.mrb[37].mxu1 }
0x16da   :  { %v4003_v15 = vpop.f32.mrb[38].mxu1 }
0x16db   :  { %v4004_v58 = vadd.f32 %v8215_v29, %v4003_v15  ;;  %v6978_v17 = vpop.f32.mrb[39].mxu1  ;;  %v4157_v29 = vrot.slane %v8233_v7, %v8048_v52 }
0x16dd   :  { %6991 = vmatpush3.xpose.msk.msra.mxu1 %vm1308_vm6, %v4004_v58  ;;  %vm8534_vm10 = vcmp.eq.s32.totalorder %v4157_v29, 1 }
0x16de   :  { %6995 = vmatprep.subr.mxu1 %v7652_v26 }
0x16e0   :  { %6993 = vmatmul.mubr.msk.f32.vlgmr.msra.gmra.mrb[40].mxu1 %vm1308_vm6, %v3934_v41 }
0x16e1   :  { %6996 = vmatpush3.msra.mxu1 %v4074_v31  ;;  %6997 = vmatprep.mubr.msk.f32.mxu1 %vm7653_vm5, %v7652_v26 }
0x16e2   :  { %7362 = vmatprep.subr.bf16.mxu1 %v7654_v48 }
0x17b3   :  { %v4149_v36 = vpop.f32.mrb[40].mxu1 }
0x17b4   :  { %v4153_v57 = vmul.f32 0.35355338, %v4149_v36  ;;  %v6994_v53 = vpop.f32.mrb[41].mxu1 }
0x17b6   :  { %v4159_v60 = vsel %vm8534_vm10, -1e+09, %v4153_v57 }
0x17b7   :  { %v4160_v34 = vsel %vm1308_vm6, %v4159_v60, -inf }
0x17b8   :  { %4161 = vmax.xlane.f32.xlu0 %v4160_v34 }
0x1845   :  { %v4162_v13 = vpop.xlane.xlu0 %4161 }
0x1846   :  { %v4163_v38 = vsub.f32 %v4159_v60, %v4162_v13 }
0x1848   :  { %v4164_v49 = vmul.f32 1.442695, %v4163_v38 }
0x184a   :  { %7562 = vpow2.f32 %v4164_v49 }
0x1854   :  { %v7563_v16 = vpop.eup %7562 }
0x1855   :  { %v4166_v52 = vsel %vm1308_vm6, %v7563_v16, 0.0 }
0x1856   :  { %4167 = vadd.xlane.f32.xlu1 %v4166_v52 }
0x18e3   :  { %v4168_v7 = vpop.xlane.xlu1 %4167 }
0x18e4   :  { %7564 = vrcp.f32 %v4168_v7 }
0x18ee   :  { %v7565_v54 = vpop.eup %7564 }
0x18ef   :  { %v4170_v24 = vmul.f32 %v7565_v54, %v7563_v16 }
0x18f1   :  { %6998 = vmatmul.mubr.msk.f32.vlgmr.msra.gmra.mrb[42].mxu1 %vm1308_vm6, %v4170_v24 }
0x18f2   :  { %7364 = vmatpush3.bf16.msra.mxu1 %v8247_v56  ;;  %7019 = vmatprep.mubr.msk.f32.mxu1 %vm7653_vm5, %v7652_v26 }
0x18f3   :  { %7365 = vmatprep.subr.bf16.mxu1 %v7654_v48 }
0x18f6   :  { %7367 = vmatpush3.bf16.msra.mxu1 %v8253_v35  ;;  %v4451_v35 = vadd.f32 %v8272_v20, %v4450_v39 }
0x18f7   :  { %7033 = vmatprep.subr.mxu1 %v7652_v26 }
0x18f9   :  { %7020 = vmatmul.mubr.msk.f32.vlgmr.msra.gmra.mrb[44].mxu1 %vm163_vm0, %v8476_v0 }
0x18fa   :  { %7035 = vmatprep.mubr.msk.f32.mxu1 %vm7653_vm5, %v7652_v26 }
0x19c4   :  { %v4240_v61 = vpop.f32.mrb[42].mxu1 }
0x19c5   :  { %v6999_v4 = vpop.f32.mrb[43].mxu1 }
0x19cc   :  { %v4380_v5 = vpop.f32.mrb[44].mxu1 }
0x19cd   :  { %v4381_v56 = vadd.f32 %v8265_v30, %v4380_v5  ;;  %v7021_v6 = vpop.f32.mrb[45].mxu1 }
0x19cf   :  { %7034 = vmatpush3.xpose.msk.msra.mxu1 %vm1308_vm6, %v4381_v56 }
0x19d0   :  { %7038 = vmatprep.subr.mxu1 %v7652_v26 }
0x19d2   :  { %7036 = vmatmul.mubr.msk.f32.vlgmr.msra.gmra.mrb[46].mxu1 %vm1308_vm6, %v4311_v14 }
0x19d3   :  { %7039 = vmatpush3.msra.mxu1 %v4451_v35  ;;  %7040 = vmatprep.mubr.msk.f32.mxu1 %vm7653_vm5, %v7652_v26 }
0x19d4   :  { %7048 = vmatprep.subr.mxu1 %v7652_v26 }
0x1aa5   :  { %v4526_v23 = vpop.f32.mrb[46].mxu1 }
0x1aa6   :  { %v4530_v63 = vmul.f32 0.35355338, %v4526_v23  ;;  %v7037_v30 = vpop.f32.mrb[47].mxu1 }
0x1aa8   :  { %v4531_v12 = vsel %vm8534_vm10, -1e+09, %v4530_v63  ;;  %v6385_v63 = vld [vmem:[%s8780_s29] ss:$0 sm:$0xff] }
0x1aa9   :  { %v4532_v44 = vsel %vm1308_vm6, %v4531_v12, -inf  ;;  %v3863_v30 = vadd.f32 %v6385_v63, %v8521_v8 }
0x1aaa   :  { %4533 = vmax.xlane.f32.xlu0 %v4532_v44 }
0x1b37   :  { %v4534_v47 = vpop.xlane.xlu0 %4533 }
0x1b38   :  { %v4535_v37 = vsub.f32 %v4531_v12, %v4534_v47 }
0x1b3a   :  { %v4536_v20 = vmul.f32 1.442695, %v4535_v37  ;;  %v5655_v37 = vadd.f32 %v3863_v30, %v8132_v43  ;;  %v5805_v30 = vld [vmem:[%s8784_s19 + $0x48] sm:$0xff] }
0x1b3c   :  { %7566 = vpow2.f32 %v4536_v20 }
0x1b46   :  { %v7567_v39 = vpop.eup %7566 }
0x1b47   :  { %v4538_v51 = vsel %vm1308_vm6, %v7567_v39, 0.0 }
0x1b48   :  { %4539 = vadd.xlane.f32.xlu1 %v4538_v51 }
0x1bd5   :  { %v4540_v46 = vpop.xlane.xlu1 %4539 }
0x1bd6   :  { %7568 = vrcp.f32 %v4540_v46 }
0x1be0   :  { %v7569_v15 = vpop.eup %7568 }
0x1be1   :  { %v4542_v58 = vmul.f32 %v7569_v15, %v7567_v39 }
0x1be3   :  { %7041 = vmatmul.mubr.msk.f32.vlgmr.msra.gmra.mrb[48].mxu1 %vm1308_vm6, %v4542_v58 }
0x1be4   :  { %7049 = vmatpush3.msra.mxu1 %v8294_v11  ;;  %7050 = vmatprep.mubr.msk.f32.mxu1 %vm7653_vm5, %v7652_v26 }
0x1be5   :  { %7380 = vmatprep.subr.bf16.mxu1 %v7654_v48 }
0x1be7   :  { %7051 = vmatmul.mubr.msk.f32.vlgmr.msra.gmra.mrb[50].mxu1 %vm1308_vm6, %v4240_v61 }
0x1be8   :  { %7382 = vmatpush3.bf16.msra.mxu1 %v8302_v22  ;;  %7072 = vmatprep.mubr.msk.f32.mxu1 %vm7653_vm5, %v7652_v26 }
0x1be9   :  { %7383 = vmatprep.subr.bf16.mxu1 %v7654_v48 }
0x1bec   :  { %7385 = vmatpush3.bf16.msra.mxu1 %v8309_v28 }
0x1bed   :  { %7086 = vmatprep.subr.mxu1 %v7652_v26 }
0x1bef   :  { %7073 = vmatmul.mubr.msk.f32.vlgmr.msra.gmra.mrb[52].mxu1 %vm163_vm0, %v8476_v0 }
0x1bf0   :  { %7088 = vmatprep.mubr.msk.f32.mxu1 %vm7653_vm5, %v7652_v26 }
0x1cb6   :  { %v4612_v11 = vpop.f32.mrb[48].mxu1 }
0x1cb7   :  { %v7042_v17 = vpop.f32.mrb[49].mxu1  ;;  %7046 = vmatmul.mubr.msk.f32.vlgmr.msra.gmra.mrb[40].mxu0 %vm1308_vm6, %v4612_v11 }
0x1cb8   :  { %7376 = vmatpush3.bf16.msra.mxu0 %v8322_v32  ;;  %7061 = vmatprep.mubr.msk.f32.mxu0 %vm7653_vm5, %v7652_v26 }
0x1cb9   :  { %7377 = vmatprep.subr.bf16.mxu0 %v7654_v48 }
0x1cba   :  { %v4758_v22 = vpop.f32.mrb[50].mxu1 }
0x1cbb   :  { %v7052_v28 = vpop.f32.mrb[51].mxu1 }
0x1cbc   :  { %7379 = vmatpush3.bf16.msra.mxu0 %v8328_v25 }
0x1cbd   :  { %7386 = vmatprep.subr.bf16.mxu0 %v7654_v48 }
0x1cbf   :  { %7062 = vmatmul.mubr.msk.f32.vlgmr.msra.gmra.mrb[42].mxu0 %vm163_vm0, %v8476_v0 }
0x1cc0   :  { %7388 = vmatpush3.bf16.msra.mxu0 %v8336_v40  ;;  %7083 = vmatprep.mubr.msk.f32.mxu0 %vm7653_vm5, %v7652_v26 }
0x1cc1   :  { %7389 = vmatprep.subr.bf16.mxu0 %v7654_v48 }
0x1cc2   :  { %v4898_v32 = vpop.f32.mrb[52].mxu1 }
0x1cc3   :  { %v4899_v41 = vadd.f32 %v8345_v21, %v4898_v32  ;;  %v7074_v31 = vpop.f32.mrb[53].mxu1 }
0x1cc4   :  { %7391 = vmatpush3.bf16.msra.mxu0 %v8347_v50  ;;  %v8665_v31 = vld [vmem:[%s8781_s3] ss:$0 sm:$0xff] }
0x1cc5   :  { %7087 = vmatpush3.xpose.msk.msra.mxu1 %vm1308_vm6, %v4899_v41  ;;  %7096 = vmatprep.subr.mxu0 %v7652_v26 }
0x1cc6   :  { %7091 = vmatprep.subr.mxu1 %v7652_v26 }
0x1cc7   :  { %7084 = vmatmul.mubr.msk.f32.vlgmr.msra.gmra.mrb[44].mxu0 %vm163_vm0, %v8476_v0 }
0x1cc8   :  { %7097 = vmatpush3.msra.mxu0 %v8380_v2  ;;  %7098 = vmatprep.mubr.msk.f32.mxu0 %vm7653_vm5, %v7652_v26 }
0x1cc9   :  { %7398 = vmatprep.subr.bf16.mxu0 %v7654_v48 }
0x1d8a   :  { %v4685_v25 = vpop.f32.mrb[40].mxu0 }
0x1d8b   :  { %v4759_v40 = vadd.f32 %v4758_v22, %v4685_v25  ;;  %v7047_v21 = vpop.f32.mrb[41].mxu0 }
0x1d92   :  { %v4828_v50 = vpop.f32.mrb[42].mxu0 }
0x1d93   :  { %v4829_v29 = vadd.f32 %v8364_v59, %v4828_v50  ;;  %v7063_v36 = vpop.f32.mrb[43].mxu0  ;;  %v8668_v50 = vld [vmem:[%s8782_s8] ss:$0 sm:$0xff] }
0x1d95   :  { %7089 = vmatmul.mubr.msk.f32.vlgmr.msra.gmra.mrb[54].mxu1 %vm1308_vm6, %v4829_v29 }
0x1d96   :  { %7093 = vmatprep.mubr.msk.f32.mxu1 %vm7653_vm5, %v7652_v26 }
0x1d9a   :  { %v4968_v57 = vpop.f32.mrb[44].mxu0 }
0x1d9b   :  { %v4969_v2 = vadd.f32 %v8371_v62, %v4968_v57  ;;  %v7085_v53 = vpop.f32.mrb[45].mxu0 }
0x1d9d   :  { %7092 = vmatpush3.msra.mxu1 %v4969_v2 }
0x1d9e   :  { %7392 = vmatprep.subr.bf16.mxu1 %v7654_v48 }
0x1e68   :  { %v5044_v60 = vpop.f32.mrb[54].mxu1 }
0x1e69   :  { %v5048_v34 = vmul.f32 0.35355338, %v5044_v60  ;;  %v7090_v13 = vpop.f32.mrb[55].mxu1 }
0x1e6b   :  { %v5049_v38 = vsel %vm8534_vm10, -1e+09, %v5048_v34 }
0x1e6c   :  { %v5050_v59 = vsel %vm1308_vm6, %v5049_v38, -inf }
0x1e6d   :  { %5051 = vmax.xlane.f32.xlu0 %v5050_v59 }
0x1efa   :  { %v5052_v49 = vpop.xlane.xlu0 %5051 }
0x1efb   :  { %v5053_v16 = vsub.f32 %v5049_v38, %v5052_v49 }
0x1efd   :  { %v5054_v52 = vmul.f32 1.442695, %v5053_v16 }
0x1eff   :  { %7570 = vpow2.f32 %v5054_v52 }
0x1f09   :  { %v7571_v7 = vpop.eup %7570 }
0x1f0a   :  { %v5056_v62 = vsel %vm1308_vm6, %v7571_v7, 0.0 }
0x1f0b   :  { %5057 = vadd.xlane.f32.xlu1 %v5056_v62 }
0x1f98   :  { %v5058_v54 = vpop.xlane.xlu1 %5057 }
0x1f99   :  { %7572 = vrcp.f32 %v5058_v54  ;;  %v5702_v54 = vld [vmem:[%s8783_s14] sm:$0xff] }
0x1fa3   :  { %v7573_v24 = vpop.eup %7572 }
0x1fa4   :  { %v5060_v61 = vmul.f32 %v7573_v24, %v7571_v7  ;;  %v5703_v24 = vld [vmem:[%s8783_s14 + $0x8] sm:$0xff] }
0x1fa6   :  { %7094 = vmatmul.mubr.msk.f32.vlgmr.msra.gmra.mrb[56].mxu1 %vm1308_vm6, %v5060_v61  ;;  %v7410_v61 = vpack.c.bf16 %v5703_v24, %v5702_v54  ;;  %v5940_v24 = vld [vmem:[%s8787_s20] sm:$0xff] }
0x1fa7   :  { %7394 = vmatpush3.bf16.msra.mxu1 %v8386_v3  ;;  %7109 = vmatprep.mubr.msk.f32.mxu1 %vm7653_vm5, %v7652_v26 }
0x1fa8   :  { %7395 = vmatprep.subr.bf16.mxu1 %v7654_v48 }
0x1fab   :  { %7397 = vmatpush3.bf16.msra.mxu1 %v8392_v42 }
0x1fac   :  { %7404 = vmatprep.subr.bf16.mxu1 %v7654_v48 }
0x1fae   :  { %7110 = vmatmul.mubr.msk.f32.vlgmr.msra.gmra.mrb[58].mxu1 %vm163_vm0, %v8476_v0 }
0x1faf   :  { %7406 = vmatpush3.bf16.msra.mxu1 %v8400_v19  ;;  %7131 = vmatprep.mubr.msk.f32.mxu1 %vm7653_vm5, %v7652_v26 }
0x1fb0   :  { %7407 = vmatprep.subr.bf16.mxu1 %v7654_v48 }
0x1fb3   :  { %7409 = vmatpush3.bf16.msra.mxu1 %v8408_v10 }
0x1fb4   :  { %7144 = vmatprep.subr.mxu1 %v7652_v26 }
0x1fb6   :  { %7132 = vmatmul.mubr.msk.f32.vlgmr.msra.gmra.mrb[60].mxu1 %vm163_vm0, %v8476_v0 }
0x1fb7   :  { %7145 = vmatpush3.msra.mxu1 %v8464_v55  ;;  %7146 = vmatprep.mubr.msk.f32.mxu1 %vm7653_vm5, %v7652_v26 }
0x2079   :  { %v5130_v3 = vpop.f32.mrb[56].mxu1 }
0x207a   :  { %v7095_v42 = vpop.f32.mrb[57].mxu1  ;;  %7099 = vmatmul.mubr.msk.f32.vlgmr.msra.gmra.mrb[46].mxu0 %vm1308_vm6, %v5130_v3  ;;  %v5705_v3 = vld [vmem:[%s8783_s14 + $0x18] sm:$0xff] }
0x207b   :  { %7400 = vmatpush3.bf16.msra.mxu0 %v8421_v27  ;;  %7120 = vmatprep.mubr.msk.f32.mxu0 %vm7653_vm5, %v7652_v26 }
0x207c   :  { %7401 = vmatprep.subr.bf16.mxu0 %v7654_v48 }
0x207f   :  { %7403 = vmatpush3.bf16.msra.mxu0 %v8427_v45 }
0x2080   :  { %7134 = vmatprep.subr.mxu0 %v7652_v26 }
0x2081   :  { %v5274_v19 = vpop.f32.mrb[58].mxu1 }
0x2082   :  { %v7111_v10 = vpop.f32.mrb[59].mxu1  ;;  %7121 = vmatmul.mubr.msk.f32.vlgmr.msra.gmra.mrb[48].mxu0 %vm163_vm0, %v8476_v0  ;;  %v5275_v35 = vadd.f32 %v8445_v1, %v5274_v19  ;;  %v5796_v19 = vld [vmem:[%s8784_s19] sm:$0xff] }
0x2083   :  { %7136 = vmatprep.mubr.msk.f32.mxu0 %vm7653_vm5, %v7652_v26  ;;  %v5797_v10 = vld [vmem:[%s8784_s19 + $0x8] sm:$0xff] }
0x2089   :  { %v5414_v55 = vpop.f32.mrb[60].mxu1 }
0x208a   :  { %v7133_v27 = vpop.f32.mrb[61].mxu1  ;;  %v5415_v23 = vadd.f32 %v8449_v9, %v5414_v55  ;;  %v5659_v9 = vsel %vm163_vm0, %v5655_v37, 0.0  ;;  %v5798_v55 = vld [vmem:[%s8784_s19 + $0x10] sm:$0xff] }
0x208b   :  { %v7418_v27 = vpack.c.bf16 %v5797_v10, %v5796_v19 }
0x208d   :  { %7419 = vmatprep.subr.bf16.mxu1 %v7418_v27 }
0x214d   :  { %v5203_v4 = vpop.f32.mrb[46].mxu0 }
0x214e   :  { %v5207_v5 = vadd.f32 %v5203_v4, %v4759_v40  ;;  %v7100_v56 = vpop.f32.mrb[47].mxu0  ;;  %v5799_v4 = vld [vmem:[%s8784_s19 + $0x18] sm:$0xff] }
0x214f   :  { %v5800_v56 = vld [vmem:[%s8784_s19 + $0x20] sm:$0xff] }
0x2155   :  { %v5344_v6 = vpop.f32.mrb[48].mxu0 }
0x2156   :  { %v5345_v14 = vadd.f32 %v8442_v18, %v5344_v6  ;;  %v7122_v45 = vpop.f32.mrb[49].mxu0  ;;  %v5801_v6 = vld [vmem:[%s8784_s19 + $0x28] sm:$0xff] }
0x2157   :  { %v5802_v45 = vld [vmem:[%s8784_s19 + $0x30] sm:$0xff] }
0x2158   :  { %7135 = vmatpush3.xpose.msk.msra.mxu0 %vm1308_vm6, %v5345_v14  ;;  %v7426_v14 = vpack.c.bf16 %v5801_v6, %v5800_v56 }
0x2159   :  { %7139 = vmatprep.subr.mxu0 %v7652_v26 }
0x215b   :  { %7137 = vmatmul.mubr.msk.f32.vlgmr.msra.gmra.mrb[50].mxu0 %vm1308_vm6, %v5275_v35  ;;  %v5803_v35 = vld [vmem:[%s8784_s19 + $0x38] sm:$0xff] }
0x215c   :  { %7140 = vmatpush3.msra.mxu0 %v5415_v23  ;;  %7141 = vmatprep.mubr.msk.f32.mxu0 %vm7653_vm5, %v7652_v26  ;;  %v7430_v23 = vpack.c.bf16 %v5803_v35, %v5802_v45 }
0x215d   :  { %7411 = vmatprep.subr.bf16.mxu0 %v7410_v61 }
0x222e   :  { %v5490_v12 = vpop.f32.mrb[50].mxu0 }
0x222f   :  { %v5494_v18 = vmul.f32 0.35355338, %v5490_v12  ;;  %v7138_v44 = vpop.f32.mrb[51].mxu0 }
0x2230   :  { %v5807_v44 = vld [vmem:[%s8784_s19 + $0x58] sm:$0xff] }
0x2231   :  { %v5495_v47 = vsel %vm8534_vm10, -1e+09, %v5494_v18  ;;  %v5806_v18 = vld [vmem:[%s8784_s19 + $0x50] sm:$0xff] }
0x2232   :  { %v5496_v1 = vsel %vm1308_vm6, %v5495_v47, -inf }
0x2233   :  { %5497 = vmax.xlane.f32.xlu0 %v5496_v1  ;;  %v5808_v1 = vld [vmem:[%s8784_s19 + $0x60] sm:$0xff] }
0x2237   :  { %5660 = vadd.xlane.f32.xlu0 %v5659_v9 }
0x22c0   :  { %v5498_v20 = vpop.xlane.xlu0 %5497 }
0x22c1   :  { %v5499_v39 = vsub.f32 %v5495_v47, %v5498_v20  ;;  %v7438_v47 = vpack.c.bf16 %v5807_v44, %v5806_v18 }
0x22c3   :  { %v5500_v51 = vmul.f32 1.442695, %v5499_v39 }
0x22c4   :  { %v5661_v46 = vpop.xlane.xlu0 %5660 }
0x22c5   :  { %7574 = vpow2.f32 %v5500_v51  ;;  %v5666_v8 = vmul.f32 0.03125, %v5661_v46 }
0x22c7   :  { %v5668_v15 = vsub.f32 %v5655_v37, %v5666_v8  ;;  %v5809_v37 = vld [vmem:[%s8784_s19 + $0x68] sm:$0xff] }
0x22c8   :  { %v7442_v9 = vpack.c.bf16 %v5809_v37, %v5808_v1  ;;  %v6034_v1 = vld [vmem:[%s8790_s2] sm:$0x3] }
0x22c9   :  { %v5670_v58 = vmul.f32 %v5668_v15, %v5668_v15  ;;  %v6108_v37 = vld [vmem:[%s7830_s4] sm:$0xff] }
0x22cb   :  { %v5672_v33 = vsel %vm163_vm0, %v5670_v58, 0.0 }
0x22cc   :  { %5673 = vadd.xlane.f32.xlu0 %v5672_v33  ;;  %v5810_v33 = vld [vmem:[%s8784_s19 + $0x70] sm:$0xff] }
0x22cf   :  { %v7575_v11 = vpop.eup %7574 }
0x22d0   :  { %v5502_v43 = vsel %vm1308_vm6, %v7575_v11, 0.0 }
0x22d1   :  { %5503 = vadd.xlane.f32.xlu1 %v5502_v43 }
0x2359   :  { %v5674_v17 = vpop.xlane.xlu0 %5673 }
0x235a   :  { %v5678_v22 = vmul.f32 0.03125, %v5674_v17  ;;  %v6416_v17 = vld [vmem:[%s8785_s24] ss:$0 sm:$0xff] }
0x235c   :  { %v5680_v28 = vadd.f32 1e-05, %v5678_v22 }
0x235e   :  { %7576 = vrsqrt.f32 %v5680_v28  ;;  %v5504_v32 = vpop.xlane.xlu1 %5503 }
0x235f   :  { %7578 = vrcp.f32 %v5504_v32 }
0x2368   :  { %v7577_v41 = vpop.eup %7576 }
0x2369   :  { %v7579_v25 = vpop.eup %7578  ;;  %v5684_v40 = vmul.f32 %v7577_v41, %v5668_v15 }
0x236a   :  { %v5506_v21 = vmul.f32 %v7579_v25, %v7575_v11  ;;  %v5811_v11 = vld [vmem:[%s8784_s19 + $0x78] sm:$0xff] }
0x236b   :  { %v5692_v29 = vmul.f32 %v8665_v31, %v5684_v40  ;;  %v7446_v43 = vpack.c.bf16 %v5811_v11, %v5810_v33 }
0x236c   :  { %7142 = vmatmul.mubr.msk.f32.vlgmr.msra.gmra.mrb[52].mxu0 %vm1308_vm6, %v5506_v21 }
0x236d   :  { %v8673_v36 = vadd.f32 %v8668_v50, %v5692_v29  ;;  %7413 = vmatpush3.bf16.msra.mxu0 %v7410_v61  ;;  %v5941_v61 = vld [vmem:[%s8787_s20 + $0x8] sm:$0xff] }
0x236f   :  { %7157 = vmatprep.mubr.msk.f32.mxu0 %vm163_vm0, %v8673_v36 }
0x243f   :  { %v5576_v57 = vpop.f32.mrb[52].mxu0 }
0x2440   :  { %v7143_v2 = vpop.f32.mrb[53].mxu0  ;;  %7147 = vmatmul.mubr.msk.f32.vlgmr.msra.gmra.mrb[62].mxu1 %vm1308_vm6, %v5576_v57 }
0x2441   :  { %7421 = vmatpush3.bf16.msra.mxu1 %v7418_v27 }
0x2513   :  { %v5649_v53 = vpop.f32.mrb[62].mxu1 }
0x2514   :  { %v5653_v60 = vadd.f32 %v5649_v53, %v5207_v5  ;;  %v7148_v34 = vpop.f32.mrb[63].mxu1  ;;  %v7422_v5 = vpack.c.bf16 %v5799_v4, %v5798_v55 }
0x2516   :  { %v5654_v13 = vadd.f32 %v6385_v63, %v5653_v60  ;;  %7423 = vmatprep.subr.bf16.mxu1 %v7422_v5  ;;  %v5804_v63 = vld [vmem:[%s8784_s19 + $0x40] sm:$0xff] }
0x2517   :  { %7425 = vmatpush3.bf16.msra.mxu1 %v7422_v5  ;;  %v7434_v12 = vpack.c.bf16 %v5805_v30, %v5804_v63 }
0x2518   :  { %v5656_v38 = vadd.f32 %v5654_v13, %v8476_v0  ;;  %v5704_v0 = vld [vmem:[%s8783_s14 + $0x10] sm:$0xff]  ;;  %7427 = vmatprep.subr.bf16.mxu1 %v7426_v14 }
0x2519   :  { %v7414_v42 = vpack.c.bf16 %v5705_v3, %v5704_v0  ;;  %v7450_v0 = vpack.c.bf16 %v5941_v61, %v5940_v24  ;;  %v5942_v3 = vld [vmem:[%s8787_s20 + $0x10] sm:$0xff] }
0x251a   :  { %v5662_v59 = vsel %vm163_vm0, %v5656_v38, 0.0 }
0x251b   :  { %5663 = vadd.xlane.f32.xlu1 %v5662_v59  ;;  %7415 = vmatprep.subr.bf16.mxu0 %v7414_v42 }
0x251c   :  { %7417 = vmatpush3.bf16.msra.mxu0 %v7414_v42  ;;  %7429 = vmatpush3.bf16.msra.mxu1 %v7426_v14  ;;  %v5943_v42 = vld [vmem:[%s8787_s20 + $0x18] sm:$0xff]  ;;  %v6420_v14 = vld [vmem:[%s8788_s28] ss:$0 sm:$0xff] }
0x251d   :  { %7431 = vmatprep.subr.bf16.mxu1 %v7430_v23  ;;  %7451 = vmatprep.subr.bf16.mxu0 %v7450_v0  ;;  %v7454_v19 = vpack.c.bf16 %v5943_v42, %v5942_v3 }
0x2520   :  { %7433 = vmatpush3.bf16.msra.mxu1 %v7430_v23  ;;  %v6421_v23 = vld [vmem:[%s8789_s1] ss:$0 sm:$0xff] }
0x2521   :  { %7435 = vmatprep.subr.bf16.mxu1 %v7434_v12 }
0x2524   :  { %7437 = vmatpush3.bf16.msra.mxu1 %v7434_v12 }
0x2525   :  { %7439 = vmatprep.subr.bf16.mxu1 %v7438_v47 }
0x2528   :  { %7441 = vmatpush3.bf16.msra.mxu1 %v7438_v47 }
0x2529   :  { %7443 = vmatprep.subr.bf16.mxu1 %v7442_v9 }
0x252c   :  { %7445 = vmatpush3.bf16.msra.mxu1 %v7442_v9  ;;  %v6109_v9 = vld [vmem:[%s7830_s4 + $0x8] sm:$0xff] }
0x252d   :  { %7447 = vmatprep.subr.bf16.mxu1 %v7446_v43 }
0x2530   :  { %7449 = vmatpush3.bf16.msra.mxu1 %v7446_v43 }
0x25a8   :  { %v5664_v49 = vpop.xlane.xlu1 %5663 }
0x25a9   :  { %v5667_v16 = vmul.f32 0.03125, %v5664_v49 }
0x25ab   :  { %v5669_v52 = vsub.f32 %v5656_v38, %v5667_v16 }
0x25ad   :  { %v5671_v7 = vmul.f32 %v5669_v52, %v5669_v52 }
0x25af   :  { %v5675_v62 = vsel %vm163_vm0, %v5671_v7, 0.0 }
0x25b0   :  { %5676 = vadd.xlane.f32.xlu1 %v5675_v62 }
0x263d   :  { %v5677_v20 = vpop.xlane.xlu1 %5676 }
0x263e   :  { %v5679_v39 = vmul.f32 0.03125, %v5677_v20  ;;  %v7462_v20 = vpack.c.bf16 %v6109_v9, %v6108_v37 }
0x2640   :  { %v5681_v51 = vadd.f32 1e-05, %v5679_v39  ;;  %v6110_v39 = vld [vmem:[%s7830_s4 + $0x10] sm:$0xff] }
0x2642   :  { %7580 = vrsqrt.f32 %v5681_v51  ;;  %v6111_v51 = vld [vmem:[%s7830_s4 + $0x18] sm:$0xff]  ;;  %s7586_s4 = scalar_lea.vmem %s6202_s11, 32 }
0x2643   :  { %p7587_p0 = scmp.ne.s32.totalorder %s6202_s11, %s7586_s4  ;;  %p7592_p2 = scmp.lt.s32.totalorder %s7586_s4, %s7586_s4 }
0x2645   :  { %p7593_p3 = por %p7592_p2, %p7591_p1 }
0x2647   :  { %p7594_p4 = pnand %p7593_p3, %p7587_p0 }
0x264c   :  { %v7581_v46 = vpop.eup %7580 }
0x264d   :  { %v5685_v8 = vmul.f32 %v7581_v46, %v5669_v52  ;;  %v7465_v46 = vpack.c.bf16 %v6111_v51, %v6110_v39 }
0x264f   :  { %v5693_v15 = vmul.f32 %v8665_v31, %v5685_v8  ;;  %v6419_v31 = vld [vmem:[%s8786_s6] ss:$0 sm:$0xff] }
0x2650   :  { %v6422_v8 = vld [vmem:[%s8791_s7] ss:$0 sm:$0xff] }
0x2651   :  { %v5701_v58 = vadd.f32 %v8668_v50, %v5693_v15 }
0x2653   :  { %7158 = vmatmul.mubr.msk.f32.vlgmr.msra.gmra.mrb[54].mxu0 %vm163_vm0, %v5701_v58 }
0x2654   :  { %7453 = vmatpush3.bf16.msra.mxu0 %v7450_v0 }
0x2655   :  { %7455 = vmatprep.subr.bf16.mxu0 %v7454_v19 }
0x2658   :  { %7457 = vmatpush3.bf16.msra.mxu0 %v7454_v19 }
0x2659   :  { %7458 = vmatprep.subr.bf16.mxu0 %v7654_v48 }
0x2726   :  { %v7159_v22 = vpop.f32.mrb[54].mxu0 }
0x2727   :  { %v5791_v28 = vadd.f32 %v7159_v22, %v6416_v17  ;;  %v5785_v32 = vpop.f32.mrb[55].mxu0 }
0x2728   :  { %v5786_v41 = vadd.f32 %v6416_v17, %v5785_v32  ;;  %v6426_v17 = vld [vmem:[%s7835_s12] ss:$0 sm:$0xff] }
0x2729   :  { %v5795_v40 = vmax.f32 %v5791_v28, 0.0 }
0x272a   :  { %v5794_v25 = vmax.f32 %v5786_v41, 0.0 }
0x272c   :  { %7192 = vmatprep.mubr.f32.mxu1 %v5794_v25 }
0x272d   :  { %7193 = vmatmul.mubr.f32.vlgmr.msra.gmra.mrb[64].mxu1 %v5795_v40 }
0x2800   :  { %v7194_v21 = vpop.f32.mrb[64].mxu1 }
0x2801   :  { %v5891_v50 = vadd.f32 %v7194_v21, %v6419_v31  ;;  %v5885_v29 = vpop.f32.mrb[65].mxu1 }
0x2802   :  { %v5886_v57 = vadd.f32 %v6419_v31, %v5885_v29 }
0x2803   :  { %v5895_v2 = vadd.f32 %v5891_v50, %v5701_v58 }
0x2804   :  { %v5894_v53 = vadd.f32 %v5886_v57, %v8673_v36 }
0x2805   :  { %v5901_v60 = vsel %vm163_vm0, %v5895_v2, 0.0 }
0x2806   :  { %5902 = vadd.xlane.f32.xlu1 %v5901_v60  ;;  %v5898_v34 = vsel %vm163_vm0, %v5894_v53, 0.0 }
0x2807   :  { %5899 = vadd.xlane.f32.xlu0 %v5898_v34 }
0x2893   :  { %v5903_v13 = vpop.xlane.xlu1 %5902 }
0x2894   :  { %v5905_v38 = vmul.f32 0.03125, %v5903_v13  ;;  %v5900_v59 = vpop.xlane.xlu0 %5899 }
0x2895   :  { %v5904_v49 = vmul.f32 0.03125, %v5900_v59 }
0x2896   :  { %v5907_v16 = vsub.f32 %v5895_v2, %v5905_v38 }
0x2897   :  { %v5906_v52 = vsub.f32 %v5894_v53, %v5904_v49 }
0x2898   :  { %v5909_v7 = vmul.f32 %v5907_v16, %v5907_v16 }
0x2899   :  { %v5908_v62 = vmul.f32 %v5906_v52, %v5906_v52 }
0x289a   :  { %v5913_v36 = vsel %vm163_vm0, %v5909_v7, 0.0 }
0x289b   :  { %5914 = vadd.xlane.f32.xlu1 %v5913_v36  ;;  %v5910_v54 = vsel %vm163_vm0, %v5908_v62, 0.0 }
0x289c   :  { %5911 = vadd.xlane.f32.xlu0 %v5910_v54 }
0x2928   :  { %v5915_v10 = vpop.xlane.xlu1 %5914 }
0x2929   :  { %v5917_v55 = vmul.f32 0.03125, %v5915_v10  ;;  %v5912_v27 = vpop.xlane.xlu0 %5911 }
0x292a   :  { %v5916_v4 = vmul.f32 0.03125, %v5912_v27 }
0x292b   :  { %v5919_v5 = vadd.f32 1e-05, %v5917_v55 }
0x292c   :  { %v5918_v56 = vadd.f32 1e-05, %v5916_v4 }
0x292d   :  { %7582 = vrsqrt.f32 %v5919_v5 }
0x292e   :  { %7584 = vrsqrt.f32 %v5918_v56 }
0x2937   :  { %v7583_v6 = vpop.eup %7582 }
0x2938   :  { %v7585_v45 = vpop.eup %7584  ;;  %v5923_v35 = vmul.f32 %v7583_v6, %v5907_v16 }
0x2939   :  { %v5922_v63 = vmul.f32 %v7585_v45, %v5906_v52 }
0x293a   :  { %v5931_v30 = vmul.f32 %v6420_v14, %v5923_v35 }
0x293b   :  { %v5930_v12 = vmul.f32 %v6420_v14, %v5922_v63 }
0x293c   :  { %v5939_v18 = vadd.f32 %v6421_v23, %v5931_v30 }
0x293d   :  { %v5938_v44 = vadd.f32 %v6421_v23, %v5930_v12 }
0x293f   :  { %7203 = vmatprep.mubr.msk.f32.mxu0 %vm163_vm0, %v5938_v44  ;;  %v7459_v47 = vpack.c.bf16 %v5939_v18, %v5938_v44 }
0x2940   :  { %7204 = vmatmul.mubr.msk.f32.vlgmr.msra.gmra.mrb[56].mxu0 %vm163_vm0, %v5939_v18 }
0x2941   :  { %7460 = vmatpush3.bf16.msra.mxu0 %v7459_v47  ;;  %7210 = vmatprep.mubr.msk.f32.mxu0 %vm7653_vm5, %v7652_v26 }
0x2942   :  { %7461 = vmatprep.subr.bf16.mxu0 %v7654_v48 }
0x2944   :  { %7211 = vmatmul.mubr.msk.f32.vlgmr.msra.gmra.mrb[58].mxu0 %vm1538_vm7, %v6034_v1 }
0x2945   :  { %7221 = vmatprep.mubr.msk.f32.mxu0 %vm7653_vm5, %v7652_v26  ;;  %7463 = vmatpush3.bf16.msra.mxu0 %v7462_v20 }
0x2946   :  { %7464 = vmatprep.subr.bf16.mxu0 %v7654_v48 }
0x2949   :  { %7466 = vmatpush3.bf16.msra.mxu0 %v7465_v46 }
0x2a13   :  { %v7205_v15 = vpop.f32.mrb[56].mxu0 }
0x2a14   :  { %v6029_v58 = vadd.f32 %v7205_v15, %v6422_v8  ;;  %v6023_v33 = vpop.f32.mrb[57].mxu0 }
0x2a15   :  { %v6024_v11 = vadd.f32 %v6422_v8, %v6023_v33 }
0x2a16   :  { %6033 = vst [vmem:[%s7840_s30 + $0x8] sm:$0xff] %v6029_v58 }
0x2a17   :  { %6032 = vst [vmem:[%s7840_s30] sm:$0xff] %v6024_v11  ;;  %v6104_v26 = vpop.f32.mrb[58].mxu0 }
0x2a18   :  { %v7212_v43 = vpop.f32.mrb[59].mxu0  ;;  %7222 = vmatmul.mubr.msk.f32.vlgmr.msra.gmra.mrb[60].mxu0 %vm163_vm0, %v6104_v26 }
0x2aeb   :  { %v6188_v22 = vpop.f32.mrb[60].mxu0 }
0x2aec   :  { %v6189_v48 = vadd.f32 %v6426_v17, %v6188_v22  ;;  %v7223_v28 = vpop.f32.mrb[61].mxu0 }
0x2aee   :  { %6192 = vst [vmem:[#allocation2] sm:$0x3] %v6189_v48 }
0x2aef   :  { %7597 = shalt.err (!%p7594_p4)
}
0x2af0   :  { %s7598_s30 = scalar_lea.hbm %s7845_s27, 32 }
0x2af1   :  { %p7599_p5 = scmp.ne.s32.totalorder %s7845_s27, %s7598_s30  ;;  %p7602_p6 = scmp.lt.u32.totalorder %s7598_s30, %s7845_s27 }
0x2af3   :  { %p7604_p7 = pnand %p7602_p6, %p7599_p5 }
0x2af5   :  { %7607 = shalt.err (!%p7604_p7)
}
0x2af6   :  { %6204 = dma.vmem_to_hbm [thread:$0]  %s6202_s11, 32, %s7845_s27, [#allocation3]  }
0x2af7   :  { %7608 = dma.done.wait [#allocation3], 32  }
0x2af8   :  { %7609 = vsyncadd [#allocation3], 4294967264 }
0x2af9   :  { %6210 = vsyncpa [#allocation3], 1 }

</bundles_post_ra>
